<compile_context>
chip_gen: v7x
topology: tpu7x:2x2x1
jax: 0.10.0
libtpu: 0.0.40
codegen_flags: <defaults>
</compile_context>

<pallas_src>
import functools
import math

import jax
import jax.numpy as jnp
from jax.experimental import pallas as pl
from jax.experimental.pallas import tpu as pltpu


def _round_up(n, m):
    return ((n + m - 1) // m) * m


def _pad2d(x, rows, cols):
    r, c = x.shape
    if (r, c) == (rows, cols):
        return x
    return jnp.pad(x, ((0, rows - r), (0, cols - c)))


def normalize_sym(A):
    """D^-1/2 A D^-1/2 (PyTorch `normalize(A, symmetric=True)`), guarding deg==0."""
    d = A.sum(axis=1)
    d_inv_sqrt = jnp.where(d > 0.0, jax.lax.rsqrt(jnp.maximum(d, 1e-12)), 0.0)
    return A * d_inv_sqrt[:, None] * d_inv_sqrt[None, :]


def _apply_act(z, activation):
    if activation == "relu":
        return jnp.maximum(z, 0.0)
    if activation == "sigmoid":
        return jax.nn.sigmoid(z)           # f32 elementwise (EUP)
    return z


def _nbytes(shape, dt):
    return math.prod(shape) * jnp.dtype(dt).itemsize


# ------------------------------- Pallas kernels -------------------------------


def _agg_wt_act_kernel(a_ref, x_ref, wt_ref, o_ref, acc_ref, *, activation):
    """One row-block of act((A @ X) @ W^T).   grid = (row blocks, k reduction)."""
    k = pl.program_id(1)

    @pl.when(k == 0)
    def _init():
        acc_ref[...] = jnp.zeros_like(acc_ref)

    # A tile (TM, TK) @ X row-block (TK, F_in) -> f32 accumulate (MXU).
    acc_ref[...] += jnp.dot(a_ref[...], x_ref[...],
                            preferred_element_type=jnp.float32)

    @pl.when(k == pl.num_programs(1) - 1)
    def _finish():
        ax = acc_ref[...].astype(wt_ref.dtype)            # MXU operand dtype
        z = jnp.dot(ax, wt_ref[...], preferred_element_type=jnp.float32)
        o_ref[...] = _apply_act(z, activation).astype(o_ref.dtype)


def _agg_act_kernel(a_ref, y_ref, o_ref, acc_ref, *, activation):
    """One row-block of act(A @ Y) (weights already applied to Y)."""
    k = pl.program_id(1)

    @pl.when(k == 0)
    def _init():
        acc_ref[...] = jnp.zeros_like(acc_ref)

    acc_ref[...] += jnp.dot(a_ref[...], y_ref[...],
                            preferred_element_type=jnp.float32)

    @pl.when(k == pl.num_programs(1) - 1)
    def _finish():
        o_ref[...] = _apply_act(acc_ref[...], activation).astype(o_ref.dtype)


def _feature_transform_kernel(x_ref, wt_ref, y_ref):
    """One row-block of Y = X @ W^T (no reduction grid; F_in fits one tile)."""
    y_ref[...] = jnp.dot(x_ref[...], wt_ref[...],
                         preferred_element_type=jnp.float32).astype(y_ref.dtype)


# ------------------------------ kernel wrappers -------------------------------


def gcn_agg_wt_act(A, X, Wt, activation, *, out_dtype, tm=256, tk=256):
    """act((A @ X) @ Wt) as one tiled pallas_call (used when fusing Wt pays off)."""
    N = A.shape[0]
    F_in = X.shape[1]
    F_out = Wt.shape[1]
    assert A.shape == (N, N) and X.shape[0] == N and Wt.shape[0] == F_in
    assert N % tm == 0 and N % tk == 0
    assert F_in % 128 == 0 and F_out % 128 == 0

    est = (2 * (_nbytes((tm, tk), A.dtype)
                + _nbytes((tk, F_in), X.dtype)
                + _nbytes((F_in, F_out), Wt.dtype)
                + _nbytes((tm, F_out), out_dtype))
           + _nbytes((tm, F_in), jnp.float32))
    vmem_limit = min(2 * est + (1 << 20), 32 * 1024 * 1024)

    kernel = functools.partial(_agg_wt_act_kernel, activation=activation)
    return pl.pallas_call(
        kernel,
        out_shape=jax.ShapeDtypeStruct((N, F_out), out_dtype),
        grid=(N // tm, N // tk),
        in_specs=[
            pl.BlockSpec((tm, tk), lambda i, k: (i, k)),       # A tile
            pl.BlockSpec((tk, F_in), lambda i, k: (k, 0)),     # X row-block
            pl.BlockSpec((F_in, F_out), lambda i, k: (0, 0)),  # Wt resident
        ],
        out_specs=pl.BlockSpec((tm, F_out), lambda i, k: (i, 0)),
        scratch_shapes=[pltpu.VMEM((tm, F_in), jnp.float32)],
        compiler_params=pltpu.CompilerParams(
            dimension_semantics=("parallel", "arbitrary"),
            vmem_limit_bytes=vmem_limit,
        ),
    )(A, X, Wt)


def gcn_agg_act(A, Y, activation, *, out_dtype, tm=256, tk=256):
    """act(A @ Y) as one tiled pallas_call (aggregation at output width)."""
    N = A.shape[0]
    F_out = Y.shape[1]
    assert A.shape == (N, N) and Y.shape[0] == N
    assert N % tm == 0 and N % tk == 0 and F_out % 128 == 0

    est = (2 * (_nbytes((tm, tk), A.dtype)
                + _nbytes((tk, F_out), Y.dtype)
                + _nbytes((tm, F_out), out_dtype))
           + _nbytes((tm, F_out), jnp.float32))
    vmem_limit = min(2 * est + (1 << 20), 32 * 1024 * 1024)

    kernel = functools.partial(_agg_act_kernel, activation=activation)
    return pl.pallas_call(
        kernel,
        out_shape=jax.ShapeDtypeStruct((N, F_out), out_dtype),
        grid=(N // tm, N // tk),
        in_specs=[
            pl.BlockSpec((tm, tk), lambda i, k: (i, k)),       # A tile
            pl.BlockSpec((tk, F_out), lambda i, k: (k, 0)),    # Y row-block
        ],
        out_specs=pl.BlockSpec((tm, F_out), lambda i, k: (i, 0)),
        scratch_shapes=[pltpu.VMEM((tm, F_out), jnp.float32)],
        compiler_params=pltpu.CompilerParams(
            dimension_semantics=("parallel", "arbitrary"),
            vmem_limit_bytes=vmem_limit,
        ),
    )(A, Y)


def feature_transform(X, Wt, *, out_dtype, tm=256):
    """Y = X @ Wt, tiled over rows (F_in <= 768 so the full K fits one tile)."""
    N, F_in = X.shape
    F_out = Wt.shape[1]
    assert Wt.shape[0] == F_in
    assert N % tm == 0 and F_in % 128 == 0 and F_out % 128 == 0

    est = 2 * (_nbytes((tm, F_in), X.dtype)
               + _nbytes((F_in, F_out), Wt.dtype)
               + _nbytes((tm, F_out), out_dtype))
    vmem_limit = min(2 * est + (1 << 20), 32 * 1024 * 1024)

    return pl.pallas_call(
        _feature_transform_kernel,
        out_shape=jax.ShapeDtypeStruct((N, F_out), out_dtype),
        grid=(N // tm,),
        in_specs=[
            pl.BlockSpec((tm, F_in), lambda i: (i, 0)),        # X row-block
            pl.BlockSpec((F_in, F_out), lambda i: (0, 0)),     # Wt resident
        ],
        out_specs=pl.BlockSpec((tm, F_out), lambda i: (i, 0)),
        compiler_params=pltpu.CompilerParams(
            dimension_semantics=("parallel",),
            vmem_limit_bytes=vmem_limit,
        ),
    )(X, Wt)


# ---------------------------------- modules ----------------------------------


class GCNPallas:
    """Z = A X W: fc1->relu, fc2->relu, fc3->sigmoid.

    nn.Dropout(p=0.2) is identity at inference; the LayerNorm/tanh modules in
    the PyTorch __init__ are unused in forward and omitted.
    """

    def __init__(self, A, dim_in, dim_out, key, *,
                 compute_dtype=jnp.bfloat16, tm=256, tk=256):
        self.dim_in = int(dim_in)
        self.dim_out = int(dim_out)
        self.compute_dtype = compute_dtype
        self.tm, self.tk = int(tm), int(tk)

        A = jnp.asarray(A, jnp.float32)
        self.N = A.shape[0]
        self.A_norm = normalize_sym(A)                       # f32 master copy

        dh = self.dim_in // 2
        k1, k2, k3 = jax.random.split(key, 3)
        # nn.Linear(in, out, bias=False) weights in PyTorch (out, in) layout.
        self.W1 = 0.05 * jax.random.normal(k1, (self.dim_in, self.dim_in), jnp.float32)
        self.W2 = 0.05 * jax.random.normal(k2, (dh, self.dim_in), jnp.float32)
        self.W3 = 0.05 * jax.random.normal(k3, (self.dim_out, dh), jnp.float32)

        # ---- one-time layout plumbing (hoisted out of forward) --------------
        self.N_pad = _round_up(self.N, math.lcm(self.tm, self.tk))
        self.F1 = _round_up(self.dim_in, 128)   # lane-dense feature widths
        self.F2 = _round_up(dh, 128)
        self.F3 = _round_up(self.dim_out, 128)

        cd = compute_dtype
        self.A_pad = _pad2d(self.A_norm, self.N_pad, self.N_pad).astype(cd)
        self.W1t = _pad2d(self.W1.T, self.F1, self.F1).astype(cd)   # (in, out)
        self.W2t = _pad2d(self.W2.T, self.F1, self.F2).astype(cd)
        self.W3t = _pad2d(self.W3.T, self.F2, self.F3).astype(cd)

    def __call__(self, X):
        X = jnp.asarray(X, jnp.float32)
        assert X.shape == (self.N, self.dim_in), X.shape
        cd = self.compute_dtype
        Xp = _pad2d(X, self.N_pad, self.F1).astype(cd)

        # Layer 1 (768 -> 768): fused act((A @ X) @ W1^T), single tiled call.
        h = gcn_agg_wt_act(self.A_pad, Xp, self.W1t, "relu",
                           out_dtype=cd, tm=self.tm, tk=self.tk)

        # Layers 2/3: re-associate as act(A @ (h @ W^T)) so the O(N^2)
        # aggregation runs at the narrower output width (384 / 128 lanes).
        y = feature_transform(h, self.W2t, out_dtype=cd, tm=self.tm)
        h = gcn_agg_act(self.A_pad, y, "relu",
                        out_dtype=cd, tm=self.tm, tk=self.tk)

        y = feature_transform(h, self.W3t, out_dtype=cd, tm=self.tm)
        h = gcn_agg_act(self.A_pad, y, "sigmoid",
                        out_dtype=jnp.float32, tm=self.tm, tk=self.tk)
        return h[: self.N, : self.dim_out]


class KnowledgeGraphPallas:
    """forward(movie_ids) = GCN(self.x)[movie_ids].

    conv1/linear1/linear2/flatten (and vocab_size/input_embedding_dim/
    tnn_out_dim) are constructed in the PyTorch __init__ but never used in
    forward, so they are omitted here.
    """

    def __init__(self, vocab_size, A, x, graph_out_size,
                 input_embedding_dim=60, tnn_out_dim=10, *,
                 key, compute_dtype=jnp.bfloat16, tm=256, tk=256):
        del vocab_size, input_embedding_dim, tnn_out_dim    # dead in forward
        self.x = jnp.asarray(x, jnp.float32)
        # PyTorch spec hardcodes GCN(A, 768, graph_out_size); dim_in == x.shape[1].
        self.gcn = GCNPallas(A, self.x.shape[1], graph_out_size, key,
                             compute_dtype=compute_dtype, tm=tm, tk=tk)

    def __call__(self, movie_ids):
        h = self.gcn(self.x)                                 # (N, graph_out_size)
        # TODO(synk): tiny dynamic row-gather x[movie_ids] left to XLA's
        # index-select; a Pallas scalar-prefetch gather only adds per-row
        # grid-step overhead at this size.
        return jnp.take(h, jnp.asarray(movie_ids, jnp.int32), axis=0)


# -------------------------------- references ---------------------------------


def _reference_forward_exact(kg, movie_ids):
    """Pure f32 reference in the exact PyTorch op order: act((A X) W^T)."""
    gcn = kg.gcn
    A, X = gcn.A_norm, kg.x
    h = jnp.maximum(jnp.dot(jnp.dot(A, X), gcn.W1.T), 0.0)
    h = jnp.maximum(jnp.dot(jnp.dot(A, h), gcn.W2.T), 0.0)
    h = jax.nn.sigmoid(jnp.dot(jnp.dot(A, h), gcn.W3.T))
    return h[jnp.asarray(movie_ids, jnp.int32)]


def _reference_forward_matched(kg, movie_ids, cd):
    """Pure-JAX reference mirroring the kernel's op order and operand dtypes."""
    gcn = kg.gcn
    A, X = gcn.A_norm, kg.x

    def mm(a, b):
        return jnp.dot(a.astype(cd), b.astype(cd),
                       preferred_element_type=jnp.float32)

    h = jnp.maximum(mm(mm(A, X), gcn.W1.T), 0.0).astype(cd)   # layer 1 (fused)
    y = mm(h, gcn.W2.T).astype(cd)                            # layer 2 (reassoc.)
    h = jnp.maximum(mm(A, y), 0.0).astype(cd)
    y = mm(h, gcn.W3.T).astype(cd)                            # layer 3 (reassoc.)
    h = jax.nn.sigmoid(mm(A, y))
    return h[jnp.asarray(movie_ids, jnp.int32)].astype(jnp.float32)


# ----------------------------------- demo ------------------------------------


if __name__ == "__main__":
    key = jax.random.PRNGKey(0)
    k_a, k_x, k_w, k_ids = jax.random.split(key, 4)

    N = 512                 # graph nodes
    dim_in = 768            # node-feature width (hardcoded in the PyTorch spec)
    graph_out_size = 8      # GCN / KnowledgeGraph output width
    num_ids = 5

    # Sparse random symmetric adjacency with self-loops.
    raw = (jax.random.uniform(k_a, (N, N)) < 0.02).astype(jnp.float32)
    A = jnp.clip(raw + raw.T + jnp.eye(N, dtype=jnp.float32), 0.0, 1.0)
    x_feat = jax.random.normal(k_x, (N, dim_in), jnp.float32)
    movie_ids = jax.random.randint(k_ids, (num_ids,), 0, N)

    # Optimized path: bf16 MXU operands, f32 accumulation (v6e/v7x friendly).
    kg_bf16 = KnowledgeGraphPallas(vocab_size=1000, A=A, x=x_feat,
                                   graph_out_size=graph_out_size, key=k_w,
                                   compute_dtype=jnp.bfloat16)
    out_bf16 = jax.block_until_ready(kg_bf16(movie_ids))

    # Exact-semantics path: f32 operands everywhere.
    kg_f32 = KnowledgeGraphPallas(vocab_size=1000, A=A, x=x_feat,
                                  graph_out_size=graph_out_size, key=k_w,
                                  compute_dtype=jnp.float32)
    out_f32 = jax.block_until_ready(kg_f32(movie_ids))

    ref_exact = _reference_forward_exact(kg_f32, movie_ids)
    ref_f32_matched = _reference_forward_matched(kg_f32, movie_ids, jnp.float32)
    ref_bf16_matched = _reference_forward_matched(kg_bf16, movie_ids, jnp.bfloat16)

    assert out_f32.shape == (num_ids, graph_out_size), out_f32.shape
    assert out_bf16.shape == (num_ids, graph_out_size), out_bf16.shape
    # f32 kernel vs matched-order f32 reference (tight) and exact torch-order
    # f32 reference (loose: re-association of layers 2/3 only).
    assert jnp.allclose(out_f32, ref_f32_matched, atol=1e-4, rtol=1e-4), "f32 mismatch"
    assert jnp.allclose(out_f32, ref_exact, atol=2e-3, rtol=2e-3), "f32 vs exact mismatch"
    # bf16 kernel vs matched-precision (bf16-operand / f32-accumulate) reference.
    assert jnp.allclose(out_bf16, ref_bf16_matched, atol=5e-3, rtol=0.0), "bf16 mismatch"
    # bf16 kernel stays close to exact f32 semantics (loose sanity bound).
    assert jnp.allclose(out_bf16, ref_exact, atol=1e-1, rtol=0.0), "bf16 drift"

    print("KERNEL_OK")
</pallas_src>

<mosaic_0001>
module attributes {stable_mosaic.version = 11 : i64} {
  func.func @_agg_wt_act_kernel(%arg0: i32, %arg1: i32, %arg2: memref<256x256xbf16, #tpu.memory_space<vmem>>, %arg3: memref<256x768xbf16, #tpu.memory_space<vmem>>, %arg4: memref<768x768xbf16, #tpu.memory_space<vmem>>, %arg5: memref<256x768xbf16, #tpu.memory_space<vmem>>, %arg6: memref<256x768xf32, #tpu.memory_space<vmem>>) attributes {dimension_semantics = [#tpu.dimension_semantics<parallel>, #tpu.dimension_semantics<arbitrary>], iteration_bounds = array<i64: 2, 2>, scalar_prefetch = 0 : i64, scratch_operands = 1 : i64, tpu.core_type = #tpu.core_type<tc>, window_params = [{transform_indices = @transform_0, window_bounds = array<i64: 256, 256>}, {transform_indices = @transform_1, window_bounds = array<i64: 256, 768>}, {pipeline_mode = #tpu.pipeline_mode<synchronous>, transform_indices = @transform_2, window_bounds = array<i64: 768, 768>}, {transform_indices = @transform_3, window_bounds = array<i64: 256, 768>}]} {
    %c0_i32 = arith.constant 0 : i32
    %0 = arith.cmpi eq, %arg1, %c0_i32 : i32
    %1 = arith.extui %0 : i1 to i32
    %c0_i32_0 = arith.constant 0 : i32
    %2 = arith.cmpi ne, %1, %c0_i32_0 : i32
    scf.if %2 {
      %cst_9 = arith.constant 0.000000e+00 : f32
      %12 = vector.broadcast %cst_9 : f32 to vector<256x768xf32>
      %c0_10 = arith.constant 0 : index
      %c0_11 = arith.constant 0 : index
      %13 = vector.load %arg6[%c0_10, %c0_11] : memref<256x768xf32, #tpu.memory_space<vmem>>, vector<256x768xf32>
      tpu.vector_store %arg6[%c0_10, %c0_11], %12 {strides = array<i32>} : memref<256x768xf32, #tpu.memory_space<vmem>>, vector<256x768xf32>,
    } else {
    }
    %c0 = arith.constant 0 : index
    %c0_1 = arith.constant 0 : index
    %3 = vector.load %arg6[%c0, %c0_1] : memref<256x768xf32, #tpu.memory_space<vmem>>, vector<256x768xf32>
    %c0_2 = arith.constant 0 : index
    %c0_3 = arith.constant 0 : index
    %4 = vector.load %arg2[%c0_2, %c0_3] : memref<256x256xbf16, #tpu.memory_space<vmem>>, vector<256x256xbf16>
    %c0_4 = arith.constant 0 : index
    %c0_5 = arith.constant 0 : index
    %5 = vector.load %arg3[%c0_4, %c0_5] : memref<256x768xbf16, #tpu.memory_space<vmem>>, vector<256x768xbf16>
    %cst = arith.constant dense<0.000000e+00> : vector<256x768xf32>
    %6 = tpu.matmul %4, %5, %cst {dimension_numbers = #tpu.dot_dimension_numbers<[1], [0], [0], [1], [0, 0, 1, 1], [], []>} : vector<256x256xbf16>, vector<256x768xbf16>, vector<256x768xf32> -> vector<256x768xf32>
    %7 = arith.addf %3, %6 : vector<256x768xf32>
    %c0_6 = arith.constant 0 : index
    %c0_7 = arith.constant 0 : index
    %8 = vector.load %arg6[%c0_6, %c0_7] : memref<256x768xf32, #tpu.memory_space<vmem>>, vector<256x768xf32>
    tpu.vector_store %arg6[%c0_6, %c0_7], %7 {strides = array<i32>} : memref<256x768xf32, #tpu.memory_space<vmem>>, vector<256x768xf32>,
    %c1_i32 = arith.constant 1 : i32
    %9 = arith.cmpi eq, %arg1, %c1_i32 : i32
    %10 = arith.extui %9 : i1 to i32
    %c0_i32_8 = arith.constant 0 : i32
    %11 = arith.cmpi ne, %10, %c0_i32_8 : i32
    scf.if %11 {
      %c0_9 = arith.constant 0 : index
      %c0_10 = arith.constant 0 : index
      %12 = vector.load %arg6[%c0_9, %c0_10] : memref<256x768xf32, #tpu.memory_space<vmem>>, vector<256x768xf32>
      %13 = arith.truncf %12 : vector<256x768xf32> to vector<256x768xbf16>
      %c0_11 = arith.constant 0 : index
      %c0_12 = arith.constant 0 : index
      %14 = vector.load %arg4[%c0_11, %c0_12] : memref<768x768xbf16, #tpu.memory_space<vmem>>, vector<768x768xbf16>
      %cst_13 = arith.constant dense<0.000000e+00> : vector<256x768xf32>
      %15 = tpu.matmul %13, %14, %cst_13 {dimension_numbers = #tpu.dot_dimension_numbers<[1], [0], [0], [1], [0, 0, 1, 1], [], []>} : vector<256x768xbf16>, vector<768x768xbf16>, vector<256x768xf32> -> vector<256x768xf32>
      %cst_14 = arith.constant 0.000000e+00 : f32
      %16 = vector.broadcast %cst_14 : f32 to vector<256x768xf32>
      %17 = arith.maximumf %15, %16 : vector<256x768xf32>
      %18 = arith.truncf %17 : vector<256x768xf32> to vector<256x768xbf16>
      %c0_15 = arith.constant 0 : index
      %c0_16 = arith.constant 0 : index
      %19 = vector.load %arg5[%c0_15, %c0_16] : memref<256x768xbf16, #tpu.memory_space<vmem>>, vector<256x768xbf16>
      tpu.vector_store %arg5[%c0_15, %c0_16], %18 {strides = array<i32>} : memref<256x768xbf16, #tpu.memory_space<vmem>>, vector<256x768xbf16>,
    } else {
    }
    return
  }
  func.func @transform_0(%arg0: i32, %arg1: i32) -> (i32, i32) {
    %c0_i32 = arith.constant 0 : i32
    return %arg0, %arg1 : i32, i32
  }
  func.func @transform_1(%arg0: i32, %arg1: i32) -> (i32, i32) {
    %c0_i32 = arith.constant 0 : i32
    %c0_i32_0 = arith.constant 0 : i32
    return %arg1, %c0_i32 : i32, i32
  }
  func.func @transform_2(%arg0: i32, %arg1: i32) -> (i32, i32) {
    %c0_i32 = arith.constant 0 : i32
    %c0_i32_0 = arith.constant 0 : i32
    %c0_i32_1 = arith.constant 0 : i32
    return %c0_i32, %c0_i32_0 : i32, i32
  }
  func.func @transform_3(%arg0: i32, %arg1: i32) -> (i32, i32) {
    %c0_i32 = arith.constant 0 : i32
    %c0_i32_0 = arith.constant 0 : i32
    return %arg0, %c0_i32 : i32, i32
  }
}

</mosaic_0001>

<bundles_post_ra>
// kernel: tpu_custom_call.1
= control target key start
LH: loop header
LB: loop body
LE: loop exit
PB: predicated region body
PF: predicated region fallthrough
CT: control target
= control target key end

     0   :  { %s10928_s0 = inlined_call_operand.hbm [shape: bf16[512,512], index: 0, kind: input, shape index: {}]   ;;  %s10929_s1 = inlined_call_operand.hbm [shape: bf16[512,768], index: 1, kind: input, shape index: {}]   ;;  %s10930_s2 = inlined_call_operand.hbm [shape: bf16[768,768], index: 2, kind: input, shape index: {}]   ;;  %s10931_s3 = inlined_call_operand.hbm [shape: bf16[512,768], index: 3, kind: output, shape index: {}]  }
   0x1   :  { %11060 = sst [smem:[#allocation77_spill]] %s10930_s2 }
   0x2   :  { %11061 = sst [smem:[#allocation78_spill]] %s10931_s3 }
   0x3   :  { %8 = vsyncpa [#allocation4], 0 }
   0x4   :  { %10 = vsyncpa [#allocation4 + $0x1], 0 }
   0x5   :  { %11 = vsyncpa [#allocation7], 0 }
   0x6   :  { %13 = vsyncpa [#allocation7 + $0x1], 0 }
   0x7   :  { %14 = vsyncpa [#allocation5], 0 }
   0x8   :  { %16 = vsyncpa [#allocation5 + $0x1], 0  ;;  %s9274_s12 = smov 0   ;;  %s9276_s13 = smov 0  }
   0x9   :  { %s9278_s14 = smov 0   ;;  %s9280_s15 = smov 0  }
   0xa   :  { %s9282_s16 = smov 0   ;;  %s9284_s17 = smov 0  }
   0xb   :  { %s9286_s18 = smov 0   ;;  %s9288_s19 = smov 0  }
   0xc   :  { %s9290_s20 = smov 0   ;;  %s9292_s21 = smov 0  }
   0xd   :  { %s9294_s22 = smov 0   ;;  %s9296_s23 = smov 0  }
   0xe   :  { %s9298_s24 = smov 0   ;;  %s9300_s25 = smov 0  }
   0xf LB: > { %11062 = sst [smem:[#allocation14_spill]] %s9188_s12  ;;  %s9341_s26 = sadd.s32 4294967295, %s9240_s25   ;;  %s9240_s25 = sphi %s9300_s25, %s22_s25   ;;  %s9236_s24 = sphi %s9298_s24, %s11228_s24   ;;  %s9232_s23 = sphi %s9296_s23, %s11227_s23   ;;  %s9228_s22 = sphi %s9294_s22, %s11226_s22   ;;  %s9224_s21 = sphi %s9292_s21, %s11225_s21   ;;  %s9220_s20 = sphi %s9290_s20, %s11224_s20   ;;  %s9216_s19 = sphi %s9288_s19, %s11223_s19   ;;  %s9212_s18 = sphi %s9286_s18, %s11222_s18   ;;  %s9208_s17 = sphi %s9284_s17, %s11221_s17   ;;  %s9204_s16 = sphi %s9282_s16, %s11220_s16   ;;  %s9200_s15 = sphi %s9280_s15, %s11219_s15   ;;  %s9196_s14 = sphi %s9278_s14, %s11218_s14   ;;  %s9192_s13 = sphi %s9276_s13, %s11217_s13   ;;  %s9188_s12 = sphi %s9274_s12, %s11216_s12  }
  0x10   : > { %11063 = sst [smem:[#allocation15_spill]] %s9192_s13  ;;  %s7140_s27 = sadd.s32 4294967294, %s9240_s25  }
  0x11   : > { %11064 = sst [smem:[#allocation16_spill]] %s9224_s21  ;;  %p56_p0 = scmp.ne.s32.totalorder %s9216_s19, %s9212_s18 }
  0x12   : > { %11065 = sst [smem:[#allocation17_spill]] %s9228_s22  ;;  %p10933_p1 = scmp.eq.s32.totalorder %s9341_s26, 0 }
  0x13   : > { %11066 = sst [smem:[#allocation18_spill]] %s9341_s26  ;;  %p82_p2 = scmp.ne.s32.totalorder %s9204_s16, %s9200_s15 }
  0x14   : > { %p9350_p3 = por %p10933_p1, %p56_p0  ;;  %p126_p4 = scmp.ne.s32.totalorder %s9196_s14, %s9192_s13 }
  0x15   : > { %p9358_p5 = por %p82_p2, %p10933_p1  ;;  %p127_p6 = scmp.eq.s32.totalorder %s9341_s26, 3 }
  0x16   : > { %s11067_s29 = scalar_select %p9350_p3, 1, 0 }
  0x17   : > { %s11068_s30 = scalar_select %p9358_p5, 1, 0 }
  0x18   : > { %p132_p7 = scmp.ne.s32.totalorder %s9192_s13, %s9188_s12  ;;  %p133_p8 = scmp.eq.s32.totalorder %s7140_s27, 3 }
  0x19   : > { %11069 = sst [smem:[#allocation19_spill]] %s11068_s30  ;;  %p9365_p9 = por %p127_p6, %p126_p4 }
  0x1a   : > { %p7141_p10 = scmp.ge.s32.totalorder %s9240_s25, 1  ;;  %p9370_p11 = por %p133_p8, %p132_p7 }
  0x1b   : > { %s11070_s4 = scalar_select %p9365_p9, 1, 0 }
  0x1c   : > { %s11072_s5 = scalar_select %p9370_p11, 1, 0 }
  0x1d   : > { %11071 = sst [smem:[#allocation20_spill]] %s11070_s4  ;;  %p140_p12 = scmp.lt.s32.totalorder %s9240_s25, 5 }
  0x1e   : > { %11073 = sst [smem:[#allocation21_spill]] %s11072_s5  ;;  %s9242_s7 = smov [#allocation8]  }
  0x1f   : > { %p9375_p13 = pnand %p7141_p10, %p140_p12  ;;  %s152_s8 = sshll.u32 %s9242_s7, 4  ;;  %s153_s8 = int_to_ptr.vmem [resolvable:$true] %s152_s8 }
  0x20   : > { %s11076_s2 = sld [smem:[#allocation77_spill]] }
  0x21   : > { %s11074_s6 = scalar_select %p9375_p13, 1, 0 }
  0x22   : > { %p8234_p0 = pneg %p9375_p13 }
  0x24   : > { %p9383_p2 = pnand %p8234_p0, %p10933_p1 }
  0x26   : > { %s8998_s15 = scalar_lea.hbm %s11076_s2, 36864  ;;  %p9000_p6 = pneg %p9383_p2 }
  0x27   : > { %p8999_p4 = scmp.ne.s32.totalorder %s11076_s2, %s8998_s15  ;;  %p9005_p10 = scmp.lt.u32.totalorder %s8998_s15, %s11076_s2 }
  0x29   : > { %p9001_p7 = pnand %p9000_p6, %p8999_p4 }
  0x2b   : > { %p9002_p8 = pneg %p9001_p7 }
  0x2d   : > { %p9007_p12 = pnand %p9005_p10, %p9002_p8 }
  0x2f   : > { %9010 = shalt.err (!%p9007_p12)
}
  0x30   : > { %s9011_s5 = scalar_lea.vmem %s153_s8, 36864  ;;  %p9019_p9 = scmp.lt.s32.totalorder %s153_s8, %s153_s8 }
  0x31   : > { %p9012_p0 = scmp.ne.s32.totalorder %s153_s8, %s9011_s5  ;;  %p9020_p5 = scmp.lt.s32.totalorder %s9011_s5, %s9011_s5 }
  0x33   : > { %p9014_p1 = pnand %p9012_p0, %p9000_p6  ;;  %p9021_p3 = por %p9020_p5, %p9019_p9 }
  0x35   : > { %p9015_p11 = pneg %p9014_p1 }
  0x37   : > { %p9022_p13 = pnand %p9021_p3, %p9015_p11 }
  0x39   : > { %9025 = shalt.err (!%p9022_p13)
}
  0x3a   : > { %s10938_s10 = smov 384   ;;  %s10939_s28 = smov 24  }
  0x3b   : > { %8237 = dma.hbm_to_vmem [thread:$0]  (!%p9383_p2), %s11076_s2, 36864, %s153_s8, [#allocation7], %s10938_s10, %s10938_s10, %s10939_s28  }
  0x3c   : > { %s31_s15 = sadd.s32 1, %s9232_s23  ;;  %s34_s18 = sadd.s32 1, %s9236_s24 }
  0x3d   : > { %p32_p1 = scmp.ge.s32.totalorder %s31_s15, 2  ;;  %s43_s27 = sadd.s32 1, %s9220_s20 }
  0x3e   : > { %p50_p3 = scmp.ne.s32.totalorder %s9220_s20, %s9216_s19  ;;  %p10953_p5 = scmp.eq.s32.totalorder %s9240_s25, 0 }
  0x3f   : > { %s11230_s15 = smov (%p32_p1, %s31_s15), 0  ;;  %s11232_s18 = smov (!%p32_p1, %s34_s18), %s9236_s24 }
  0x40   : > { %11077 = sst [smem:[#allocation22_spill]] %s11230_s15  ;;  %s9416_s9 = ssub.s32 %s9232_s23, %s11230_s15 }
  0x41   : > { %p36_p9 = scmp.ge.s32.totalorder %s11232_s18, 2  ;;  %p67_p11 = scmp.eq.s32.totalorder %s9416_s9, 0 }
  0x42   : > { %p9422_p13 = por %p10953_p5, %p50_p3  ;;  %p10952_p2 = scmp.lt.s32.totalorder %s9240_s25, 4 }
  0x43   : > { %s11234_s18 = smov (%p36_p9, %s11232_s18), 0  ;;  %s166_s7 = sand.u32 1, %s9220_s20  }
  0x44   : > { %11079 = sst [smem:[#allocation23_spill]] %s11234_s18  ;;  %s7146_s5 = sshll.u32 %s9232_s23, 1 }
  0x45   : > { %s38_s11 = ssub.s32 %s9236_s24, %s11234_s18  ;;  %s7144_s28 = sshll.u32 %s166_s7, 8 }
  0x46   : > { %s40_s10 = sor.u32 %s9416_s9, %s38_s11  ;;  %p114_p4 = scmp.eq.s32.totalorder %s38_s11, 0 }
  0x47   : > { %p41_p6 = scmp.eq.s32.totalorder %s40_s10, 0  ;;  %s11080_s2 = sadd.s32 1, %s9196_s14 }
  0x48   : > { %s9437_s15 = scalar_select %p114_p4, %s9196_s14, %s11080_s2  }
  0x49   : > { %s9440_s12 = scalar_select %p41_p6, %s9220_s20, %s43_s27  }
  0x4a   : > { %s7674_s3 = sshll.u32 %s9236_s24, 7  ;;  %s170_s22 = scalar_lea.vmem [#allocation3], %s7144_s28 }
  0x4b   : > { %s177_s4 = sadd.s32 %s7674_s3, %s7146_s5  ;;  %s180_s21 = sshll.u32 %s170_s22, 4  ;;  %s9443_s21 = int_to_ptr.vmem [resolvable:$true] %s180_s21 }
  0x4c   : > { %s7148_s13 = sshll.u32 %s177_s4, 6  ;;  %p9454_p7 = pnand %p10952_p2, %p9422_p13 }
  0x4d   : > { %s9448_s18 = scalar_lea.hbm %s10928_s0, %s7148_s13  ;;  %s9458_s3 = scalar_lea.sflag [#allocation4], %s166_s7 }
  0x4e   : > { %s9026_s22 = scalar_lea.hbm %s9448_s18, 4096  ;;  %p9028_p10 = pneg %p9454_p7 }
  0x4f   : > { %p9027_p8 = scmp.ne.s32.totalorder %s9448_s18, %s9026_s22  ;;  %s9031_s30 = scalar_lea.hbm %s10928_s0, 16384 }
  0x50   : > { %p9032_p1 = scmp.lt.u32.totalorder %s9448_s18, %s10928_s0  ;;  %p9033_p3 = scmp.lt.u32.totalorder %s9031_s30, %s9026_s22 }
  0x51   : > { %p9029_p12 = pnand %p9028_p10, %p9027_p8  ;;  %p9035_p13 = scmp.lt.u32.totalorder %s9026_s22, %s9448_s18 }
  0x52   : > { %p9034_p9 = por %p9033_p3, %p9032_p1 }
  0x53   : > { %p9030_p0 = pneg %p9029_p12 }
  0x54   : > { %p9036_p4 = por %p9035_p13, %p9034_p9 }
  0x56   : > { %p9037_p6 = pnand %p9036_p4, %p9030_p0 }
  0x58   : > { %9040 = shalt.err (!%p9037_p6)
}
  0x59   : > { %s9041_s28 = scalar_lea.vmem %s9443_s21, 4096  ;;  %s9245_s27 = smov [#allocation3]  }
  0x5a   : > { %p9042_p8 = scmp.ne.s32.totalorder %s9443_s21, %s9041_s28  ;;  %s9046_s8 = sshll.u32 %s9245_s27, 4  ;;  %s9047_s8 = int_to_ptr.vmem [resolvable:$false] %s9046_s8 }
  0x5b   : > { %s9048_s7 = scalar_lea.vmem %s9047_s8, 8192  ;;  %p9049_p5 = scmp.lt.s32.totalorder %s9443_s21, %s9047_s8 }
  0x5c   : > { %p9044_p12 = pnand %p9042_p8, %p9028_p10  ;;  %p9050_p1 = scmp.lt.s32.totalorder %s9048_s7, %s9041_s28 }
  0x5e   : > { %p9045_p2 = pneg %p9044_p12  ;;  %p9051_p3 = por %p9050_p1, %p9049_p5 }
  0x60   : > { %p9052_p9 = pnand %p9051_p3, %p9045_p2 }
  0x62   : > { %9055 = shalt.err (!%p9052_p9)
}
  0x63   : > { %s9246_s5 = smov 256   ;;  %s9247_s11 = smov 128  }
  0x64   : > { %s9248_s22 = smov 8   ;;  %s190_s13 = sand.u32 1, %s9240_s25  }
  0x65   : > { %8241 = dma.hbm_to_vmem [thread:$0]  (!%p9454_p7), %s9448_s18, 4096, %s9443_s21, %s9458_s3, %s9246_s5, %s9247_s11, %s9248_s22  }
  0x66   : > { %s69_s26 = sadd.s32 1, %s9208_s17  ;;  %p76_p5 = scmp.ne.s32.totalorder %s9208_s17, %s9204_s16 }
  0x67   : > { %s9493_s30 = scalar_select %p67_p11, %s9208_s17, %s69_s26  }
  0x68   : > { %p11082_p2 = scmp.eq.s32.totalorder %s9240_s25, 0  ;;  %s192_s4 = sand.u32 1, %s9208_s17  }
  0x69   : > { %s8219_s10 = smul.u32 768, %s192_s4  ;;  %p11083_p0 = scmp.lt.s32.totalorder %s9240_s25, 4 }
  0x6a   : > { %p78_p10 = por %p76_p5, %p11082_p2  ;;  %s8220_s28 = smul.u32 12288, %s9232_s23 }
  0x6b   : > { %s194_s18 = scalar_lea.vmem [#allocation6], %s8219_s10  ;;  %s9512_s2 = scalar_lea.sflag [#allocation7], %s190_s13 }
  0x6c   : > { %p9501_p13 = pnand %p11083_p0, %p78_p10  ;;  %s9508_s21 = scalar_lea.hbm %s10929_s1, %s8220_s28 }
  0x6d   : > { %s202_s9 = sshll.u32 %s194_s18, 4  ;;  %s9056_s3 = scalar_lea.hbm %s9508_s21, 12288  ;;  %s9510_s9 = int_to_ptr.vmem [resolvable:$true] %s202_s9 }
  0x6e   : > { %p9057_p11 = scmp.ne.s32.totalorder %s9508_s21, %s9056_s3  ;;  %p9058_p7 = pneg %p9501_p13 }
  0x6f   : > { %s9061_s22 = scalar_lea.hbm %s10929_s1, 24576  ;;  %p9062_p8 = scmp.lt.u32.totalorder %s9508_s21, %s10929_s1 }
  0x70   : > { %p9059_p4 = pnand %p9058_p7, %p9057_p11  ;;  %p9063_p12 = scmp.lt.u32.totalorder %s9061_s22, %s9056_s3 }
  0x71   : > { %p9065_p3 = scmp.lt.u32.totalorder %s9056_s3, %s9508_s21 }
  0x72   : > { %p9060_p6 = pneg %p9059_p4  ;;  %p9064_p1 = por %p9063_p12, %p9062_p8 }
  0x74   : > { %p9066_p9 = por %p9065_p3, %p9064_p1 }
  0x76   : > { %p9067_p5 = pnand %p9066_p9, %p9060_p6 }
  0x78   : > { %9070 = shalt.err (!%p9067_p5)
}
  0x79   : > { %s9071_s13 = scalar_lea.vmem %s9510_s9, 12288  ;;  %s9249_s10 = smov [#allocation6]  }
  0x7a   : > { %p9072_p2 = scmp.ne.s32.totalorder %s9510_s9, %s9071_s13  ;;  %s9076_s28 = sshll.u32 %s9249_s10, 4  ;;  %s9077_s28 = int_to_ptr.vmem [resolvable:$false] %s9076_s28 }
  0x7b   : > { %s9078_s8 = scalar_lea.vmem %s9077_s28, 24576  ;;  %p9079_p11 = scmp.lt.s32.totalorder %s9510_s9, %s9077_s28 }
  0x7c   : > { %p9074_p10 = pnand %p9072_p2, %p9058_p7  ;;  %p9080_p4 = scmp.lt.s32.totalorder %s9078_s8, %s9071_s13 }
  0x7e   : > { %p9075_p0 = pneg %p9074_p10  ;;  %p9081_p8 = por %p9080_p4, %p9079_p11 }
  0x80   : > { %p9082_p12 = pnand %p9081_p8, %p9075_p0 }
  0x82   : > { %9085 = shalt.err (!%p9082_p12)
}
  0x83   : > { %s11085_s7 = smov 24   ;;  %s11086_s18 = smov 384  }
  0x84   : > { %8244 = dma.hbm_to_vmem [thread:$0]  (!%p9501_p13), %s9508_s21, 12288, %s9510_s9, %s9512_s2, %s11086_s18, %s11086_s18, %s11085_s7  }
  0x85   : > { %p11087_p7 = scmp.ne.s32.totalorder %s11074_s6, 0 }
  0x86   : > { %s216_s3 = sand.u32 (!%p11087_p7), 1, %s9216_s19   ;;  %p11088_p6 = scmp.ne.s32.totalorder (!%p11087_p7), %s11067_s29, 0 }
  0x87   : > { %214 = sbr.rel (%p11087_p7) target bundleno = 1608 (0x648), region = 32  ;;  %s7153_s5 = sshll.u32 (!%p11087_p7), %s216_s3, 8 }
  0x88   : > { %s217_s11 = scalar_lea.sflag (!%p11087_p7), [#allocation4], %s216_s3  ;;  %s9546_s22 = scalar_lea.vmem (!%p11087_p7), [#allocation3], %s7153_s5 }
  0x8e   : > { %9171 = dma.done.wait (%p11088_p6), %s217_s11, 4096  }
  0x8f   : > { %9173 = vsyncadd (%p11088_p6), %s217_s11, 4294963200  ;;  %s11089_s27 = sld [smem:[#allocation18_spill]]  ;;  %s11090_s26 = sld [smem:[#allocation19_spill]] }
  0x90   : > { %s227_s21 = sand.u32 1, %s9204_s16  }
  0x91   : > { %s8221_s9 = smul.u32 768, %s227_s21 }
  0x93   : > { %s9554_s2 = scalar_lea.vmem [#allocation6], %s8221_s9 }
  0x95   : > { %s225_s4 = sand.u32 1, %s11089_s27   ;;  %p11091_p13 = scmp.ne.s32.totalorder %s11090_s26, 0 }
  0x96   : > { %s226_s6 = scalar_lea.sflag [#allocation7], %s225_s4 }
  0x97   : > { %9175 = dma.done.wait (%p11091_p13), %s226_s6, 12288  }
  0x98   : > { %9177 = vsyncadd (%p11091_p13), %s226_s6, 4294955008  ;;  %p11092_p1 = scmp.eq.s32.totalorder %s11089_s27, 0 }
  0x9a   : > { %9179 = dma.done.wait (%p11092_p1), [#allocation7], 36864   ;;  %p11093_p3 = pmov %p11092_p1 }
  0x9b   : > { %s11094_s29 = sld [smem:[#allocation15_spill]]  ;;  %s11095_s8 = sld [smem:[#allocation16_spill]] }
  0x9c   : > { %9181 = vsyncadd (%p11093_p3), [#allocation7], 4294930432 }
  0xa1   : > { %s258_s13 = sand.u32 1, %s11094_s29   ;;  %p7155_p9 = scmp.ne.s32.totalorder %s11095_s8, 0 }
  0xa2   : > { %s8222_s10 = smul.u32 768, %s258_s13  ;;  %v9250_v0 = vmov (!%p7155_p9), 0.0  }
  0xa3   : > { %268 = sbr.rel (%p7155_p9) target bundleno = 259 (0x103), region = 48  ;;  %269 = vst [vmem:[#allocation2] sm:$0xff] (!%p7155_p9), %v9250_v0  ;;  %270 = vst [vmem:[#allocation2 + $0x8] sm:$0xff] (!%p7155_p9), %v9250_v0 }
  0xa4   : > { %s9567_s28 = scalar_lea.vmem [#allocation9], %s8222_s10  ;;  %271 = vst [vmem:[#allocation2 + $0x10] sm:$0xff] (!%p7155_p9), %v9250_v0  ;;  %272 = vst [vmem:[#allocation2 + $0x18] sm:$0xff] (!%p7155_p9), %v9250_v0 }
  0xa5   : > { %273 = vst [vmem:[#allocation2 + $0x20] sm:$0xff] (!%p7155_p9), %v9250_v0  ;;  %274 = vst [vmem:[#allocation2 + $0x28] sm:$0xff] (!%p7155_p9), %v9250_v0 }
  0xa6   : > { %275 = vst [vmem:[#allocation2 + $0x30] sm:$0xff] (!%p7155_p9), %v9250_v0  ;;  %276 = vst [vmem:[#allocation2 + $0x38] sm:$0xff] (!%p7155_p9), %v9250_v0 }
  0xa7   : > { %277 = vst [vmem:[#allocation2 + $0x40] sm:$0xff] (!%p7155_p9), %v9250_v0  ;;  %278 = vst [vmem:[#allocation2 + $0x48] sm:$0xff] (!%p7155_p9), %v9250_v0 }
  0xa8   : > { %279 = vst [vmem:[#allocation2 + $0x50] sm:$0xff] (!%p7155_p9), %v9250_v0  ;;  %280 = vst [vmem:[#allocation2 + $0x58] sm:$0xff] (!%p7155_p9), %v9250_v0 }
  0xa9   : > { %281 = vst [vmem:[#allocation2 + $0x60] sm:$0xff] (!%p7155_p9), %v9250_v0  ;;  %282 = vst [vmem:[#allocation2 + $0x68] sm:$0xff] (!%p7155_p9), %v9250_v0 }
  0xaa   : > { %283 = vst [vmem:[#allocation2 + $0x70] sm:$0xff] %v9250_v0  ;;  %284 = vst [vmem:[#allocation2 + $0x78] sm:$0xff] %v9250_v0 }
  0xab   : > { %285 = vst [vmem:[#allocation2 + $0x80] sm:$0xff] %v9250_v0  ;;  %286 = vst [vmem:[#allocation2 + $0x88] sm:$0xff] %v9250_v0 }
  0xac   : > { %287 = vst [vmem:[#allocation2 + $0x90] sm:$0xff] %v9250_v0  ;;  %288 = vst [vmem:[#allocation2 + $0x98] sm:$0xff] %v9250_v0 }
  0xad   : > { %289 = vst [vmem:[#allocation2 + $0xa0] sm:$0xff] %v9250_v0  ;;  %290 = vst [vmem:[#allocation2 + $0xa8] sm:$0xff] %v9250_v0 }
  0xae   : > { %291 = vst [vmem:[#allocation2 + $0xb0] sm:$0xff] %v9250_v0  ;;  %292 = vst [vmem:[#allocation2 + $0xb8] sm:$0xff] %v9250_v0 }
  0xaf   : > { %293 = vst [vmem:[#allocation2 + $0xc0] sm:$0xff] %v9250_v0  ;;  %294 = vst [vmem:[#allocation2 + $0xc8] sm:$0xff] %v9250_v0 }
  0xb0   : > { %295 = vst [vmem:[#allocation2 + $0xd0] sm:$0xff] %v9250_v0  ;;  %296 = vst [vmem:[#allocation2 + $0xd8] sm:$0xff] %v9250_v0 }
  0xb1   : > { %297 = vst [vmem:[#allocation2 + $0xe0] sm:$0xff] %v9250_v0  ;;  %298 = vst [vmem:[#allocation2 + $0xe8] sm:$0xff] %v9250_v0 }
  0xb2   : > { %299 = vst [vmem:[#allocation2 + $0xf0] sm:$0xff] %v9250_v0  ;;  %300 = vst [vmem:[#allocation2 + $0xf8] sm:$0xff] %v9250_v0 }
  0xb3   : > { %301 = vst [vmem:[#allocation2 + $0x100] sm:$0xff] %v9250_v0  ;;  %302 = vst [vmem:[#allocation2 + $0x108] sm:$0xff] %v9250_v0 }
  0xb4   : > { %303 = vst [vmem:[#allocation2 + $0x110] sm:$0xff] %v9250_v0  ;;  %304 = vst [vmem:[#allocation2 + $0x118] sm:$0xff] %v9250_v0 }
  0xb5   : > { %305 = vst [vmem:[#allocation2 + $0x120] sm:$0xff] %v9250_v0  ;;  %306 = vst [vmem:[#allocation2 + $0x128] sm:$0xff] %v9250_v0 }
  0xb6   : > { %307 = vst [vmem:[#allocation2 + $0x130] sm:$0xff] %v9250_v0  ;;  %308 = vst [vmem:[#allocation2 + $0x138] sm:$0xff] %v9250_v0 }
  0xb7   : > { %309 = vst [vmem:[#allocation2 + $0x140] sm:$0xff] %v9250_v0  ;;  %310 = vst [vmem:[#allocation2 + $0x148] sm:$0xff] %v9250_v0 }
  0xb8   : > { %311 = vst [vmem:[#allocation2 + $0x150] sm:$0xff] %v9250_v0  ;;  %312 = vst [vmem:[#allocation2 + $0x158] sm:$0xff] %v9250_v0 }
  0xb9   : > { %313 = vst [vmem:[#allocation2 + $0x160] sm:$0xff] %v9250_v0  ;;  %314 = vst [vmem:[#allocation2 + $0x168] sm:$0xff] %v9250_v0 }
  0xba   : > { %315 = vst [vmem:[#allocation2 + $0x170] sm:$0xff] %v9250_v0  ;;  %316 = vst [vmem:[#allocation2 + $0x178] sm:$0xff] %v9250_v0 }
  0xbb   : > { %317 = vst [vmem:[#allocation2 + $0x180] sm:$0xff] %v9250_v0  ;;  %318 = vst [vmem:[#allocation2 + $0x188] sm:$0xff] %v9250_v0 }
  0xbc   : > { %319 = vst [vmem:[#allocation2 + $0x190] sm:$0xff] %v9250_v0  ;;  %320 = vst [vmem:[#allocation2 + $0x198] sm:$0xff] %v9250_v0 }
  0xbd   : > { %321 = vst [vmem:[#allocation2 + $0x1a0] sm:$0xff] %v9250_v0  ;;  %322 = vst [vmem:[#allocation2 + $0x1a8] sm:$0xff] %v9250_v0 }
  0xbe   : > { %323 = vst [vmem:[#allocation2 + $0x1b0] sm:$0xff] %v9250_v0  ;;  %324 = vst [vmem:[#allocation2 + $0x1b8] sm:$0xff] %v9250_v0 }
  0xbf   : > { %325 = vst [vmem:[#allocation2 + $0x1c0] sm:$0xff] %v9250_v0  ;;  %326 = vst [vmem:[#allocation2 + $0x1c8] sm:$0xff] %v9250_v0 }
  0xc0   : > { %327 = vst [vmem:[#allocation2 + $0x1d0] sm:$0xff] %v9250_v0  ;;  %328 = vst [vmem:[#allocation2 + $0x1d8] sm:$0xff] %v9250_v0 }
  0xc1   : > { %329 = vst [vmem:[#allocation2 + $0x1e0] sm:$0xff] %v9250_v0  ;;  %330 = vst [vmem:[#allocation2 + $0x1e8] sm:$0xff] %v9250_v0 }
  0xc2   : > { %331 = vst [vmem:[#allocation2 + $0x1f0] sm:$0xff] %v9250_v0  ;;  %332 = vst [vmem:[#allocation2 + $0x1f8] sm:$0xff] %v9250_v0 }
  0xc3   : > { %333 = vst [vmem:[#allocation2 + $0x200] sm:$0xff] %v9250_v0  ;;  %334 = vst [vmem:[#allocation2 + $0x208] sm:$0xff] %v9250_v0 }
  0xc4   : > { %335 = vst [vmem:[#allocation2 + $0x210] sm:$0xff] %v9250_v0  ;;  %336 = vst [vmem:[#allocation2 + $0x218] sm:$0xff] %v9250_v0 }
  0xc5   : > { %337 = vst [vmem:[#allocation2 + $0x220] sm:$0xff] %v9250_v0  ;;  %338 = vst [vmem:[#allocation2 + $0x228] sm:$0xff] %v9250_v0 }
  0xc6   : > { %339 = vst [vmem:[#allocation2 + $0x230] sm:$0xff] %v9250_v0  ;;  %340 = vst [vmem:[#allocation2 + $0x238] sm:$0xff] %v9250_v0 }
  0xc7   : > { %341 = vst [vmem:[#allocation2 + $0x240] sm:$0xff] %v9250_v0  ;;  %342 = vst [vmem:[#allocation2 + $0x248] sm:$0xff] %v9250_v0 }
  0xc8   : > { %343 = vst [vmem:[#allocation2 + $0x250] sm:$0xff] %v9250_v0  ;;  %344 = vst [vmem:[#allocation2 + $0x258] sm:$0xff] %v9250_v0 }
  0xc9   : > { %345 = vst [vmem:[#allocation2 + $0x260] sm:$0xff] %v9250_v0  ;;  %346 = vst [vmem:[#allocation2 + $0x268] sm:$0xff] %v9250_v0 }
  0xca   : > { %347 = vst [vmem:[#allocation2 + $0x270] sm:$0xff] %v9250_v0  ;;  %348 = vst [vmem:[#allocation2 + $0x278] sm:$0xff] %v9250_v0 }
  0xcb   : > { %349 = vst [vmem:[#allocation2 + $0x280] sm:$0xff] %v9250_v0  ;;  %350 = vst [vmem:[#allocation2 + $0x288] sm:$0xff] %v9250_v0 }
  0xcc   : > { %351 = vst [vmem:[#allocation2 + $0x290] sm:$0xff] %v9250_v0  ;;  %352 = vst [vmem:[#allocation2 + $0x298] sm:$0xff] %v9250_v0 }
  0xcd   : > { %353 = vst [vmem:[#allocation2 + $0x2a0] sm:$0xff] %v9250_v0  ;;  %354 = vst [vmem:[#allocation2 + $0x2a8] sm:$0xff] %v9250_v0 }
  0xce   : > { %355 = vst [vmem:[#allocation2 + $0x2b0] sm:$0xff] %v9250_v0  ;;  %356 = vst [vmem:[#allocation2 + $0x2b8] sm:$0xff] %v9250_v0 }
  0xcf   : > { %357 = vst [vmem:[#allocation2 + $0x2c0] sm:$0xff] %v9250_v0  ;;  %358 = vst [vmem:[#allocation2 + $0x2c8] sm:$0xff] %v9250_v0 }
  0xd0   : > { %359 = vst [vmem:[#allocation2 + $0x2d0] sm:$0xff] %v9250_v0  ;;  %360 = vst [vmem:[#allocation2 + $0x2d8] sm:$0xff] %v9250_v0 }
  0xd1   : > { %361 = vst [vmem:[#allocation2 + $0x2e0] sm:$0xff] %v9250_v0  ;;  %362 = vst [vmem:[#allocation2 + $0x2e8] sm:$0xff] %v9250_v0 }
  0xd2   : > { %363 = vst [vmem:[#allocation2 + $0x2f0] sm:$0xff] %v9250_v0  ;;  %364 = vst [vmem:[#allocation2 + $0x2f8] sm:$0xff] %v9250_v0 }
  0xd3   : > { %365 = vst [vmem:[#allocation2 + $0x300] sm:$0xff] %v9250_v0  ;;  %366 = vst [vmem:[#allocation2 + $0x308] sm:$0xff] %v9250_v0 }
  0xd4   : > { %367 = vst [vmem:[#allocation2 + $0x310] sm:$0xff] %v9250_v0  ;;  %368 = vst [vmem:[#allocation2 + $0x318] sm:$0xff] %v9250_v0 }
  0xd5   : > { %369 = vst [vmem:[#allocation2 + $0x320] sm:$0xff] %v9250_v0  ;;  %370 = vst [vmem:[#allocation2 + $0x328] sm:$0xff] %v9250_v0 }
  0xd6   : > { %371 = vst [vmem:[#allocation2 + $0x330] sm:$0xff] %v9250_v0  ;;  %372 = vst [vmem:[#allocation2 + $0x338] sm:$0xff] %v9250_v0 }
  0xd7   : > { %373 = vst [vmem:[#allocation2 + $0x340] sm:$0xff] %v9250_v0  ;;  %374 = vst [vmem:[#allocation2 + $0x348] sm:$0xff] %v9250_v0 }
  0xd8   : > { %375 = vst [vmem:[#allocation2 + $0x350] sm:$0xff] %v9250_v0  ;;  %376 = vst [vmem:[#allocation2 + $0x358] sm:$0xff] %v9250_v0 }
  0xd9   : > { %377 = vst [vmem:[#allocation2 + $0x360] sm:$0xff] %v9250_v0  ;;  %378 = vst [vmem:[#allocation2 + $0x368] sm:$0xff] %v9250_v0 }
  0xda   : > { %379 = vst [vmem:[#allocation2 + $0x370] sm:$0xff] %v9250_v0  ;;  %380 = vst [vmem:[#allocation2 + $0x378] sm:$0xff] %v9250_v0 }
  0xdb   : > { %381 = vst [vmem:[#allocation2 + $0x380] sm:$0xff] %v9250_v0  ;;  %382 = vst [vmem:[#allocation2 + $0x388] sm:$0xff] %v9250_v0 }
  0xdc   : > { %383 = vst [vmem:[#allocation2 + $0x390] sm:$0xff] %v9250_v0  ;;  %384 = vst [vmem:[#allocation2 + $0x398] sm:$0xff] %v9250_v0 }
  0xdd   : > { %385 = vst [vmem:[#allocation2 + $0x3a0] sm:$0xff] %v9250_v0  ;;  %386 = vst [vmem:[#allocation2 + $0x3a8] sm:$0xff] %v9250_v0 }
  0xde   : > { %387 = vst [vmem:[#allocation2 + $0x3b0] sm:$0xff] %v9250_v0  ;;  %388 = vst [vmem:[#allocation2 + $0x3b8] sm:$0xff] %v9250_v0 }
  0xdf   : > { %389 = vst [vmem:[#allocation2 + $0x3c0] sm:$0xff] %v9250_v0  ;;  %390 = vst [vmem:[#allocation2 + $0x3c8] sm:$0xff] %v9250_v0 }
  0xe0   : > { %391 = vst [vmem:[#allocation2 + $0x3d0] sm:$0xff] %v9250_v0  ;;  %392 = vst [vmem:[#allocation2 + $0x3d8] sm:$0xff] %v9250_v0 }
  0xe1   : > { %393 = vst [vmem:[#allocation2 + $0x3e0] sm:$0xff] %v9250_v0  ;;  %394 = vst [vmem:[#allocation2 + $0x3e8] sm:$0xff] %v9250_v0 }
  0xe2   : > { %395 = vst [vmem:[#allocation2 + $0x3f0] sm:$0xff] %v9250_v0  ;;  %396 = vst [vmem:[#allocation2 + $0x3f8] sm:$0xff] %v9250_v0 }
  0xe3   : > { %397 = vst [vmem:[#allocation2 + $0x400] sm:$0xff] %v9250_v0  ;;  %398 = vst [vmem:[#allocation2 + $0x408] sm:$0xff] %v9250_v0 }
  0xe4   : > { %399 = vst [vmem:[#allocation2 + $0x410] sm:$0xff] %v9250_v0  ;;  %400 = vst [vmem:[#allocation2 + $0x418] sm:$0xff] %v9250_v0 }
  0xe5   : > { %401 = vst [vmem:[#allocation2 + $0x420] sm:$0xff] %v9250_v0  ;;  %402 = vst [vmem:[#allocation2 + $0x428] sm:$0xff] %v9250_v0 }
  0xe6   : > { %403 = vst [vmem:[#allocation2 + $0x430] sm:$0xff] %v9250_v0  ;;  %404 = vst [vmem:[#allocation2 + $0x438] sm:$0xff] %v9250_v0 }
  0xe7   : > { %405 = vst [vmem:[#allocation2 + $0x440] sm:$0xff] %v9250_v0  ;;  %406 = vst [vmem:[#allocation2 + $0x448] sm:$0xff] %v9250_v0 }
  0xe8   : > { %407 = vst [vmem:[#allocation2 + $0x450] sm:$0xff] %v9250_v0  ;;  %408 = vst [vmem:[#allocation2 + $0x458] sm:$0xff] %v9250_v0 }
  0xe9   : > { %409 = vst [vmem:[#allocation2 + $0x460] sm:$0xff] %v9250_v0  ;;  %410 = vst [vmem:[#allocation2 + $0x468] sm:$0xff] %v9250_v0 }
  0xea   : > { %411 = vst [vmem:[#allocation2 + $0x470] sm:$0xff] %v9250_v0  ;;  %412 = vst [vmem:[#allocation2 + $0x478] sm:$0xff] %v9250_v0 }
  0xeb   : > { %413 = vst [vmem:[#allocation2 + $0x480] sm:$0xff] %v9250_v0  ;;  %414 = vst [vmem:[#allocation2 + $0x488] sm:$0xff] %v9250_v0 }
  0xec   : > { %415 = vst [vmem:[#allocation2 + $0x490] sm:$0xff] %v9250_v0  ;;  %416 = vst [vmem:[#allocation2 + $0x498] sm:$0xff] %v9250_v0 }
  0xed   : > { %417 = vst [vmem:[#allocation2 + $0x4a0] sm:$0xff] %v9250_v0  ;;  %418 = vst [vmem:[#allocation2 + $0x4a8] sm:$0xff] %v9250_v0 }
  0xee   : > { %419 = vst [vmem:[#allocation2 + $0x4b0] sm:$0xff] %v9250_v0  ;;  %420 = vst [vmem:[#allocation2 + $0x4b8] sm:$0xff] %v9250_v0 }
  0xef   : > { %421 = vst [vmem:[#allocation2 + $0x4c0] sm:$0xff] %v9250_v0  ;;  %422 = vst [vmem:[#allocation2 + $0x4c8] sm:$0xff] %v9250_v0 }
  0xf0   : > { %423 = vst [vmem:[#allocation2 + $0x4d0] sm:$0xff] %v9250_v0  ;;  %424 = vst [vmem:[#allocation2 + $0x4d8] sm:$0xff] %v9250_v0 }
  0xf1   : > { %425 = vst [vmem:[#allocation2 + $0x4e0] sm:$0xff] %v9250_v0  ;;  %426 = vst [vmem:[#allocation2 + $0x4e8] sm:$0xff] %v9250_v0 }
  0xf2   : > { %427 = vst [vmem:[#allocation2 + $0x4f0] sm:$0xff] %v9250_v0  ;;  %428 = vst [vmem:[#allocation2 + $0x4f8] sm:$0xff] %v9250_v0 }
  0xf3   : > { %429 = vst [vmem:[#allocation2 + $0x500] sm:$0xff] %v9250_v0  ;;  %430 = vst [vmem:[#allocation2 + $0x508] sm:$0xff] %v9250_v0 }
  0xf4   : > { %431 = vst [vmem:[#allocation2 + $0x510] sm:$0xff] %v9250_v0  ;;  %432 = vst [vmem:[#allocation2 + $0x518] sm:$0xff] %v9250_v0 }
  0xf5   : > { %433 = vst [vmem:[#allocation2 + $0x520] sm:$0xff] %v9250_v0  ;;  %434 = vst [vmem:[#allocation2 + $0x528] sm:$0xff] %v9250_v0 }
  0xf6   : > { %435 = vst [vmem:[#allocation2 + $0x530] sm:$0xff] %v9250_v0  ;;  %436 = vst [vmem:[#allocation2 + $0x538] sm:$0xff] %v9250_v0 }
  0xf7   : > { %437 = vst [vmem:[#allocation2 + $0x540] sm:$0xff] %v9250_v0  ;;  %438 = vst [vmem:[#allocation2 + $0x548] sm:$0xff] %v9250_v0 }
  0xf8   : > { %439 = vst [vmem:[#allocation2 + $0x550] sm:$0xff] %v9250_v0  ;;  %440 = vst [vmem:[#allocation2 + $0x558] sm:$0xff] %v9250_v0 }
  0xf9   : > { %441 = vst [vmem:[#allocation2 + $0x560] sm:$0xff] %v9250_v0  ;;  %442 = vst [vmem:[#allocation2 + $0x568] sm:$0xff] %v9250_v0 }
  0xfa   : > { %443 = vst [vmem:[#allocation2 + $0x570] sm:$0xff] %v9250_v0  ;;  %444 = vst [vmem:[#allocation2 + $0x578] sm:$0xff] %v9250_v0 }
  0xfb   : > { %445 = vst [vmem:[#allocation2 + $0x580] sm:$0xff] %v9250_v0  ;;  %446 = vst [vmem:[#allocation2 + $0x588] sm:$0xff] %v9250_v0 }
  0xfc   : > { %447 = vst [vmem:[#allocation2 + $0x590] sm:$0xff] %v9250_v0  ;;  %448 = vst [vmem:[#allocation2 + $0x598] sm:$0xff] %v9250_v0 }
  0xfd   : > { %449 = vst [vmem:[#allocation2 + $0x5a0] sm:$0xff] %v9250_v0  ;;  %450 = vst [vmem:[#allocation2 + $0x5a8] sm:$0xff] %v9250_v0 }
  0xfe   : > { %451 = vst [vmem:[#allocation2 + $0x5b0] sm:$0xff] %v9250_v0  ;;  %452 = vst [vmem:[#allocation2 + $0x5b8] sm:$0xff] %v9250_v0 }
  0xff   : > { %453 = vst [vmem:[#allocation2 + $0x5c0] sm:$0xff] %v9250_v0  ;;  %454 = vst [vmem:[#allocation2 + $0x5c8] sm:$0xff] %v9250_v0 }
 0x100   : > { %455 = vst [vmem:[#allocation2 + $0x5d0] sm:$0xff] %v9250_v0  ;;  %456 = vst [vmem:[#allocation2 + $0x5d8] sm:$0xff] %v9250_v0 }
 0x101   : > { %457 = vst [vmem:[#allocation2 + $0x5e0] sm:$0xff] %v9250_v0  ;;  %458 = vst [vmem:[#allocation2 + $0x5e8] sm:$0xff] %v9250_v0 }
 0x102   : > { %459 = vst [vmem:[#allocation2 + $0x5f0] sm:$0xff] %v9250_v0  ;;  %460 = vst [vmem:[#allocation2 + $0x5f8] sm:$0xff] %v9250_v0 }
 0x103 PF: > { %v8374_v1 = vld [vmem:[%s9554_s2 + $0x4] ss:$24 sps:$4 sm:$0xff]   ;;  %v8376_v2 = vld [vmem:[%s9554_s2] ss:$24 sps:$4 sm:$0xff]   ;;  %v8377_v3 = vld [vmem:[%s9554_s2 + $0x34] ss:$24 sps:$4 sm:$0xff]  }
 0x104   : > { %1421 = vmatprep.subr.bf16.mxu0 %v8374_v1  ;;  %7771 = vmatprep.subr.bf16.mxu1 %v8374_v1  ;;  %v8379_v4 = vld [vmem:[%s9554_s2 + $0x30] ss:$24 sps:$4 sm:$0xff]   ;;  %v8380_v5 = vld [vmem:[%s9554_s2 + $0x64] ss:$24 sps:$4 sm:$0xff]   ;;  %v8382_v6 = vld [vmem:[%s9554_s2 + $0x60] ss:$24 sps:$4 sm:$0xff]  }
 0x105   : > { %1422 = vmatpush1.bf16.msra.mxu0 %v8376_v2  ;;  %7787 = vmatpush1.bf16.msra.mxu1 %v8376_v2  ;;  %v8383_v7 = vld [vmem:[%s9554_s2 + $0x94] ss:$24 sps:$4 sm:$0xff]   ;;  %v8385_v8 = vld [vmem:[%s9554_s2 + $0x90] ss:$24 sps:$4 sm:$0xff]   ;;  %v8386_v9 = vld [vmem:[%s9554_s2 + $0xc4] ss:$24 sps:$4 sm:$0xff]  }
 0x106   : > { %1423 = vmatprep.subr.bf16.mxu0 %v8377_v3  ;;  %7772 = vmatprep.subr.bf16.mxu1 %v8377_v3  ;;  %v8388_v10 = vld [vmem:[%s9554_s2 + $0xc0] ss:$24 sps:$4 sm:$0xff]   ;;  %v8389_v11 = vld [vmem:[%s9554_s2 + $0xf4] ss:$24 sps:$4 sm:$0xff]   ;;  %v8391_v12 = vld [vmem:[%s9554_s2 + $0xf0] ss:$24 sps:$4 sm:$0xff]  }
 0x107   : > { %v8392_v13 = vld [vmem:[%s9554_s2 + $0x124] ss:$24 sps:$4 sm:$0xff]   ;;  %v8394_v15 = vld [vmem:[%s9554_s2 + $0x120] ss:$24 sps:$4 sm:$0xff]   ;;  %v8395_v17 = vld [vmem:[%s9554_s2 + $0x154] ss:$24 sps:$4 sm:$0xff]  }
 0x108   : > { %v9776_v14 = vld [vmem:[%s9546_s22 + $0x4] ss:$8 sps:$4 sm:$0xff]   ;;  %v8397_v18 = vld [vmem:[%s9554_s2 + $0x150] ss:$24 sps:$4 sm:$0xff]   ;;  %v8400_v20 = vld [vmem:[%s9554_s2 + $0x180] ss:$24 sps:$4 sm:$0xff]  }
 0x109   : > { %1424 = vmatpush1.bf16.msra.mxu0 %v8379_v4  ;;  %7788 = vmatpush1.bf16.msra.mxu1 %v8379_v4  ;;  %v9780_v16 = vld [vmem:[%s9546_s22 + $0x84] ss:$8 sps:$4 sm:$0xff]   ;;  %v8403_v22 = vld [vmem:[%s9554_s2 + $0x1b0] ss:$24 sps:$4 sm:$0xff]   ;;  %v8406_v24 = vld [vmem:[%s9554_s2 + $0x1e0] ss:$24 sps:$4 sm:$0xff]  }
 0x10a   : > { %1425 = vmatprep.subr.bf16.mxu0 %v8380_v5  ;;  %7773 = vmatprep.subr.bf16.mxu1 %v8380_v5  ;;  %v8398_v19 = vld [vmem:[%s9554_s2 + $0x184] ss:$24 sps:$4 sm:$0xff]   ;;  %v8401_v21 = vld [vmem:[%s9554_s2 + $0x1b4] ss:$24 sps:$4 sm:$0xff]   ;;  %v8409_v26 = vld [vmem:[%s9554_s2 + $0x210] ss:$24 sps:$4 sm:$0xff]  }
 0x10b   : > { %1453 = vmatprep.mubr.bf16.mxu0 %v9776_v14  ;;  %1533 = vmatprep.mubr.bf16.mxu1 %v9780_v16  ;;  %v8404_v23 = vld [vmem:[%s9554_s2 + $0x1e4] ss:$24 sps:$4 sm:$0xff]   ;;  %v8407_v25 = vld [vmem:[%s9554_s2 + $0x214] ss:$24 sps:$4 sm:$0xff]   ;;  %v8412_v28 = vld [vmem:[%s9554_s2 + $0x240] ss:$24 sps:$4 sm:$0xff]  }
 0x10c   : > { %v8410_v27 = vld [vmem:[%s9554_s2 + $0x244] ss:$24 sps:$4 sm:$0xff]   ;;  %v8413_v29 = vld [vmem:[%s9554_s2 + $0x274] ss:$24 sps:$4 sm:$0xff]   ;;  %v8415_v30 = vld [vmem:[%s9554_s2 + $0x270] ss:$24 sps:$4 sm:$0xff]  }
 0x10d   : > { %1426 = vmatpush1.bf16.msra.mxu0 %v8382_v6  ;;  %7789 = vmatpush1.bf16.msra.mxu1 %v8382_v6  ;;  %v8416_v31 = vld [vmem:[%s9554_s2 + $0x2a4] ss:$24 sps:$4 sm:$0xff]   ;;  %v8418_v32 = vld [vmem:[%s9554_s2 + $0x2a0] ss:$24 sps:$4 sm:$0xff]   ;;  %v8419_v33 = vld [vmem:[%s9554_s2 + $0x2d4] ss:$24 sps:$4 sm:$0xff]  }
 0x10e   : > { %1427 = vmatprep.subr.bf16.mxu0 %v8383_v7  ;;  %7774 = vmatprep.subr.bf16.mxu1 %v8383_v7  ;;  %v8421_v34 = vld [vmem:[%s9554_s2 + $0x2d0] ss:$24 sps:$4 sm:$0xff]   ;;  %v8430_v35 = vld [vmem:[%s9554_s2 + $0xc] ss:$24 sps:$4 sm:$0xff]   ;;  %v8436_v41 = vld [vmem:[%s9554_s2 + $0x3c] ss:$24 sps:$4 sm:$0xff]  }
 0x10f   : > { %v9804_v36 = vld [vmem:[%s9546_s22] ss:$8 sps:$4 sm:$0xff]   ;;  %v8433_v37 = vld [vmem:[%s9554_s2 + $0x14] ss:$24 sps:$4 sm:$0xff]   ;;  %v8439_v42 = vld [vmem:[%s9554_s2 + $0x44] ss:$24 sps:$4 sm:$0xff]  }
 0x110   : > { %v9808_v38 = vld [vmem:[%s9546_s22 + $0x80] ss:$8 sps:$4 sm:$0xff]   ;;  %v9815_v43 = vld [vmem:[%s9546_s22 + $0x14] ss:$8 sps:$4 sm:$0xff]   ;;  %v8434_v45 = vld [vmem:[%s9554_s2 + $0x38] ss:$24 sps:$4 sm:$0xff]  }
 0x111   : > { %1428 = vmatpush1.bf16.msra.mxu0 %v8385_v8  ;;  %7790 = vmatpush1.bf16.msra.mxu1 %v8385_v8  ;;  %v8428_v39 = vld [vmem:[%s9554_s2 + $0x8] ss:$24 sps:$4 sm:$0xff]   ;;  %v9818_v44 = vld [vmem:[%s9546_s22 + $0x94] ss:$8 sps:$4 sm:$0xff]   ;;  %v8448_v47 = vld [vmem:[%s9554_s2 + $0x6c] ss:$24 sps:$4 sm:$0xff]  }
 0x112   : > { %1429 = vmatprep.subr.bf16.mxu0 %v8386_v9  ;;  %7775 = vmatprep.subr.bf16.mxu1 %v8386_v9  ;;  %v8431_v40 = vld [vmem:[%s9554_s2 + $0x10] ss:$24 sps:$4 sm:$0xff]   ;;  %v8437_v46 = vld [vmem:[%s9554_s2 + $0x40] ss:$24 sps:$4 sm:$0xff]   ;;  %v8451_v49 = vld [vmem:[%s9554_s2 + $0x74] ss:$24 sps:$4 sm:$0xff]  }
 0x113   : > { %v9826_v48 = vld [vmem:[%s9546_s22 + $0x10] ss:$8 sps:$4 sm:$0xff]   ;;  %v8446_v51 = vld [vmem:[%s9554_s2 + $0x68] ss:$24 sps:$4 sm:$0xff]   ;;  %v8454_v53 = vld [vmem:[%s9554_s2 + $0x9c] ss:$24 sps:$4 sm:$0xff]  }
 0x114   : > { %v9832_v50 = vld [vmem:[%s9546_s22 + $0x90] ss:$8 sps:$4 sm:$0xff]   ;;  %v8457_v54 = vld [vmem:[%s9554_s2 + $0xa4] ss:$24 sps:$4 sm:$0xff]   ;;  %v9850_v60 = vld [vmem:[%s9546_s22 + $0x20] ss:$8 sps:$4 sm:$0xff]  }
 0x115   : > { %1430 = vmatpush1.bf16.msra.mxu0 %v8388_v10  ;;  %7791 = vmatpush1.bf16.msra.mxu1 %v8388_v10  ;;  %v8449_v52 = vld [vmem:[%s9554_s2 + $0x70] ss:$24 sps:$4 sm:$0xff]   ;;  %v9839_v55 = vld [vmem:[%s9546_s22 + $0x24] ss:$8 sps:$4 sm:$0xff]   ;;  %v8455_v58 = vld [vmem:[%s9554_s2 + $0xa0] ss:$24 sps:$4 sm:$0xff]  }
 0x116   : > { %1431 = vmatprep.subr.bf16.mxu0 %v8389_v11  ;;  %7776 = vmatprep.subr.bf16.mxu1 %v8389_v11  ;;  %v9842_v56 = vld [vmem:[%s9546_s22 + $0xa4] ss:$8 sps:$4 sm:$0xff]   ;;  %v8452_v57 = vld [vmem:[%s9554_s2 + $0x98] ss:$24 sps:$4 sm:$0xff]   ;;  %v9856_v62 = vld [vmem:[%s9546_s22 + $0xa0] ss:$8 sps:$4 sm:$0xff]  }
 0x117   : > { %v8466_v59 = vld [vmem:[%s9554_s2 + $0xcc] ss:$24 sps:$4 sm:$0xff]   ;;  %v8464_v63 = vld [vmem:[%s9554_s2 + $0xc8] ss:$24 sps:$4 sm:$0xff]   ;;  %v8472_v1 = vld [vmem:[%s9554_s2 + $0xfc] ss:$24 sps:$4 sm:$0xff]  }
 0x118   : > { %v8469_v61 = vld [vmem:[%s9554_s2 + $0xd4] ss:$24 sps:$4 sm:$0xff]   ;;  %v8467_v0 = vld [vmem:[%s9554_s2 + $0xd0] ss:$24 sps:$4 sm:$0xff]   ;;  %v8475_v2 = vld [vmem:[%s9554_s2 + $0x104] ss:$24 sps:$4 sm:$0xff]  }
 0x119   : > { %1432 = vmatpush1.bf16.msra.mxu0 %v8391_v12  ;;  %7792 = vmatpush1.bf16.msra.mxu1 %v8391_v12  ;;  %v9863_v3 = vld [vmem:[%s9546_s22 + $0x34] ss:$8 sps:$4 sm:$0xff]   ;;  %v8470_v5 = vld [vmem:[%s9554_s2 + $0xf8] ss:$24 sps:$4 sm:$0xff]   ;;  %v8484_v7 = vld [vmem:[%s9554_s2 + $0x12c] ss:$24 sps:$4 sm:$0xff]  }
 0x11a   : > { %1433 = vmatprep.subr.bf16.mxu0 %v8392_v13  ;;  %7777 = vmatprep.subr.bf16.mxu1 %v8392_v13  ;;  %v9866_v4 = vld [vmem:[%s9546_s22 + $0xb4] ss:$8 sps:$4 sm:$0xff]   ;;  %v8473_v6 = vld [vmem:[%s9554_s2 + $0x100] ss:$24 sps:$4 sm:$0xff]   ;;  %v8485_v12 = vld [vmem:[%s9554_s2 + $0x130] ss:$24 sps:$4 sm:$0xff]  }
 0x11b   : > { %v8487_v8 = vld [vmem:[%s9554_s2 + $0x134] ss:$24 sps:$4 sm:$0xff]   ;;  %v9877_v9 = vld [vmem:[%s9546_s22 + $0x30] ss:$8 sps:$4 sm:$0xff]   ;;  %v8482_v11 = vld [vmem:[%s9554_s2 + $0x128] ss:$24 sps:$4 sm:$0xff]  }
 0x11c   : > { %v9880_v10 = vld [vmem:[%s9546_s22 + $0xb0] ss:$8 sps:$4 sm:$0xff]   ;;  %v8490_v13 = vld [vmem:[%s9554_s2 + $0x15c] ss:$24 sps:$4 sm:$0xff]   ;;  %s11096_s7 = sld [smem:[#allocation16_spill]] }
 0x11d   : > { %1434 = vmatpush1.bf16.msra.mxu0 %v8394_v15  ;;  %7793 = vmatpush1.bf16.msra.mxu1 %v8394_v15  ;;  %v8493_v15 = vld [vmem:[%s9554_s2 + $0x164] ss:$24 sps:$4 sm:$0xff]  }
 0x11e   : > { %1435 = vmatprep.subr.bf16.mxu0 %v8395_v17  ;;  %7778 = vmatprep.subr.bf16.mxu1 %v8395_v17  ;;  %v9887_v17 = vld [vmem:[%s9546_s22 + $0x44] ss:$8 sps:$4 sm:$0xff]  }
 0x121   : > { %1436 = vmatpush1.bf16.msra.mxu0 %v8397_v18  ;;  %7794 = vmatpush1.bf16.msra.mxu1 %v8397_v18  ;;  %v9890_v18 = vld [vmem:[%s9546_s22 + $0xc4] ss:$8 sps:$4 sm:$0xff]  }
 0x122   : > { %1437 = vmatprep.subr.bf16.mxu0 %v8398_v19  ;;  %7779 = vmatprep.subr.bf16.mxu1 %v8398_v19  ;;  %v8488_v19 = vld [vmem:[%s9554_s2 + $0x158] ss:$24 sps:$4 sm:$0xff]   ;;  %p7284_p5 = scmp.ne.s32.totalorder %s11096_s7, 1 }
 0x125   : > { %1438 = vmatpush1.bf16.msra.mxu0 %v8400_v20  ;;  %7795 = vmatpush1.bf16.msra.mxu1 %v8400_v20  ;;  %v8491_v20 = vld [vmem:[%s9554_s2 + $0x160] ss:$24 sps:$4 sm:$0xff]  }
 0x126   : > { %1439 = vmatprep.subr.bf16.mxu0 %v8401_v21  ;;  %7780 = vmatprep.subr.bf16.mxu1 %v8401_v21  ;;  %v8502_v21 = vld [vmem:[%s9554_s2 + $0x18c] ss:$24 sps:$4 sm:$0xff]  }
 0x129   : > { %1440 = vmatpush1.bf16.msra.mxu0 %v8403_v22  ;;  %7796 = vmatpush1.bf16.msra.mxu1 %v8403_v22  ;;  %v8505_v22 = vld [vmem:[%s9554_s2 + $0x194] ss:$24 sps:$4 sm:$0xff]  }
 0x12a   : > { %1441 = vmatprep.subr.bf16.mxu0 %v8404_v23  ;;  %7781 = vmatprep.subr.bf16.mxu1 %v8404_v23  ;;  %v9901_v23 = vld [vmem:[%s9546_s22 + $0x40] ss:$8 sps:$4 sm:$0xff]  }
 0x12d   : > { %1442 = vmatpush1.bf16.msra.mxu0 %v8406_v24  ;;  %7797 = vmatpush1.bf16.msra.mxu1 %v8406_v24  ;;  %v9904_v24 = vld [vmem:[%s9546_s22 + $0xc0] ss:$8 sps:$4 sm:$0xff]  }
 0x12e   : > { %1443 = vmatprep.subr.bf16.mxu0 %v8407_v25  ;;  %7782 = vmatprep.subr.bf16.mxu1 %v8407_v25  ;;  %v8500_v25 = vld [vmem:[%s9554_s2 + $0x188] ss:$24 sps:$4 sm:$0xff]  }
 0x131   : > { %1444 = vmatpush1.bf16.msra.mxu0 %v8409_v26  ;;  %7798 = vmatpush1.bf16.msra.mxu1 %v8409_v26  ;;  %v8503_v26 = vld [vmem:[%s9554_s2 + $0x190] ss:$24 sps:$4 sm:$0xff]  }
 0x132   : > { %1445 = vmatprep.subr.bf16.mxu0 %v8410_v27  ;;  %7783 = vmatprep.subr.bf16.mxu1 %v8410_v27  ;;  %v8508_v27 = vld [vmem:[%s9554_s2 + $0x1bc] ss:$24 sps:$4 sm:$0xff]  }
 0x135   : > { %1446 = vmatpush1.bf16.msra.mxu0 %v8412_v28  ;;  %7799 = vmatpush1.bf16.msra.mxu1 %v8412_v28  ;;  %v8511_v28 = vld [vmem:[%s9554_s2 + $0x1c4] ss:$24 sps:$4 sm:$0xff]  }
 0x136   : > { %1447 = vmatprep.subr.bf16.mxu0 %v8413_v29  ;;  %7784 = vmatprep.subr.bf16.mxu1 %v8413_v29  ;;  %v9911_v29 = vld [vmem:[%s9546_s22 + $0x54] ss:$8 sps:$4 sm:$0xff]  }
 0x139   : > { %1448 = vmatpush1.bf16.msra.mxu0 %v8415_v30  ;;  %7800 = vmatpush1.bf16.msra.mxu1 %v8415_v30  ;;  %v9914_v30 = vld [vmem:[%s9546_s22 + $0xd4] ss:$8 sps:$4 sm:$0xff]  }
 0x13a   : > { %1449 = vmatprep.subr.bf16.mxu0 %v8416_v31  ;;  %7785 = vmatprep.subr.bf16.mxu1 %v8416_v31  ;;  %v8506_v31 = vld [vmem:[%s9554_s2 + $0x1b8] ss:$24 sps:$4 sm:$0xff]  }
 0x13d   : > { %1450 = vmatpush1.bf16.msra.mxu0 %v8418_v32  ;;  %7801 = vmatpush1.bf16.msra.mxu1 %v8418_v32  ;;  %v8509_v32 = vld [vmem:[%s9554_s2 + $0x1c0] ss:$24 sps:$4 sm:$0xff]  }
 0x13e   : > { %1451 = vmatprep.subr.bf16.mxu0 %v8419_v33  ;;  %7786 = vmatprep.subr.bf16.mxu1 %v8419_v33  ;;  %v8520_v33 = vld [vmem:[%s9554_s2 + $0x1ec] ss:$24 sps:$4 sm:$0xff]  }
 0x141   : > { %1452 = vmatpush1.bf16.msra.mxu0 %v8421_v34  ;;  %7802 = vmatpush1.bf16.msra.mxu1 %v8421_v34  ;;  %v8523_v34 = vld [vmem:[%s9554_s2 + $0x1f4] ss:$24 sps:$4 sm:$0xff]  }
 0x142   : > { %1614 = vmatprep.subr.bf16.mxu1 %v8430_v35  ;;  %1807 = vmatprep.subr.bf16.mxu0 %v8433_v37  ;;  %v9925_v35 = vld [vmem:[%s9546_s22 + $0x50] ss:$8 sps:$4 sm:$0xff]  }
 0x143   : > { %v9928_v37 = vld [vmem:[%s9546_s22 + $0xd0] ss:$8 sps:$4 sm:$0xff]  }
 0x144   : > { %1454 = vmatmul.mubr.bf16.vlgmr.msra.gmra.mrb[0].mxu0 %v9804_v36  ;;  %1534 = vmatmul.mubr.bf16.vlgmr.msra.gmra.mrb[0].mxu1 %v9808_v38 }
 0x145   : > { %1615 = vmatpush1.bf16.msra.mxu1 %v8428_v39  ;;  %1808 = vmatpush1.bf16.msra.mxu0 %v8431_v40  ;;  %v8518_v39 = vld [vmem:[%s9554_s2 + $0x1e8] ss:$24 sps:$4 sm:$0xff]  }
 0x146   : > { %1616 = vmatprep.subr.bf16.mxu1 %v8436_v41  ;;  %1809 = vmatprep.subr.bf16.mxu0 %v8439_v42  ;;  %v8521_v40 = vld [vmem:[%s9554_s2 + $0x1f0] ss:$24 sps:$4 sm:$0xff]   ;;  %v8526_v41 = vld [vmem:[%s9554_s2 + $0x21c] ss:$24 sps:$4 sm:$0xff]  }
 0x147   : > { %1463 = vmatprep.mubr.bf16.mxu0 %v9815_v43  ;;  %1543 = vmatprep.mubr.bf16.mxu1 %v9818_v44  ;;  %v8529_v42 = vld [vmem:[%s9554_s2 + $0x224] ss:$24 sps:$4 sm:$0xff]  }
 0x149   : > { %1617 = vmatpush1.bf16.msra.mxu1 %v8434_v45  ;;  %1810 = vmatpush1.bf16.msra.mxu0 %v8437_v46  ;;  %v9935_v45 = vld [vmem:[%s9546_s22 + $0x64] ss:$8 sps:$4 sm:$0xff]  }
 0x14a   : > { %1618 = vmatprep.subr.bf16.mxu1 %v8448_v47  ;;  %1811 = vmatprep.subr.bf16.mxu0 %v8451_v49  ;;  %v9938_v46 = vld [vmem:[%s9546_s22 + $0xe4] ss:$8 sps:$4 sm:$0xff]   ;;  %v8524_v47 = vld [vmem:[%s9554_s2 + $0x218] ss:$24 sps:$4 sm:$0xff]  }
 0x14b   : > { %v8527_v49 = vld [vmem:[%s9554_s2 + $0x220] ss:$24 sps:$4 sm:$0xff]  }
 0x14c   : > { %1464 = vmatmul.mubr.bf16.gmra.mrb[4].mxu0 %v9826_v48  ;;  %1544 = vmatmul.mubr.bf16.gmra.mrb[4].mxu1 %v9832_v50 }
 0x14d   : > { %1619 = vmatpush1.bf16.msra.mxu1 %v8446_v51  ;;  %1812 = vmatpush1.bf16.msra.mxu0 %v8449_v52  ;;  %v8538_v51 = vld [vmem:[%s9554_s2 + $0x24c] ss:$24 sps:$4 sm:$0xff]  }
 0x14e   : > { %1620 = vmatprep.subr.bf16.mxu1 %v8454_v53  ;;  %1813 = vmatprep.subr.bf16.mxu0 %v8457_v54  ;;  %v8541_v52 = vld [vmem:[%s9554_s2 + $0x254] ss:$24 sps:$4 sm:$0xff]   ;;  %v9949_v53 = vld [vmem:[%s9546_s22 + $0x60] ss:$8 sps:$4 sm:$0xff]  }
 0x14f   : > { %1473 = vmatprep.mubr.bf16.mxu0 %v9839_v55  ;;  %1553 = vmatprep.mubr.bf16.mxu1 %v9842_v56  ;;  %v9952_v54 = vld [vmem:[%s9546_s22 + $0xe0] ss:$8 sps:$4 sm:$0xff]  }
 0x151   : > { %1621 = vmatpush1.bf16.msra.mxu1 %v8452_v57  ;;  %1814 = vmatpush1.bf16.msra.mxu0 %v8455_v58  ;;  %v8536_v57 = vld [vmem:[%s9554_s2 + $0x248] ss:$24 sps:$4 sm:$0xff]  }
 0x152   : > { %1622 = vmatprep.subr.bf16.mxu1 %v8466_v59  ;;  %1815 = vmatprep.subr.bf16.mxu0 %v8469_v61  ;;  %v8539_v58 = vld [vmem:[%s9554_s2 + $0x250] ss:$24 sps:$4 sm:$0xff]   ;;  %v8544_v59 = vld [vmem:[%s9554_s2 + $0x27c] ss:$24 sps:$4 sm:$0xff]  }
 0x153   : > { %v8547_v61 = vld [vmem:[%s9554_s2 + $0x284] ss:$24 sps:$4 sm:$0xff]  }
 0x154   : > { %1474 = vmatmul.mubr.bf16.gmra.mrb[8].mxu0 %v9850_v60  ;;  %1554 = vmatmul.mubr.bf16.gmra.mrb[8].mxu1 %v9856_v62 }
 0x155   : > { %1623 = vmatpush1.bf16.msra.mxu1 %v8464_v63  ;;  %1816 = vmatpush1.bf16.msra.mxu0 %v8467_v0  ;;  %v8548_v63 = vld [vmem:[%s9546_s22 + $0x74] ss:$8 sps:$4 sm:$0xff]  }
 0x156   : > { %1624 = vmatprep.subr.bf16.mxu1 %v8472_v1  ;;  %1817 = vmatprep.subr.bf16.mxu0 %v8475_v2  ;;  %v9960_v0 = vld [vmem:[%s9546_s22 + $0xf4] ss:$8 sps:$4 sm:$0xff]   ;;  %v8542_v1 = vld [vmem:[%s9554_s2 + $0x278] ss:$24 sps:$4 sm:$0xff]  }
 0x157   : > { %1483 = vmatprep.mubr.bf16.mxu0 %v9863_v3  ;;  %1563 = vmatprep.mubr.bf16.mxu1 %v9866_v4  ;;  %v8545_v2 = vld [vmem:[%s9554_s2 + $0x280] ss:$24 sps:$4 sm:$0xff]  }
 0x159   : > { %1625 = vmatpush1.bf16.msra.mxu1 %v8470_v5  ;;  %1818 = vmatpush1.bf16.msra.mxu0 %v8473_v6  ;;  %v8556_v5 = vld [vmem:[%s9554_s2 + $0x2ac] ss:$24 sps:$4 sm:$0xff]  }
 0x15a   : > { %1626 = vmatprep.subr.bf16.mxu1 %v8484_v7  ;;  %1819 = vmatprep.subr.bf16.mxu0 %v8487_v8  ;;  %v8559_v6 = vld [vmem:[%s9554_s2 + $0x2b4] ss:$24 sps:$4 sm:$0xff]   ;;  %v8552_v7 = vld [vmem:[%s9546_s22 + $0x70] ss:$8 sps:$4 sm:$0xff]  }
 0x15b   : > { %v9971_v8 = vld [vmem:[%s9546_s22 + $0xf0] ss:$8 sps:$4 sm:$0xff]  }
 0x15c   : > { %1484 = vmatmul.mubr.bf16.gmra.mrb[12].mxu0 %v9877_v9  ;;  %1564 = vmatmul.mubr.bf16.gmra.mrb[12].mxu1 %v9880_v10 }
 0x15d   : > { %1627 = vmatpush1.bf16.msra.mxu1 %v8482_v11  ;;  %1820 = vmatpush1.bf16.msra.mxu0 %v8485_v12  ;;  %v8554_v11 = vld [vmem:[%s9554_s2 + $0x2a8] ss:$24 sps:$4 sm:$0xff]  }
 0x15e   : > { %1628 = vmatprep.subr.bf16.mxu1 %v8490_v13  ;;  %1821 = vmatprep.subr.bf16.mxu0 %v8493_v15  ;;  %v8557_v12 = vld [vmem:[%s9554_s2 + $0x2b0] ss:$24 sps:$4 sm:$0xff]   ;;  %v8562_v13 = vld [vmem:[%s9554_s2 + $0x2dc] ss:$24 sps:$4 sm:$0xff]  }
 0x15f   : > { %1493 = vmatprep.mubr.bf16.mxu0 %v9887_v17  ;;  %1573 = vmatprep.mubr.bf16.mxu1 %v9890_v18  ;;  %v8565_v15 = vld [vmem:[%s9554_s2 + $0x2e4] ss:$24 sps:$4 sm:$0xff]  }
 0x161   : > { %1629 = vmatpush1.bf16.msra.mxu1 %v8488_v19  ;;  %1822 = vmatpush1.bf16.msra.mxu0 %v8491_v20  ;;  %v8560_v19 = vld [vmem:[%s9554_s2 + $0x2d8] ss:$24 sps:$4 sm:$0xff]  }
 0x162   : > { %1630 = vmatprep.subr.bf16.mxu1 %v8502_v21  ;;  %1823 = vmatprep.subr.bf16.mxu0 %v8505_v22  ;;  %v8563_v20 = vld [vmem:[%s9554_s2 + $0x2e0] ss:$24 sps:$4 sm:$0xff]  }
 0x164   : > { %1494 = vmatmul.mubr.bf16.gmra.mrb[16].mxu0 %v9901_v23  ;;  %1574 = vmatmul.mubr.bf16.gmra.mrb[16].mxu1 %v9904_v24 }
 0x165   : > { %1631 = vmatpush1.bf16.msra.mxu1 %v8500_v25  ;;  %1824 = vmatpush1.bf16.msra.mxu0 %v8503_v26 }
 0x166   : > { %1632 = vmatprep.subr.bf16.mxu1 %v8508_v27  ;;  %1825 = vmatprep.subr.bf16.mxu0 %v8511_v28  ;;  %v473_v27 = vld [vmem:[#allocation2 + $0x60] sm:$0xff] }
 0x167   : > { %1503 = vmatprep.mubr.bf16.mxu0 %v9911_v29  ;;  %1583 = vmatprep.mubr.bf16.mxu1 %v9914_v30  ;;  %v569_v28 = vld [vmem:[#allocation2 + $0x360] sm:$0xff] }
 0x169   : > { %1633 = vmatpush1.bf16.msra.mxu1 %v8506_v31  ;;  %1826 = vmatpush1.bf16.msra.mxu0 %v8509_v32 }
 0x16a   : > { %1634 = vmatprep.subr.bf16.mxu1 %v8520_v33  ;;  %1827 = vmatprep.subr.bf16.mxu0 %v8523_v34  ;;  %v479_v33 = vld [vmem:[#allocation2 + $0x90] sm:$0xff] }
 0x16b   : > { %v575_v34 = vld [vmem:[#allocation2 + $0x390] sm:$0xff] }
 0x16c   : > { %1504 = vmatmul.mubr.bf16.gmra.mrb[20].mxu0 %v9925_v35  ;;  %1584 = vmatmul.mubr.bf16.gmra.mrb[20].mxu1 %v9928_v37 }
 0x16d   : > { %1635 = vmatpush1.bf16.msra.mxu1 %v8518_v39  ;;  %1828 = vmatpush1.bf16.msra.mxu0 %v8521_v40 }
 0x16e   : > { %1636 = vmatprep.subr.bf16.mxu1 %v8526_v41  ;;  %1829 = vmatprep.subr.bf16.mxu0 %v8529_v42  ;;  %v480_v41 = vld [vmem:[#allocation2 + $0x98] sm:$0xff] }
 0x16f   : > { %1513 = vmatprep.mubr.bf16.mxu0 %v9935_v45  ;;  %1593 = vmatprep.mubr.bf16.mxu1 %v9938_v46  ;;  %v576_v42 = vld [vmem:[#allocation2 + $0x398] sm:$0xff] }
 0x171   : > { %1637 = vmatpush1.bf16.msra.mxu1 %v8524_v47  ;;  %1830 = vmatpush1.bf16.msra.mxu0 %v8527_v49 }
 0x172   : > { %1638 = vmatprep.subr.bf16.mxu1 %v8538_v51  ;;  %1831 = vmatprep.subr.bf16.mxu0 %v8541_v52 }
 0x174   : > { %1514 = vmatmul.mubr.bf16.gmra.mrb[24].mxu0 %v9949_v53  ;;  %1594 = vmatmul.mubr.bf16.gmra.mrb[24].mxu1 %v9952_v54 }
 0x175   : > { %1639 = vmatpush1.bf16.msra.mxu1 %v8536_v57  ;;  %1832 = vmatpush1.bf16.msra.mxu0 %v8539_v58 }
 0x176   : > { %1640 = vmatprep.subr.bf16.mxu1 %v8544_v59  ;;  %1833 = vmatprep.subr.bf16.mxu0 %v8547_v61  ;;  %v485_v59 = vld [vmem:[#allocation2 + $0xc0] sm:$0xff] }
 0x177   : > { %1523 = vmatprep.mubr.bf16.mxu0 %v8548_v63  ;;  %1603 = vmatprep.mubr.bf16.mxu1 %v9960_v0  ;;  %v581_v61 = vld [vmem:[#allocation2 + $0x3c0] sm:$0xff] }
 0x179   : > { %1641 = vmatpush1.bf16.msra.mxu1 %v8542_v1  ;;  %1834 = vmatpush1.bf16.msra.mxu0 %v8545_v2 }
 0x17a   : > { %1642 = vmatprep.subr.bf16.mxu1 %v8556_v5  ;;  %1835 = vmatprep.subr.bf16.mxu0 %v8559_v6  ;;  %v491_v5 = vld [vmem:[#allocation2 + $0xf0] sm:$0xff] }
 0x17b   : > { %v587_v6 = vld [vmem:[#allocation2 + $0x3f0] sm:$0xff] }
 0x17c   : > { %1524 = vmatmul.mubr.bf16.gmra.mrb[28].mxu0 %v8552_v7  ;;  %1604 = vmatmul.mubr.bf16.gmra.mrb[28].mxu1 %v9971_v8 }
 0x17d   : > { %1643 = vmatpush1.bf16.msra.mxu1 %v8554_v11  ;;  %1836 = vmatpush1.bf16.msra.mxu0 %v8557_v12 }
 0x17e   : > { %1644 = vmatprep.subr.bf16.mxu1 %v8562_v13  ;;  %1837 = vmatprep.subr.bf16.mxu0 %v8565_v15  ;;  %v492_v13 = vld [vmem:[#allocation2 + $0xf8] sm:$0xff] }
 0x17f   : > { %1646 = vmatprep.mubr.bf16.mxu1 %v9776_v14  ;;  %1839 = vmatprep.mubr.bf16.mxu0 %v9776_v14  ;;  %v461_v14 = vld [vmem:[#allocation2] sm:$0xff]  ;;  %v588_v15 = vld [vmem:[#allocation2 + $0x3f8] sm:$0xff] }
 0x181   : > { %1645 = vmatpush1.bf16.msra.mxu1 %v8560_v19  ;;  %1838 = vmatpush1.bf16.msra.mxu0 %v8563_v20 }
 0x184   : > { %1647 = vmatmul.mubr.bf16.vlgmr.msra.gmra.mrb[32].mxu1 %v9804_v36  ;;  %1840 = vmatmul.mubr.bf16.vlgmr.msra.gmra.mrb[32].mxu0 %v9804_v36  ;;  %v462_v36 = vld [vmem:[#allocation2 + $0x8] sm:$0xff] }
 0x185   : > { %1656 = vmatprep.mubr.bf16.mxu1 %v9815_v43  ;;  %1849 = vmatprep.mubr.bf16.mxu0 %v9815_v43 }
 0x18c   : > { %1657 = vmatmul.mubr.bf16.gmra.mrb[36].mxu1 %v9826_v48  ;;  %1850 = vmatmul.mubr.bf16.gmra.mrb[36].mxu0 %v9826_v48  ;;  %v467_v48 = vld [vmem:[#allocation2 + $0x30] sm:$0xff] }
 0x18d   : > { %1666 = vmatprep.mubr.bf16.mxu1 %v9839_v55  ;;  %1859 = vmatprep.mubr.bf16.mxu0 %v9839_v55 }
 0x194   : > { %1667 = vmatmul.mubr.bf16.gmra.mrb[40].mxu1 %v9850_v60  ;;  %1860 = vmatmul.mubr.bf16.gmra.mrb[40].mxu0 %v9850_v60 }
 0x195   : > { %1676 = vmatprep.mubr.bf16.mxu1 %v9863_v3  ;;  %1869 = vmatprep.mubr.bf16.mxu0 %v9863_v3  ;;  %v468_v3 = vld [vmem:[#allocation2 + $0x38] sm:$0xff] }
 0x19c   : > { %1677 = vmatmul.mubr.bf16.gmra.mrb[44].mxu1 %v9877_v9  ;;  %1870 = vmatmul.mubr.bf16.gmra.mrb[44].mxu0 %v9877_v9 }
 0x19d   : > { %1686 = vmatprep.mubr.bf16.mxu1 %v9887_v17  ;;  %1879 = vmatprep.mubr.bf16.mxu0 %v9887_v17 }
 0x1a4   : > { %1687 = vmatmul.mubr.bf16.gmra.mrb[48].mxu1 %v9901_v23  ;;  %1880 = vmatmul.mubr.bf16.gmra.mrb[48].mxu0 %v9901_v23 }
 0x1a5   : > { %1696 = vmatprep.mubr.bf16.mxu1 %v9911_v29  ;;  %1889 = vmatprep.mubr.bf16.mxu0 %v9911_v29  ;;  %v474_v29 = vld [vmem:[#allocation2 + $0x68] sm:$0xff] }
 0x1ac   : > { %1697 = vmatmul.mubr.bf16.gmra.mrb[52].mxu1 %v9925_v35  ;;  %1890 = vmatmul.mubr.bf16.gmra.mrb[52].mxu0 %v9925_v35 }
 0x1ad   : > { %1706 = vmatprep.mubr.bf16.mxu1 %v9935_v45  ;;  %1899 = vmatprep.mubr.bf16.mxu0 %v9935_v45 }
 0x1b4   : > { %1707 = vmatmul.mubr.bf16.gmra.mrb[56].mxu1 %v9949_v53  ;;  %1900 = vmatmul.mubr.bf16.gmra.mrb[56].mxu0 %v9949_v53 }
 0x1b5   : > { %1716 = vmatprep.mubr.bf16.mxu1 %v8548_v63  ;;  %1909 = vmatprep.mubr.bf16.mxu0 %v8548_v63  ;;  %v486_v63 = vld [vmem:[#allocation2 + $0xc8] sm:$0xff] }
 0x1bc   : > { %1717 = vmatmul.mubr.bf16.gmra.mrb[60].mxu1 %v8552_v7  ;;  %1910 = vmatmul.mubr.bf16.gmra.mrb[60].mxu0 %v8552_v7 }
 0x1bd   : > { %1726 = vmatprep.mubr.bf16.mxu1 %v9780_v16  ;;  %1919 = vmatprep.mubr.bf16.mxu0 %v9780_v16  ;;  %v557_v16 = vld [vmem:[#allocation2 + $0x300] sm:$0xff] }
 0x1c4   : > { %1727 = vmatmul.mubr.bf16.gmra.mrb[64].mxu1 %v9808_v38  ;;  %1920 = vmatmul.mubr.bf16.gmra.mrb[64].mxu0 %v9808_v38  ;;  %v558_v38 = vld [vmem:[#allocation2 + $0x308] sm:$0xff] }
 0x1c5   : > { %1736 = vmatprep.mubr.bf16.mxu1 %v9818_v44  ;;  %1929 = vmatprep.mubr.bf16.mxu0 %v9818_v44 }
 0x1cc   : > { %1737 = vmatmul.mubr.bf16.gmra.mrb[68].mxu1 %v9832_v50  ;;  %1930 = vmatmul.mubr.bf16.gmra.mrb[68].mxu0 %v9832_v50  ;;  %v563_v50 = vld [vmem:[#allocation2 + $0x330] sm:$0xff] }
 0x1cd   : > { %1746 = vmatprep.mubr.bf16.mxu1 %v9842_v56  ;;  %1939 = vmatprep.mubr.bf16.mxu0 %v9842_v56 }
 0x1d4   : > { %1747 = vmatmul.mubr.bf16.gmra.mrb[72].mxu1 %v9856_v62  ;;  %1940 = vmatmul.mubr.bf16.gmra.mrb[72].mxu0 %v9856_v62 }
 0x1d5   : > { %1756 = vmatprep.mubr.bf16.mxu1 %v9866_v4  ;;  %1949 = vmatprep.mubr.bf16.mxu0 %v9866_v4  ;;  %v564_v4 = vld [vmem:[#allocation2 + $0x338] sm:$0xff] }
 0x1dc   : > { %1757 = vmatmul.mubr.bf16.gmra.mrb[76].mxu1 %v9880_v10  ;;  %1950 = vmatmul.mubr.bf16.gmra.mrb[76].mxu0 %v9880_v10 }
 0x1dd   : > { %1766 = vmatprep.mubr.bf16.mxu1 %v9890_v18  ;;  %1959 = vmatprep.mubr.bf16.mxu0 %v9890_v18 }
 0x1e4   : > { %1767 = vmatmul.mubr.bf16.gmra.mrb[80].mxu1 %v9904_v24  ;;  %1960 = vmatmul.mubr.bf16.gmra.mrb[80].mxu0 %v9904_v24 }
 0x1e5   : > { %1776 = vmatprep.mubr.bf16.mxu1 %v9914_v30  ;;  %1969 = vmatprep.mubr.bf16.mxu0 %v9914_v30  ;;  %v570_v30 = vld [vmem:[#allocation2 + $0x368] sm:$0xff] }
 0x1ec   : > { %1777 = vmatmul.mubr.bf16.gmra.mrb[84].mxu1 %v9928_v37  ;;  %1970 = vmatmul.mubr.bf16.gmra.mrb[84].mxu0 %v9928_v37 }
 0x1ed   : > { %1786 = vmatprep.mubr.bf16.mxu1 %v9938_v46  ;;  %1979 = vmatprep.mubr.bf16.mxu0 %v9938_v46 }
 0x1f4   : > { %1787 = vmatmul.mubr.bf16.gmra.mrb[88].mxu1 %v9952_v54  ;;  %1980 = vmatmul.mubr.bf16.gmra.mrb[88].mxu0 %v9952_v54 }
 0x1f5   : > { %1796 = vmatprep.mubr.bf16.mxu1 %v9960_v0  ;;  %1989 = vmatprep.mubr.bf16.mxu0 %v9960_v0  ;;  %v582_v0 = vld [vmem:[#allocation2 + $0x3c8] sm:$0xff] }
 0x1fc   : > { %1797 = vmatmul.mubr.bf16.gmra.mrb[92].mxu1 %v9971_v8  ;;  %1990 = vmatmul.mubr.bf16.gmra.mrb[92].mxu0 %v9971_v8 }
 0x217   : > { %v1455_v43 = vpop.f32.mrb[0].mxu0  ;;  %v1535_v44 = vpop.f32.mrb[0].mxu1 }
 0x218   : > { %v2000_v55 = vadd.f32 %v1455_v43, %v461_v14  ;;  %v2096_v56 = vadd.f32 %v1535_v44, %v557_v16  ;;  %v1457_v60 = vpop.f32.mrb[1].mxu0  ;;  %v1537_v62 = vpop.f32.mrb[1].mxu1 }
 0x219   : > { %v2001_v9 = vadd.f32 %v1457_v60, %v462_v36  ;;  %v2097_v10 = vadd.f32 %v1537_v62, %v558_v38  ;;  %v1459_v17 = vpop.f32.mrb[2].mxu0  ;;  %v1539_v18 = vpop.f32.mrb[2].mxu1  ;;  %v498_v60 = vld [vmem:[#allocation2 + $0x128] sm:$0xff] }
 0x21a   : > { %2192 = vst [vmem:[#allocation2] sm:$0xff] %v2000_v55  ;;  %2288 = vst [vmem:[#allocation2 + $0x300] sm:$0xff] %v2096_v56  ;;  %v2006_v21 = vadd.f32 %v1459_v17, %v467_v48  ;;  %v2102_v22 = vadd.f32 %v1539_v18, %v563_v50  ;;  %v1461_v23 = vpop.f32.mrb[3].mxu0  ;;  %v1541_v24 = vpop.f32.mrb[3].mxu1  ;;  %v497_v55 = vld [vmem:[#allocation2 + $0x120] sm:$0xff]  ;;  %v594_v62 = vld [vmem:[#allocation2 + $0x428] sm:$0xff] }
 0x21b   : > { %2193 = vst [vmem:[#allocation2 + $0x8] sm:$0xff] %v2001_v9  ;;  %2289 = vst [vmem:[#allocation2 + $0x308] sm:$0xff] %v2097_v10  ;;  %v2007_v25 = vadd.f32 %v1461_v23, %v468_v3  ;;  %v2103_v26 = vadd.f32 %v1541_v24, %v564_v4  ;;  %v593_v56 = vld [vmem:[#allocation2 + $0x420] sm:$0xff]  ;;  %v503_v9 = vld [vmem:[#allocation2 + $0x150] sm:$0xff] }
 0x21c   : > { %2198 = vst [vmem:[#allocation2 + $0x30] sm:$0xff] %v2006_v21  ;;  %2294 = vst [vmem:[#allocation2 + $0x330] sm:$0xff] %v2102_v22  ;;  %v599_v10 = vld [vmem:[#allocation2 + $0x450] sm:$0xff]  ;;  %v504_v23 = vld [vmem:[#allocation2 + $0x158] sm:$0xff] }
 0x21d   : > { %2199 = vst [vmem:[#allocation2 + $0x38] sm:$0xff] %v2007_v25  ;;  %2295 = vst [vmem:[#allocation2 + $0x338] sm:$0xff] %v2103_v26  ;;  %v600_v24 = vld [vmem:[#allocation2 + $0x458] sm:$0xff] }
 0x21f   : > { %v1465_v31 = vpop.f32.mrb[4].mxu0  ;;  %v1545_v32 = vpop.f32.mrb[4].mxu1 }
 0x220   : > { %v2012_v35 = vadd.f32 %v1465_v31, %v473_v27  ;;  %v2108_v37 = vadd.f32 %v1545_v32, %v569_v28  ;;  %v1467_v39 = vpop.f32.mrb[5].mxu0  ;;  %v1547_v40 = vpop.f32.mrb[5].mxu1 }
 0x221   : > { %v2013_v45 = vadd.f32 %v1467_v39, %v474_v29  ;;  %v2109_v46 = vadd.f32 %v1547_v40, %v570_v30  ;;  %v1469_v47 = vpop.f32.mrb[6].mxu0  ;;  %v1549_v49 = vpop.f32.mrb[6].mxu1  ;;  %v510_v39 = vld [vmem:[#allocation2 + $0x188] sm:$0xff] }
 0x222   : > { %2204 = vst [vmem:[#allocation2 + $0x60] sm:$0xff] %v2012_v35  ;;  %2300 = vst [vmem:[#allocation2 + $0x360] sm:$0xff] %v2108_v37  ;;  %v2018_v51 = vadd.f32 %v1469_v47, %v479_v33  ;;  %v2114_v52 = vadd.f32 %v1549_v49, %v575_v34  ;;  %v1471_v53 = vpop.f32.mrb[7].mxu0  ;;  %v1551_v54 = vpop.f32.mrb[7].mxu1  ;;  %v509_v35 = vld [vmem:[#allocation2 + $0x180] sm:$0xff]  ;;  %v606_v40 = vld [vmem:[#allocation2 + $0x488] sm:$0xff] }
 0x223   : > { %2205 = vst [vmem:[#allocation2 + $0x68] sm:$0xff] %v2013_v45  ;;  %2301 = vst [vmem:[#allocation2 + $0x368] sm:$0xff] %v2109_v46  ;;  %v2019_v57 = vadd.f32 %v1471_v53, %v480_v41  ;;  %v2115_v58 = vadd.f32 %v1551_v54, %v576_v42  ;;  %v605_v37 = vld [vmem:[#allocation2 + $0x480] sm:$0xff]  ;;  %v515_v45 = vld [vmem:[#allocation2 + $0x1b0] sm:$0xff] }
 0x224   : > { %2210 = vst [vmem:[#allocation2 + $0x90] sm:$0xff] %v2018_v51  ;;  %2306 = vst [vmem:[#allocation2 + $0x390] sm:$0xff] %v2114_v52  ;;  %v611_v46 = vld [vmem:[#allocation2 + $0x4b0] sm:$0xff]  ;;  %v516_v53 = vld [vmem:[#allocation2 + $0x1b8] sm:$0xff] }
 0x225   : > { %2211 = vst [vmem:[#allocation2 + $0x98] sm:$0xff] %v2019_v57  ;;  %2307 = vst [vmem:[#allocation2 + $0x398] sm:$0xff] %v2115_v58  ;;  %v612_v54 = vld [vmem:[#allocation2 + $0x4b8] sm:$0xff] }
 0x227   : > { %v1475_v1 = vpop.f32.mrb[8].mxu0  ;;  %v1555_v2 = vpop.f32.mrb[8].mxu1 }
 0x228   : > { %v2024_v7 = vadd.f32 %v1475_v1, %v485_v59  ;;  %v2120_v8 = vadd.f32 %v1555_v2, %v581_v61  ;;  %v1477_v11 = vpop.f32.mrb[9].mxu0  ;;  %v1557_v12 = vpop.f32.mrb[9].mxu1 }
 0x229   : > { %v2025_v19 = vadd.f32 %v1477_v11, %v486_v63  ;;  %v2121_v20 = vadd.f32 %v1557_v12, %v582_v0  ;;  %v1479_v14 = vpop.f32.mrb[10].mxu0  ;;  %v1559_v16 = vpop.f32.mrb[10].mxu1  ;;  %v522_v11 = vld [vmem:[#allocation2 + $0x1e8] sm:$0xff] }
 0x22a   : > { %2216 = vst [vmem:[#allocation2 + $0xc0] sm:$0xff] %v2024_v7  ;;  %2312 = vst [vmem:[#allocation2 + $0x3c0] sm:$0xff] %v2120_v8  ;;  %v2030_v36 = vadd.f32 %v1479_v14, %v491_v5  ;;  %v2126_v38 = vadd.f32 %v1559_v16, %v587_v6  ;;  %v1481_v43 = vpop.f32.mrb[11].mxu0  ;;  %v1561_v44 = vpop.f32.mrb[11].mxu1  ;;  %v521_v7 = vld [vmem:[#allocation2 + $0x1e0] sm:$0xff]  ;;  %v618_v12 = vld [vmem:[#allocation2 + $0x4e8] sm:$0xff] }
 0x22b   : > { %2217 = vst [vmem:[#allocation2 + $0xc8] sm:$0xff] %v2025_v19  ;;  %2313 = vst [vmem:[#allocation2 + $0x3c8] sm:$0xff] %v2121_v20  ;;  %v2031_v48 = vadd.f32 %v1481_v43, %v492_v13  ;;  %v2127_v50 = vadd.f32 %v1561_v44, %v588_v15  ;;  %v617_v8 = vld [vmem:[#allocation2 + $0x4e0] sm:$0xff]  ;;  %v527_v19 = vld [vmem:[#allocation2 + $0x210] sm:$0xff] }
 0x22c   : > { %2222 = vst [vmem:[#allocation2 + $0xf0] sm:$0xff] %v2030_v36  ;;  %2318 = vst [vmem:[#allocation2 + $0x3f0] sm:$0xff] %v2126_v38  ;;  %v623_v20 = vld [vmem:[#allocation2 + $0x510] sm:$0xff]  ;;  %v528_v43 = vld [vmem:[#allocation2 + $0x218] sm:$0xff] }
 0x22d   : > { %2223 = vst [vmem:[#allocation2 + $0xf8] sm:$0xff] %v2031_v48  ;;  %2319 = vst [vmem:[#allocation2 + $0x3f8] sm:$0xff] %v2127_v50  ;;  %v624_v44 = vld [vmem:[#allocation2 + $0x518] sm:$0xff] }
 0x22f   : > { %v1485_v3 = vpop.f32.mrb[12].mxu0  ;;  %v1565_v4 = vpop.f32.mrb[12].mxu1 }
 0x230   : > { %v2036_v17 = vadd.f32 %v1485_v3, %v497_v55  ;;  %v2132_v18 = vadd.f32 %v1565_v4, %v593_v56  ;;  %v1487_v21 = vpop.f32.mrb[13].mxu0  ;;  %v1567_v22 = vpop.f32.mrb[13].mxu1 }
 0x231   : > { %v2037_v25 = vadd.f32 %v1487_v21, %v498_v60  ;;  %v2133_v26 = vadd.f32 %v1567_v22, %v594_v62  ;;  %v1489_v27 = vpop.f32.mrb[14].mxu0  ;;  %v1569_v28 = vpop.f32.mrb[14].mxu1  ;;  %v534_v21 = vld [vmem:[#allocation2 + $0x248] sm:$0xff] }
 0x232   : > { %2228 = vst [vmem:[#allocation2 + $0x120] sm:$0xff] %v2036_v17  ;;  %2324 = vst [vmem:[#allocation2 + $0x420] sm:$0xff] %v2132_v18  ;;  %v2042_v29 = vadd.f32 %v1489_v27, %v503_v9  ;;  %v2138_v30 = vadd.f32 %v1569_v28, %v599_v10  ;;  %v1491_v31 = vpop.f32.mrb[15].mxu0  ;;  %v1571_v32 = vpop.f32.mrb[15].mxu1  ;;  %v533_v17 = vld [vmem:[#allocation2 + $0x240] sm:$0xff]  ;;  %v630_v22 = vld [vmem:[#allocation2 + $0x548] sm:$0xff] }
 0x233   : > { %2229 = vst [vmem:[#allocation2 + $0x128] sm:$0xff] %v2037_v25  ;;  %2325 = vst [vmem:[#allocation2 + $0x428] sm:$0xff] %v2133_v26  ;;  %v2043_v33 = vadd.f32 %v1491_v31, %v504_v23  ;;  %v2139_v34 = vadd.f32 %v1571_v32, %v600_v24  ;;  %v629_v18 = vld [vmem:[#allocation2 + $0x540] sm:$0xff]  ;;  %v539_v25 = vld [vmem:[#allocation2 + $0x270] sm:$0xff] }
 0x234   : > { %2234 = vst [vmem:[#allocation2 + $0x150] sm:$0xff] %v2042_v29  ;;  %2330 = vst [vmem:[#allocation2 + $0x450] sm:$0xff] %v2138_v30  ;;  %v635_v26 = vld [vmem:[#allocation2 + $0x570] sm:$0xff]  ;;  %v540_v31 = vld [vmem:[#allocation2 + $0x278] sm:$0xff] }
 0x235   : > { %2235 = vst [vmem:[#allocation2 + $0x158] sm:$0xff] %v2043_v33  ;;  %2331 = vst [vmem:[#allocation2 + $0x458] sm:$0xff] %v2139_v34  ;;  %v636_v32 = vld [vmem:[#allocation2 + $0x578] sm:$0xff] }
 0x237   : > { %v1495_v41 = vpop.f32.mrb[16].mxu0  ;;  %v1575_v42 = vpop.f32.mrb[16].mxu1 }
 0x238   : > { %v2048_v47 = vadd.f32 %v1495_v41, %v509_v35  ;;  %v2144_v49 = vadd.f32 %v1575_v42, %v605_v37  ;;  %v1497_v51 = vpop.f32.mrb[17].mxu0  ;;  %v1577_v52 = vpop.f32.mrb[17].mxu1 }
 0x239   : > { %v2049_v57 = vadd.f32 %v1497_v51, %v510_v39  ;;  %v2145_v58 = vadd.f32 %v1577_v52, %v606_v40  ;;  %v1499_v59 = vpop.f32.mrb[18].mxu0  ;;  %v1579_v61 = vpop.f32.mrb[18].mxu1  ;;  %v546_v51 = vld [vmem:[#allocation2 + $0x2a8] sm:$0xff] }
 0x23a   : > { %2240 = vst [vmem:[#allocation2 + $0x180] sm:$0xff] %v2048_v47  ;;  %2336 = vst [vmem:[#allocation2 + $0x480] sm:$0xff] %v2144_v49  ;;  %v2054_v63 = vadd.f32 %v1499_v59, %v515_v45  ;;  %v2150_v0 = vadd.f32 %v1579_v61, %v611_v46  ;;  %v1501_v1 = vpop.f32.mrb[19].mxu0  ;;  %v1581_v2 = vpop.f32.mrb[19].mxu1  ;;  %v545_v47 = vld [vmem:[#allocation2 + $0x2a0] sm:$0xff]  ;;  %v642_v52 = vld [vmem:[#allocation2 + $0x5a8] sm:$0xff] }
 0x23b   : > { %2241 = vst [vmem:[#allocation2 + $0x188] sm:$0xff] %v2049_v57  ;;  %2337 = vst [vmem:[#allocation2 + $0x488] sm:$0xff] %v2145_v58  ;;  %v2055_v5 = vadd.f32 %v1501_v1, %v516_v53  ;;  %v2151_v6 = vadd.f32 %v1581_v2, %v612_v54  ;;  %v641_v49 = vld [vmem:[#allocation2 + $0x5a0] sm:$0xff]  ;;  %v551_v57 = vld [vmem:[#allocation2 + $0x2d0] sm:$0xff] }
 0x23c   : > { %2246 = vst [vmem:[#allocation2 + $0x1b0] sm:$0xff] %v2054_v63  ;;  %2342 = vst [vmem:[#allocation2 + $0x4b0] sm:$0xff] %v2150_v0  ;;  %v647_v58 = vld [vmem:[#allocation2 + $0x5d0] sm:$0xff]  ;;  %v552_v1 = vld [vmem:[#allocation2 + $0x2d8] sm:$0xff] }
 0x23d   : > { %2247 = vst [vmem:[#allocation2 + $0x1b8] sm:$0xff] %v2055_v5  ;;  %2343 = vst [vmem:[#allocation2 + $0x4b8] sm:$0xff] %v2151_v6  ;;  %v648_v2 = vld [vmem:[#allocation2 + $0x5d8] sm:$0xff] }
 0x23f   : > { %v1505_v13 = vpop.f32.mrb[20].mxu0  ;;  %v1585_v15 = vpop.f32.mrb[20].mxu1 }
 0x240   : > { %v2060_v14 = vadd.f32 %v1505_v13, %v521_v7  ;;  %v2156_v16 = vadd.f32 %v1585_v15, %v617_v8  ;;  %v1507_v36 = vpop.f32.mrb[21].mxu0  ;;  %v1587_v38 = vpop.f32.mrb[21].mxu1 }
 0x241   : > { %v2061_v48 = vadd.f32 %v1507_v36, %v522_v11  ;;  %v2157_v50 = vadd.f32 %v1587_v38, %v618_v12  ;;  %v1509_v55 = vpop.f32.mrb[22].mxu0  ;;  %v1589_v56 = vpop.f32.mrb[22].mxu1  ;;  %v464_v36 = vld [vmem:[#allocation2 + $0x18] sm:$0xff]  ;;  %v466_v38 = vld [vmem:[#allocation2 + $0x28] sm:$0xff] }
 0x242   : > { %2252 = vst [vmem:[#allocation2 + $0x1e0] sm:$0xff] %v2060_v14  ;;  %2348 = vst [vmem:[#allocation2 + $0x4e0] sm:$0xff] %v2156_v16  ;;  %v2066_v60 = vadd.f32 %v1509_v55, %v527_v19  ;;  %v2162_v62 = vadd.f32 %v1589_v56, %v623_v20  ;;  %v1511_v3 = vpop.f32.mrb[23].mxu0  ;;  %v1591_v4 = vpop.f32.mrb[23].mxu1  ;;  %v463_v14 = vld [vmem:[#allocation2 + $0x10] sm:$0xff]  ;;  %v465_v16 = vld [vmem:[#allocation2 + $0x20] sm:$0xff] }
 0x243   : > { %2253 = vst [vmem:[#allocation2 + $0x1e8] sm:$0xff] %v2061_v48  ;;  %2349 = vst [vmem:[#allocation2 + $0x4e8] sm:$0xff] %v2157_v50  ;;  %v2067_v9 = vadd.f32 %v1511_v3, %v528_v43  ;;  %v2163_v10 = vadd.f32 %v1591_v4, %v624_v44  ;;  %v469_v48 = vld [vmem:[#allocation2 + $0x40] sm:$0xff]  ;;  %v471_v50 = vld [vmem:[#allocation2 + $0x50] sm:$0xff] }
 0x244   : > { %2258 = vst [vmem:[#allocation2 + $0x210] sm:$0xff] %v2066_v60  ;;  %2354 = vst [vmem:[#allocation2 + $0x510] sm:$0xff] %v2162_v62  ;;  %v470_v3 = vld [vmem:[#allocation2 + $0x48] sm:$0xff]  ;;  %v472_v4 = vld [vmem:[#allocation2 + $0x58] sm:$0xff] }
 0x245   : > { %2259 = vst [vmem:[#allocation2 + $0x218] sm:$0xff] %v2067_v9  ;;  %2355 = vst [vmem:[#allocation2 + $0x518] sm:$0xff] %v2163_v10 }
 0x247   : > { %v1515_v23 = vpop.f32.mrb[24].mxu0  ;;  %v1595_v24 = vpop.f32.mrb[24].mxu1 }
 0x248   : > { %v2072_v27 = vadd.f32 %v1515_v23, %v533_v17  ;;  %v2168_v28 = vadd.f32 %v1595_v24, %v629_v18  ;;  %v1517_v29 = vpop.f32.mrb[25].mxu0  ;;  %v1597_v30 = vpop.f32.mrb[25].mxu1 }
 0x249   : > { %v2073_v33 = vadd.f32 %v1517_v29, %v534_v21  ;;  %v2169_v34 = vadd.f32 %v1597_v30, %v630_v22  ;;  %v1519_v35 = vpop.f32.mrb[26].mxu0  ;;  %v1599_v37 = vpop.f32.mrb[26].mxu1  ;;  %v476_v29 = vld [vmem:[#allocation2 + $0x78] sm:$0xff]  ;;  %v478_v30 = vld [vmem:[#allocation2 + $0x88] sm:$0xff] }
 0x24a   : > { %2264 = vst [vmem:[#allocation2 + $0x240] sm:$0xff] %v2072_v27  ;;  %2360 = vst [vmem:[#allocation2 + $0x540] sm:$0xff] %v2168_v28  ;;  %v2078_v39 = vadd.f32 %v1519_v35, %v539_v25  ;;  %v2174_v40 = vadd.f32 %v1599_v37, %v635_v26  ;;  %v1521_v41 = vpop.f32.mrb[27].mxu0  ;;  %v1601_v42 = vpop.f32.mrb[27].mxu1  ;;  %v475_v27 = vld [vmem:[#allocation2 + $0x70] sm:$0xff]  ;;  %v477_v28 = vld [vmem:[#allocation2 + $0x80] sm:$0xff] }
 0x24b   : > { %2265 = vst [vmem:[#allocation2 + $0x248] sm:$0xff] %v2073_v33  ;;  %2361 = vst [vmem:[#allocation2 + $0x548] sm:$0xff] %v2169_v34  ;;  %v2079_v45 = vadd.f32 %v1521_v41, %v540_v31  ;;  %v2175_v46 = vadd.f32 %v1601_v42, %v636_v32  ;;  %v481_v33 = vld [vmem:[#allocation2 + $0xa0] sm:$0xff]  ;;  %v483_v34 = vld [vmem:[#allocation2 + $0xb0] sm:$0xff] }
 0x24c   : > { %2270 = vst [vmem:[#allocation2 + $0x270] sm:$0xff] %v2078_v39  ;;  %2366 = vst [vmem:[#allocation2 + $0x570] sm:$0xff] %v2174_v40  ;;  %v482_v41 = vld [vmem:[#allocation2 + $0xa8] sm:$0xff]  ;;  %v484_v42 = vld [vmem:[#allocation2 + $0xb8] sm:$0xff] }
 0x24d   : > { %2271 = vst [vmem:[#allocation2 + $0x278] sm:$0xff] %v2079_v45  ;;  %2367 = vst [vmem:[#allocation2 + $0x578] sm:$0xff] %v2175_v46 }
 0x24f   : > { %v1525_v53 = vpop.f32.mrb[28].mxu0  ;;  %v1605_v54 = vpop.f32.mrb[28].mxu1 }
 0x250   : > { %v2084_v59 = vadd.f32 %v1525_v53, %v545_v47  ;;  %v2180_v61 = vadd.f32 %v1605_v54, %v641_v49  ;;  %v1527_v63 = vpop.f32.mrb[29].mxu0  ;;  %v1607_v0 = vpop.f32.mrb[29].mxu1 }
 0x251   : > { %v2085_v5 = vadd.f32 %v1527_v63, %v546_v51  ;;  %v2181_v6 = vadd.f32 %v1607_v0, %v642_v52  ;;  %v1529_v7 = vpop.f32.mrb[30].mxu0  ;;  %v1609_v8 = vpop.f32.mrb[30].mxu1  ;;  %v488_v63 = vld [vmem:[#allocation2 + $0xd8] sm:$0xff]  ;;  %v490_v0 = vld [vmem:[#allocation2 + $0xe8] sm:$0xff] }
 0x252   : > { %2276 = vst [vmem:[#allocation2 + $0x2a0] sm:$0xff] %v2084_v59  ;;  %2372 = vst [vmem:[#allocation2 + $0x5a0] sm:$0xff] %v2180_v61  ;;  %v2090_v11 = vadd.f32 %v1529_v7, %v551_v57  ;;  %v2186_v12 = vadd.f32 %v1609_v8, %v647_v58  ;;  %v1531_v13 = vpop.f32.mrb[31].mxu0  ;;  %v1611_v15 = vpop.f32.mrb[31].mxu1  ;;  %v487_v59 = vld [vmem:[#allocation2 + $0xd0] sm:$0xff]  ;;  %v489_v61 = vld [vmem:[#allocation2 + $0xe0] sm:$0xff] }
 0x253   : > { %2277 = vst [vmem:[#allocation2 + $0x2a8] sm:$0xff] %v2085_v5  ;;  %2373 = vst [vmem:[#allocation2 + $0x5a8] sm:$0xff] %v2181_v6  ;;  %v2091_v19 = vadd.f32 %v1531_v13, %v552_v1  ;;  %v2187_v20 = vadd.f32 %v1611_v15, %v648_v2  ;;  %v493_v5 = vld [vmem:[#allocation2 + $0x100] sm:$0xff]  ;;  %v495_v6 = vld [vmem:[#allocation2 + $0x110] sm:$0xff] }
 0x254   : > { %2282 = vst [vmem:[#allocation2 + $0x2d0] sm:$0xff] %v2090_v11  ;;  %2378 = vst [vmem:[#allocation2 + $0x5d0] sm:$0xff] %v2186_v12  ;;  %v494_v13 = vld [vmem:[#allocation2 + $0x108] sm:$0xff]  ;;  %v496_v15 = vld [vmem:[#allocation2 + $0x118] sm:$0xff] }
 0x255   : > { %2283 = vst [vmem:[#allocation2 + $0x2d8] sm:$0xff] %v2091_v19  ;;  %2379 = vst [vmem:[#allocation2 + $0x5d8] sm:$0xff] %v2187_v20 }
 0x257   : > { %v1648_v43 = vpop.f32.mrb[32].mxu1  ;;  %v1841_v44 = vpop.f32.mrb[32].mxu0 }
 0x258   : > { %v2002_v55 = vadd.f32 %v1648_v43, %v463_v14  ;;  %v2004_v56 = vadd.f32 %v1841_v44, %v465_v16  ;;  %v1650_v60 = vpop.f32.mrb[33].mxu1  ;;  %v1843_v62 = vpop.f32.mrb[33].mxu0 }
 0x259   : > { %v2003_v9 = vadd.f32 %v1650_v60, %v464_v36  ;;  %v2005_v10 = vadd.f32 %v1843_v62, %v466_v38  ;;  %v1652_v17 = vpop.f32.mrb[34].mxu1  ;;  %v1845_v18 = vpop.f32.mrb[34].mxu0  ;;  %v500_v60 = vld [vmem:[#allocation2 + $0x138] sm:$0xff]  ;;  %v502_v62 = vld [vmem:[#allocation2 + $0x148] sm:$0xff] }
 0x25a   : > { %2194 = vst [vmem:[#allocation2 + $0x10] sm:$0xff] %v2002_v55  ;;  %2196 = vst [vmem:[#allocation2 + $0x20] sm:$0xff] %v2004_v56  ;;  %v2008_v21 = vadd.f32 %v1652_v17, %v469_v48  ;;  %v2010_v22 = vadd.f32 %v1845_v18, %v471_v50  ;;  %v1654_v23 = vpop.f32.mrb[35].mxu1  ;;  %v1847_v24 = vpop.f32.mrb[35].mxu0  ;;  %v499_v55 = vld [vmem:[#allocation2 + $0x130] sm:$0xff]  ;;  %v501_v56 = vld [vmem:[#allocation2 + $0x140] sm:$0xff] }
 0x25b   : > { %2195 = vst [vmem:[#allocation2 + $0x18] sm:$0xff] %v2003_v9  ;;  %2197 = vst [vmem:[#allocation2 + $0x28] sm:$0xff] %v2005_v10  ;;  %v2009_v25 = vadd.f32 %v1654_v23, %v470_v3  ;;  %v2011_v26 = vadd.f32 %v1847_v24, %v472_v4  ;;  %v505_v9 = vld [vmem:[#allocation2 + $0x160] sm:$0xff]  ;;  %v507_v10 = vld [vmem:[#allocation2 + $0x170] sm:$0xff] }
 0x25c   : > { %2200 = vst [vmem:[#allocation2 + $0x40] sm:$0xff] %v2008_v21  ;;  %2202 = vst [vmem:[#allocation2 + $0x50] sm:$0xff] %v2010_v22  ;;  %v506_v23 = vld [vmem:[#allocation2 + $0x168] sm:$0xff]  ;;  %v508_v24 = vld [vmem:[#allocation2 + $0x178] sm:$0xff] }
 0x25d   : > { %2201 = vst [vmem:[#allocation2 + $0x48] sm:$0xff] %v2009_v25  ;;  %2203 = vst [vmem:[#allocation2 + $0x58] sm:$0xff] %v2011_v26 }
 0x25f   : > { %v1658_v31 = vpop.f32.mrb[36].mxu1  ;;  %v1851_v32 = vpop.f32.mrb[36].mxu0 }
 0x260   : > { %v2014_v35 = vadd.f32 %v1658_v31, %v475_v27  ;;  %v2016_v37 = vadd.f32 %v1851_v32, %v477_v28  ;;  %v1660_v39 = vpop.f32.mrb[37].mxu1  ;;  %v1853_v40 = vpop.f32.mrb[37].mxu0 }
 0x261   : > { %v2015_v45 = vadd.f32 %v1660_v39, %v476_v29  ;;  %v2017_v46 = vadd.f32 %v1853_v40, %v478_v30  ;;  %v1662_v47 = vpop.f32.mrb[38].mxu1  ;;  %v1855_v49 = vpop.f32.mrb[38].mxu0  ;;  %v512_v39 = vld [vmem:[#allocation2 + $0x198] sm:$0xff]  ;;  %v514_v40 = vld [vmem:[#allocation2 + $0x1a8] sm:$0xff] }
 0x262   : > { %2206 = vst [vmem:[#allocation2 + $0x70] sm:$0xff] %v2014_v35  ;;  %2208 = vst [vmem:[#allocation2 + $0x80] sm:$0xff] %v2016_v37  ;;  %v2020_v51 = vadd.f32 %v1662_v47, %v481_v33  ;;  %v2022_v52 = vadd.f32 %v1855_v49, %v483_v34  ;;  %v1664_v53 = vpop.f32.mrb[39].mxu1  ;;  %v1857_v54 = vpop.f32.mrb[39].mxu0  ;;  %v511_v35 = vld [vmem:[#allocation2 + $0x190] sm:$0xff]  ;;  %v513_v37 = vld [vmem:[#allocation2 + $0x1a0] sm:$0xff] }
 0x263   : > { %2207 = vst [vmem:[#allocation2 + $0x78] sm:$0xff] %v2015_v45  ;;  %2209 = vst [vmem:[#allocation2 + $0x88] sm:$0xff] %v2017_v46  ;;  %v2021_v57 = vadd.f32 %v1664_v53, %v482_v41  ;;  %v2023_v58 = vadd.f32 %v1857_v54, %v484_v42  ;;  %v517_v45 = vld [vmem:[#allocation2 + $0x1c0] sm:$0xff]  ;;  %v519_v46 = vld [vmem:[#allocation2 + $0x1d0] sm:$0xff] }
 0x264   : > { %2212 = vst [vmem:[#allocation2 + $0xa0] sm:$0xff] %v2020_v51  ;;  %2214 = vst [vmem:[#allocation2 + $0xb0] sm:$0xff] %v2022_v52  ;;  %v518_v53 = vld [vmem:[#allocation2 + $0x1c8] sm:$0xff]  ;;  %v520_v54 = vld [vmem:[#allocation2 + $0x1d8] sm:$0xff] }
 0x265   : > { %2213 = vst [vmem:[#allocation2 + $0xa8] sm:$0xff] %v2021_v57  ;;  %2215 = vst [vmem:[#allocation2 + $0xb8] sm:$0xff] %v2023_v58 }
 0x267   : > { %v1668_v1 = vpop.f32.mrb[40].mxu1  ;;  %v1861_v2 = vpop.f32.mrb[40].mxu0 }
 0x268   : > { %v2026_v7 = vadd.f32 %v1668_v1, %v487_v59  ;;  %v2028_v8 = vadd.f32 %v1861_v2, %v489_v61  ;;  %v1670_v11 = vpop.f32.mrb[41].mxu1  ;;  %v1863_v12 = vpop.f32.mrb[41].mxu0 }
 0x269   : > { %v2027_v19 = vadd.f32 %v1670_v11, %v488_v63  ;;  %v2029_v20 = vadd.f32 %v1863_v12, %v490_v0  ;;  %v1672_v14 = vpop.f32.mrb[42].mxu1  ;;  %v1865_v16 = vpop.f32.mrb[42].mxu0  ;;  %v524_v11 = vld [vmem:[#allocation2 + $0x1f8] sm:$0xff]  ;;  %v526_v12 = vld [vmem:[#allocation2 + $0x208] sm:$0xff] }
 0x26a   : > { %2218 = vst [vmem:[#allocation2 + $0xd0] sm:$0xff] %v2026_v7  ;;  %2220 = vst [vmem:[#allocation2 + $0xe0] sm:$0xff] %v2028_v8  ;;  %v2032_v36 = vadd.f32 %v1672_v14, %v493_v5  ;;  %v2034_v38 = vadd.f32 %v1865_v16, %v495_v6  ;;  %v1674_v43 = vpop.f32.mrb[43].mxu1  ;;  %v1867_v44 = vpop.f32.mrb[43].mxu0  ;;  %v523_v7 = vld [vmem:[#allocation2 + $0x1f0] sm:$0xff]  ;;  %v525_v8 = vld [vmem:[#allocation2 + $0x200] sm:$0xff] }
 0x26b   : > { %2219 = vst [vmem:[#allocation2 + $0xd8] sm:$0xff] %v2027_v19  ;;  %2221 = vst [vmem:[#allocation2 + $0xe8] sm:$0xff] %v2029_v20  ;;  %v2033_v48 = vadd.f32 %v1674_v43, %v494_v13  ;;  %v2035_v50 = vadd.f32 %v1867_v44, %v496_v15  ;;  %v529_v19 = vld [vmem:[#allocation2 + $0x220] sm:$0xff]  ;;  %v531_v20 = vld [vmem:[#allocation2 + $0x230] sm:$0xff] }
 0x26c   : > { %2224 = vst [vmem:[#allocation2 + $0x100] sm:$0xff] %v2032_v36  ;;  %2226 = vst [vmem:[#allocation2 + $0x110] sm:$0xff] %v2034_v38  ;;  %v530_v43 = vld [vmem:[#allocation2 + $0x228] sm:$0xff]  ;;  %v532_v44 = vld [vmem:[#allocation2 + $0x238] sm:$0xff] }
 0x26d   : > { %2225 = vst [vmem:[#allocation2 + $0x108] sm:$0xff] %v2033_v48  ;;  %2227 = vst [vmem:[#allocation2 + $0x118] sm:$0xff] %v2035_v50 }
 0x26f   : > { %v1678_v3 = vpop.f32.mrb[44].mxu1  ;;  %v1871_v4 = vpop.f32.mrb[44].mxu0 }
 0x270   : > { %v2038_v17 = vadd.f32 %v1678_v3, %v499_v55  ;;  %v2040_v18 = vadd.f32 %v1871_v4, %v501_v56  ;;  %v1680_v21 = vpop.f32.mrb[45].mxu1  ;;  %v1873_v22 = vpop.f32.mrb[45].mxu0 }
 0x271   : > { %v2039_v25 = vadd.f32 %v1680_v21, %v500_v60  ;;  %v2041_v26 = vadd.f32 %v1873_v22, %v502_v62  ;;  %v1682_v27 = vpop.f32.mrb[46].mxu1  ;;  %v1875_v28 = vpop.f32.mrb[46].mxu0  ;;  %v536_v21 = vld [vmem:[#allocation2 + $0x258] sm:$0xff]  ;;  %v538_v22 = vld [vmem:[#allocation2 + $0x268] sm:$0xff] }
 0x272   : > { %2230 = vst [vmem:[#allocation2 + $0x130] sm:$0xff] %v2038_v17  ;;  %2232 = vst [vmem:[#allocation2 + $0x140] sm:$0xff] %v2040_v18  ;;  %v2044_v29 = vadd.f32 %v1682_v27, %v505_v9  ;;  %v2046_v30 = vadd.f32 %v1875_v28, %v507_v10  ;;  %v1684_v31 = vpop.f32.mrb[47].mxu1  ;;  %v1877_v32 = vpop.f32.mrb[47].mxu0  ;;  %v535_v17 = vld [vmem:[#allocation2 + $0x250] sm:$0xff]  ;;  %v537_v18 = vld [vmem:[#allocation2 + $0x260] sm:$0xff] }
 0x273   : > { %2231 = vst [vmem:[#allocation2 + $0x138] sm:$0xff] %v2039_v25  ;;  %2233 = vst [vmem:[#allocation2 + $0x148] sm:$0xff] %v2041_v26  ;;  %v2045_v33 = vadd.f32 %v1684_v31, %v506_v23  ;;  %v2047_v34 = vadd.f32 %v1877_v32, %v508_v24  ;;  %v541_v25 = vld [vmem:[#allocation2 + $0x280] sm:$0xff]  ;;  %v543_v26 = vld [vmem:[#allocation2 + $0x290] sm:$0xff] }
 0x274   : > { %2236 = vst [vmem:[#allocation2 + $0x160] sm:$0xff] %v2044_v29  ;;  %2238 = vst [vmem:[#allocation2 + $0x170] sm:$0xff] %v2046_v30  ;;  %v542_v31 = vld [vmem:[#allocation2 + $0x288] sm:$0xff]  ;;  %v544_v32 = vld [vmem:[#allocation2 + $0x298] sm:$0xff] }
 0x275   : > { %2237 = vst [vmem:[#allocation2 + $0x168] sm:$0xff] %v2045_v33  ;;  %2239 = vst [vmem:[#allocation2 + $0x178] sm:$0xff] %v2047_v34 }
 0x277   : > { %v1688_v41 = vpop.f32.mrb[48].mxu1  ;;  %v1881_v42 = vpop.f32.mrb[48].mxu0 }
 0x278   : > { %v2050_v47 = vadd.f32 %v1688_v41, %v511_v35  ;;  %v2052_v49 = vadd.f32 %v1881_v42, %v513_v37  ;;  %v1690_v51 = vpop.f32.mrb[49].mxu1  ;;  %v1883_v52 = vpop.f32.mrb[49].mxu0 }
 0x279   : > { %v2051_v57 = vadd.f32 %v1690_v51, %v512_v39  ;;  %v2053_v58 = vadd.f32 %v1883_v52, %v514_v40  ;;  %v1692_v59 = vpop.f32.mrb[50].mxu1  ;;  %v1885_v61 = vpop.f32.mrb[50].mxu0  ;;  %v548_v51 = vld [vmem:[#allocation2 + $0x2b8] sm:$0xff]  ;;  %v550_v52 = vld [vmem:[#allocation2 + $0x2c8] sm:$0xff] }
 0x27a   : > { %2242 = vst [vmem:[#allocation2 + $0x190] sm:$0xff] %v2050_v47  ;;  %2244 = vst [vmem:[#allocation2 + $0x1a0] sm:$0xff] %v2052_v49  ;;  %v2056_v63 = vadd.f32 %v1692_v59, %v517_v45  ;;  %v2058_v0 = vadd.f32 %v1885_v61, %v519_v46  ;;  %v1694_v1 = vpop.f32.mrb[51].mxu1  ;;  %v1887_v2 = vpop.f32.mrb[51].mxu0  ;;  %v547_v47 = vld [vmem:[#allocation2 + $0x2b0] sm:$0xff]  ;;  %v549_v49 = vld [vmem:[#allocation2 + $0x2c0] sm:$0xff] }
 0x27b   : > { %2243 = vst [vmem:[#allocation2 + $0x198] sm:$0xff] %v2051_v57  ;;  %2245 = vst [vmem:[#allocation2 + $0x1a8] sm:$0xff] %v2053_v58  ;;  %v2057_v5 = vadd.f32 %v1694_v1, %v518_v53  ;;  %v2059_v6 = vadd.f32 %v1887_v2, %v520_v54  ;;  %v553_v57 = vld [vmem:[#allocation2 + $0x2e0] sm:$0xff]  ;;  %v555_v58 = vld [vmem:[#allocation2 + $0x2f0] sm:$0xff] }
 0x27c   : > { %2248 = vst [vmem:[#allocation2 + $0x1c0] sm:$0xff] %v2056_v63  ;;  %2250 = vst [vmem:[#allocation2 + $0x1d0] sm:$0xff] %v2058_v0  ;;  %v554_v1 = vld [vmem:[#allocation2 + $0x2e8] sm:$0xff]  ;;  %v556_v2 = vld [vmem:[#allocation2 + $0x2f8] sm:$0xff] }
 0x27d   : > { %2249 = vst [vmem:[#allocation2 + $0x1c8] sm:$0xff] %v2057_v5  ;;  %2251 = vst [vmem:[#allocation2 + $0x1d8] sm:$0xff] %v2059_v6 }
 0x27f   : > { %v1698_v13 = vpop.f32.mrb[52].mxu1  ;;  %v1891_v15 = vpop.f32.mrb[52].mxu0 }
 0x280   : > { %v2062_v14 = vadd.f32 %v1698_v13, %v523_v7  ;;  %v2064_v16 = vadd.f32 %v1891_v15, %v525_v8  ;;  %v1700_v36 = vpop.f32.mrb[53].mxu1  ;;  %v1893_v38 = vpop.f32.mrb[53].mxu0 }
 0x281   : > { %v2063_v48 = vadd.f32 %v1700_v36, %v524_v11  ;;  %v2065_v50 = vadd.f32 %v1893_v38, %v526_v12  ;;  %v1702_v55 = vpop.f32.mrb[54].mxu1  ;;  %v1895_v56 = vpop.f32.mrb[54].mxu0  ;;  %v560_v36 = vld [vmem:[#allocation2 + $0x318] sm:$0xff]  ;;  %v562_v38 = vld [vmem:[#allocation2 + $0x328] sm:$0xff] }
 0x282   : > { %2254 = vst [vmem:[#allocation2 + $0x1f0] sm:$0xff] %v2062_v14  ;;  %2256 = vst [vmem:[#allocation2 + $0x200] sm:$0xff] %v2064_v16  ;;  %v2068_v60 = vadd.f32 %v1702_v55, %v529_v19  ;;  %v2070_v62 = vadd.f32 %v1895_v56, %v531_v20  ;;  %v1704_v3 = vpop.f32.mrb[55].mxu1  ;;  %v1897_v4 = vpop.f32.mrb[55].mxu0  ;;  %v559_v14 = vld [vmem:[#allocation2 + $0x310] sm:$0xff]  ;;  %v561_v16 = vld [vmem:[#allocation2 + $0x320] sm:$0xff] }
 0x283   : > { %2255 = vst [vmem:[#allocation2 + $0x1f8] sm:$0xff] %v2063_v48  ;;  %2257 = vst [vmem:[#allocation2 + $0x208] sm:$0xff] %v2065_v50  ;;  %v2069_v9 = vadd.f32 %v1704_v3, %v530_v43  ;;  %v2071_v10 = vadd.f32 %v1897_v4, %v532_v44  ;;  %v565_v48 = vld [vmem:[#allocation2 + $0x340] sm:$0xff]  ;;  %v567_v50 = vld [vmem:[#allocation2 + $0x350] sm:$0xff] }
 0x284   : > { %2260 = vst [vmem:[#allocation2 + $0x220] sm:$0xff] %v2068_v60  ;;  %2262 = vst [vmem:[#allocation2 + $0x230] sm:$0xff] %v2070_v62  ;;  %v566_v3 = vld [vmem:[#allocation2 + $0x348] sm:$0xff]  ;;  %v568_v4 = vld [vmem:[#allocation2 + $0x358] sm:$0xff] }
 0x285   : > { %2261 = vst [vmem:[#allocation2 + $0x228] sm:$0xff] %v2069_v9  ;;  %2263 = vst [vmem:[#allocation2 + $0x238] sm:$0xff] %v2071_v10 }
 0x287   : > { %v1708_v23 = vpop.f32.mrb[56].mxu1  ;;  %v1901_v24 = vpop.f32.mrb[56].mxu0 }
 0x288   : > { %v2074_v27 = vadd.f32 %v1708_v23, %v535_v17  ;;  %v2076_v28 = vadd.f32 %v1901_v24, %v537_v18  ;;  %v1710_v29 = vpop.f32.mrb[57].mxu1  ;;  %v1903_v30 = vpop.f32.mrb[57].mxu0 }
 0x289   : > { %v2075_v33 = vadd.f32 %v1710_v29, %v536_v21  ;;  %v2077_v34 = vadd.f32 %v1903_v30, %v538_v22  ;;  %v1712_v35 = vpop.f32.mrb[58].mxu1  ;;  %v1905_v37 = vpop.f32.mrb[58].mxu0  ;;  %v572_v29 = vld [vmem:[#allocation2 + $0x378] sm:$0xff]  ;;  %v574_v30 = vld [vmem:[#allocation2 + $0x388] sm:$0xff] }
 0x28a   : > { %2266 = vst [vmem:[#allocation2 + $0x250] sm:$0xff] %v2074_v27  ;;  %2268 = vst [vmem:[#allocation2 + $0x260] sm:$0xff] %v2076_v28  ;;  %v2080_v39 = vadd.f32 %v1712_v35, %v541_v25  ;;  %v2082_v40 = vadd.f32 %v1905_v37, %v543_v26  ;;  %v1714_v41 = vpop.f32.mrb[59].mxu1  ;;  %v1907_v42 = vpop.f32.mrb[59].mxu0  ;;  %v571_v27 = vld [vmem:[#allocation2 + $0x370] sm:$0xff]  ;;  %v573_v28 = vld [vmem:[#allocation2 + $0x380] sm:$0xff] }
 0x28b   : > { %2267 = vst [vmem:[#allocation2 + $0x258] sm:$0xff] %v2075_v33  ;;  %2269 = vst [vmem:[#allocation2 + $0x268] sm:$0xff] %v2077_v34  ;;  %v2081_v45 = vadd.f32 %v1714_v41, %v542_v31  ;;  %v2083_v46 = vadd.f32 %v1907_v42, %v544_v32  ;;  %v577_v33 = vld [vmem:[#allocation2 + $0x3a0] sm:$0xff]  ;;  %v579_v34 = vld [vmem:[#allocation2 + $0x3b0] sm:$0xff] }
 0x28c   : > { %2272 = vst [vmem:[#allocation2 + $0x280] sm:$0xff] %v2080_v39  ;;  %2274 = vst [vmem:[#allocation2 + $0x290] sm:$0xff] %v2082_v40  ;;  %v578_v41 = vld [vmem:[#allocation2 + $0x3a8] sm:$0xff]  ;;  %v580_v42 = vld [vmem:[#allocation2 + $0x3b8] sm:$0xff] }
 0x28d   : > { %2273 = vst [vmem:[#allocation2 + $0x288] sm:$0xff] %v2081_v45  ;;  %2275 = vst [vmem:[#allocation2 + $0x298] sm:$0xff] %v2083_v46 }
 0x28f   : > { %v1718_v53 = vpop.f32.mrb[60].mxu1  ;;  %v1911_v54 = vpop.f32.mrb[60].mxu0 }
 0x290   : > { %v2086_v59 = vadd.f32 %v1718_v53, %v547_v47  ;;  %v2088_v61 = vadd.f32 %v1911_v54, %v549_v49  ;;  %v1720_v63 = vpop.f32.mrb[61].mxu1  ;;  %v1913_v0 = vpop.f32.mrb[61].mxu0 }
 0x291   : > { %v2087_v5 = vadd.f32 %v1720_v63, %v548_v51  ;;  %v2089_v6 = vadd.f32 %v1913_v0, %v550_v52  ;;  %v1722_v7 = vpop.f32.mrb[62].mxu1  ;;  %v1915_v8 = vpop.f32.mrb[62].mxu0  ;;  %v584_v63 = vld [vmem:[#allocation2 + $0x3d8] sm:$0xff]  ;;  %v586_v0 = vld [vmem:[#allocation2 + $0x3e8] sm:$0xff] }
 0x292   : > { %2278 = vst [vmem:[#allocation2 + $0x2b0] sm:$0xff] %v2086_v59  ;;  %2280 = vst [vmem:[#allocation2 + $0x2c0] sm:$0xff] %v2088_v61  ;;  %v2092_v11 = vadd.f32 %v1722_v7, %v553_v57  ;;  %v2094_v12 = vadd.f32 %v1915_v8, %v555_v58  ;;  %v1724_v13 = vpop.f32.mrb[63].mxu1  ;;  %v1917_v15 = vpop.f32.mrb[63].mxu0  ;;  %v583_v59 = vld [vmem:[#allocation2 + $0x3d0] sm:$0xff]  ;;  %v585_v61 = vld [vmem:[#allocation2 + $0x3e0] sm:$0xff] }
 0x293   : > { %2279 = vst [vmem:[#allocation2 + $0x2b8] sm:$0xff] %v2087_v5  ;;  %2281 = vst [vmem:[#allocation2 + $0x2c8] sm:$0xff] %v2089_v6  ;;  %v2093_v19 = vadd.f32 %v1724_v13, %v554_v1  ;;  %v2095_v20 = vadd.f32 %v1917_v15, %v556_v2  ;;  %v589_v5 = vld [vmem:[#allocation2 + $0x400] sm:$0xff]  ;;  %v591_v6 = vld [vmem:[#allocation2 + $0x410] sm:$0xff] }
 0x294   : > { %2284 = vst [vmem:[#allocation2 + $0x2e0] sm:$0xff] %v2092_v11  ;;  %2286 = vst [vmem:[#allocation2 + $0x2f0] sm:$0xff] %v2094_v12  ;;  %v590_v13 = vld [vmem:[#allocation2 + $0x408] sm:$0xff]  ;;  %v592_v15 = vld [vmem:[#allocation2 + $0x418] sm:$0xff] }
 0x295   : > { %2285 = vst [vmem:[#allocation2 + $0x2e8] sm:$0xff] %v2093_v19  ;;  %2287 = vst [vmem:[#allocation2 + $0x2f8] sm:$0xff] %v2095_v20 }
 0x297   : > { %v1728_v43 = vpop.f32.mrb[64].mxu1  ;;  %v1921_v44 = vpop.f32.mrb[64].mxu0 }
 0x298   : > { %v2098_v55 = vadd.f32 %v1728_v43, %v559_v14  ;;  %v2100_v56 = vadd.f32 %v1921_v44, %v561_v16  ;;  %v1730_v60 = vpop.f32.mrb[65].mxu1  ;;  %v1923_v62 = vpop.f32.mrb[65].mxu0 }
 0x299   : > { %v2099_v9 = vadd.f32 %v1730_v60, %v560_v36  ;;  %v2101_v10 = vadd.f32 %v1923_v62, %v562_v38  ;;  %v1732_v17 = vpop.f32.mrb[66].mxu1  ;;  %v1925_v18 = vpop.f32.mrb[66].mxu0  ;;  %v596_v60 = vld [vmem:[#allocation2 + $0x438] sm:$0xff]  ;;  %v598_v62 = vld [vmem:[#allocation2 + $0x448] sm:$0xff] }
 0x29a   : > { %2290 = vst [vmem:[#allocation2 + $0x310] sm:$0xff] %v2098_v55  ;;  %2292 = vst [vmem:[#allocation2 + $0x320] sm:$0xff] %v2100_v56  ;;  %v2104_v21 = vadd.f32 %v1732_v17, %v565_v48  ;;  %v2106_v22 = vadd.f32 %v1925_v18, %v567_v50  ;;  %v1734_v23 = vpop.f32.mrb[67].mxu1  ;;  %v1927_v24 = vpop.f32.mrb[67].mxu0  ;;  %v595_v55 = vld [vmem:[#allocation2 + $0x430] sm:$0xff]  ;;  %v597_v56 = vld [vmem:[#allocation2 + $0x440] sm:$0xff] }
 0x29b   : > { %2291 = vst [vmem:[#allocation2 + $0x318] sm:$0xff] %v2099_v9  ;;  %2293 = vst [vmem:[#allocation2 + $0x328] sm:$0xff] %v2101_v10  ;;  %v2105_v25 = vadd.f32 %v1734_v23, %v566_v3  ;;  %v2107_v26 = vadd.f32 %v1927_v24, %v568_v4  ;;  %v601_v9 = vld [vmem:[#allocation2 + $0x460] sm:$0xff]  ;;  %v603_v10 = vld [vmem:[#allocation2 + $0x470] sm:$0xff] }
 0x29c   : > { %2296 = vst [vmem:[#allocation2 + $0x340] sm:$0xff] %v2104_v21  ;;  %2298 = vst [vmem:[#allocation2 + $0x350] sm:$0xff] %v2106_v22  ;;  %v602_v23 = vld [vmem:[#allocation2 + $0x468] sm:$0xff]  ;;  %v604_v24 = vld [vmem:[#allocation2 + $0x478] sm:$0xff] }
 0x29d   : > { %2297 = vst [vmem:[#allocation2 + $0x348] sm:$0xff] %v2105_v25  ;;  %2299 = vst [vmem:[#allocation2 + $0x358] sm:$0xff] %v2107_v26 }
 0x29f   : > { %v1738_v31 = vpop.f32.mrb[68].mxu1  ;;  %v1931_v32 = vpop.f32.mrb[68].mxu0 }
 0x2a0   : > { %v2110_v35 = vadd.f32 %v1738_v31, %v571_v27  ;;  %v2112_v37 = vadd.f32 %v1931_v32, %v573_v28  ;;  %v1740_v39 = vpop.f32.mrb[69].mxu1  ;;  %v1933_v40 = vpop.f32.mrb[69].mxu0 }
 0x2a1   : > { %v2111_v45 = vadd.f32 %v1740_v39, %v572_v29  ;;  %v2113_v46 = vadd.f32 %v1933_v40, %v574_v30  ;;  %v1742_v47 = vpop.f32.mrb[70].mxu1  ;;  %v1935_v49 = vpop.f32.mrb[70].mxu0  ;;  %v608_v39 = vld [vmem:[#allocation2 + $0x498] sm:$0xff]  ;;  %v610_v40 = vld [vmem:[#allocation2 + $0x4a8] sm:$0xff] }
 0x2a2   : > { %2302 = vst [vmem:[#allocation2 + $0x370] sm:$0xff] %v2110_v35  ;;  %2304 = vst [vmem:[#allocation2 + $0x380] sm:$0xff] %v2112_v37  ;;  %v2116_v51 = vadd.f32 %v1742_v47, %v577_v33  ;;  %v2118_v52 = vadd.f32 %v1935_v49, %v579_v34  ;;  %v1744_v53 = vpop.f32.mrb[71].mxu1  ;;  %v1937_v54 = vpop.f32.mrb[71].mxu0  ;;  %v607_v35 = vld [vmem:[#allocation2 + $0x490] sm:$0xff]  ;;  %v609_v37 = vld [vmem:[#allocation2 + $0x4a0] sm:$0xff] }
 0x2a3   : > { %2303 = vst [vmem:[#allocation2 + $0x378] sm:$0xff] %v2111_v45  ;;  %2305 = vst [vmem:[#allocation2 + $0x388] sm:$0xff] %v2113_v46  ;;  %v2117_v57 = vadd.f32 %v1744_v53, %v578_v41  ;;  %v2119_v58 = vadd.f32 %v1937_v54, %v580_v42  ;;  %v613_v45 = vld [vmem:[#allocation2 + $0x4c0] sm:$0xff]  ;;  %v615_v46 = vld [vmem:[#allocation2 + $0x4d0] sm:$0xff] }
 0x2a4   : > { %2308 = vst [vmem:[#allocation2 + $0x3a0] sm:$0xff] %v2116_v51  ;;  %2310 = vst [vmem:[#allocation2 + $0x3b0] sm:$0xff] %v2118_v52  ;;  %v614_v53 = vld [vmem:[#allocation2 + $0x4c8] sm:$0xff]  ;;  %v616_v54 = vld [vmem:[#allocation2 + $0x4d8] sm:$0xff] }
 0x2a5   : > { %2309 = vst [vmem:[#allocation2 + $0x3a8] sm:$0xff] %v2117_v57  ;;  %2311 = vst [vmem:[#allocation2 + $0x3b8] sm:$0xff] %v2119_v58 }
 0x2a7   : > { %v1748_v1 = vpop.f32.mrb[72].mxu1  ;;  %v1941_v2 = vpop.f32.mrb[72].mxu0 }
 0x2a8   : > { %v2122_v7 = vadd.f32 %v1748_v1, %v583_v59  ;;  %v2124_v8 = vadd.f32 %v1941_v2, %v585_v61  ;;  %v1750_v11 = vpop.f32.mrb[73].mxu1  ;;  %v1943_v12 = vpop.f32.mrb[73].mxu0 }
 0x2a9   : > { %v2123_v19 = vadd.f32 %v1750_v11, %v584_v63  ;;  %v2125_v20 = vadd.f32 %v1943_v12, %v586_v0  ;;  %v1752_v14 = vpop.f32.mrb[74].mxu1  ;;  %v1945_v16 = vpop.f32.mrb[74].mxu0  ;;  %v620_v11 = vld [vmem:[#allocation2 + $0x4f8] sm:$0xff]  ;;  %v622_v12 = vld [vmem:[#allocation2 + $0x508] sm:$0xff] }
 0x2aa   : > { %2314 = vst [vmem:[#allocation2 + $0x3d0] sm:$0xff] %v2122_v7  ;;  %2316 = vst [vmem:[#allocation2 + $0x3e0] sm:$0xff] %v2124_v8  ;;  %v2128_v36 = vadd.f32 %v1752_v14, %v589_v5  ;;  %v2130_v38 = vadd.f32 %v1945_v16, %v591_v6  ;;  %v1754_v43 = vpop.f32.mrb[75].mxu1  ;;  %v1947_v44 = vpop.f32.mrb[75].mxu0  ;;  %v619_v7 = vld [vmem:[#allocation2 + $0x4f0] sm:$0xff]  ;;  %v621_v8 = vld [vmem:[#allocation2 + $0x500] sm:$0xff] }
 0x2ab   : > { %2315 = vst [vmem:[#allocation2 + $0x3d8] sm:$0xff] %v2123_v19  ;;  %2317 = vst [vmem:[#allocation2 + $0x3e8] sm:$0xff] %v2125_v20  ;;  %v2129_v48 = vadd.f32 %v1754_v43, %v590_v13  ;;  %v2131_v50 = vadd.f32 %v1947_v44, %v592_v15  ;;  %v625_v19 = vld [vmem:[#allocation2 + $0x520] sm:$0xff]  ;;  %v627_v20 = vld [vmem:[#allocation2 + $0x530] sm:$0xff] }
 0x2ac   : > { %2320 = vst [vmem:[#allocation2 + $0x400] sm:$0xff] %v2128_v36  ;;  %2322 = vst [vmem:[#allocation2 + $0x410] sm:$0xff] %v2130_v38  ;;  %v626_v43 = vld [vmem:[#allocation2 + $0x528] sm:$0xff]  ;;  %v628_v44 = vld [vmem:[#allocation2 + $0x538] sm:$0xff] }
 0x2ad   : > { %2321 = vst [vmem:[#allocation2 + $0x408] sm:$0xff] %v2129_v48  ;;  %2323 = vst [vmem:[#allocation2 + $0x418] sm:$0xff] %v2131_v50 }
 0x2af   : > { %v1758_v3 = vpop.f32.mrb[76].mxu1  ;;  %v1951_v4 = vpop.f32.mrb[76].mxu0 }
 0x2b0   : > { %v2134_v17 = vadd.f32 %v1758_v3, %v595_v55  ;;  %v2136_v18 = vadd.f32 %v1951_v4, %v597_v56  ;;  %v1760_v21 = vpop.f32.mrb[77].mxu1  ;;  %v1953_v22 = vpop.f32.mrb[77].mxu0 }
 0x2b1   : > { %v2135_v25 = vadd.f32 %v1760_v21, %v596_v60  ;;  %v2137_v26 = vadd.f32 %v1953_v22, %v598_v62  ;;  %v1762_v27 = vpop.f32.mrb[78].mxu1  ;;  %v1955_v28 = vpop.f32.mrb[78].mxu0  ;;  %v632_v21 = vld [vmem:[#allocation2 + $0x558] sm:$0xff]  ;;  %v634_v22 = vld [vmem:[#allocation2 + $0x568] sm:$0xff] }
 0x2b2   : > { %2326 = vst [vmem:[#allocation2 + $0x430] sm:$0xff] %v2134_v17  ;;  %2328 = vst [vmem:[#allocation2 + $0x440] sm:$0xff] %v2136_v18  ;;  %v2140_v29 = vadd.f32 %v1762_v27, %v601_v9  ;;  %v2142_v30 = vadd.f32 %v1955_v28, %v603_v10  ;;  %v1764_v31 = vpop.f32.mrb[79].mxu1  ;;  %v1957_v32 = vpop.f32.mrb[79].mxu0  ;;  %v631_v17 = vld [vmem:[#allocation2 + $0x550] sm:$0xff]  ;;  %v633_v18 = vld [vmem:[#allocation2 + $0x560] sm:$0xff] }
 0x2b3   : > { %2327 = vst [vmem:[#allocation2 + $0x438] sm:$0xff] %v2135_v25  ;;  %2329 = vst [vmem:[#allocation2 + $0x448] sm:$0xff] %v2137_v26  ;;  %v2141_v33 = vadd.f32 %v1764_v31, %v602_v23  ;;  %v2143_v34 = vadd.f32 %v1957_v32, %v604_v24  ;;  %v637_v25 = vld [vmem:[#allocation2 + $0x580] sm:$0xff]  ;;  %v639_v26 = vld [vmem:[#allocation2 + $0x590] sm:$0xff] }
 0x2b4   : > { %2332 = vst [vmem:[#allocation2 + $0x460] sm:$0xff] %v2140_v29  ;;  %2334 = vst [vmem:[#allocation2 + $0x470] sm:$0xff] %v2142_v30  ;;  %v638_v31 = vld [vmem:[#allocation2 + $0x588] sm:$0xff]  ;;  %v640_v32 = vld [vmem:[#allocation2 + $0x598] sm:$0xff] }
 0x2b5   : > { %2333 = vst [vmem:[#allocation2 + $0x468] sm:$0xff] %v2141_v33  ;;  %2335 = vst [vmem:[#allocation2 + $0x478] sm:$0xff] %v2143_v34 }
 0x2b7   : > { %v1768_v41 = vpop.f32.mrb[80].mxu1  ;;  %v1961_v42 = vpop.f32.mrb[80].mxu0 }
 0x2b8   : > { %v2146_v47 = vadd.f32 %v1768_v41, %v607_v35  ;;  %v2148_v49 = vadd.f32 %v1961_v42, %v609_v37  ;;  %v1770_v51 = vpop.f32.mrb[81].mxu1  ;;  %v1963_v52 = vpop.f32.mrb[81].mxu0 }
 0x2b9   : > { %v2147_v57 = vadd.f32 %v1770_v51, %v608_v39  ;;  %v2149_v58 = vadd.f32 %v1963_v52, %v610_v40  ;;  %v1772_v59 = vpop.f32.mrb[82].mxu1  ;;  %v1965_v61 = vpop.f32.mrb[82].mxu0  ;;  %v644_v51 = vld [vmem:[#allocation2 + $0x5b8] sm:$0xff]  ;;  %v646_v52 = vld [vmem:[#allocation2 + $0x5c8] sm:$0xff] }
 0x2ba   : > { %2338 = vst [vmem:[#allocation2 + $0x490] sm:$0xff] %v2146_v47  ;;  %2340 = vst [vmem:[#allocation2 + $0x4a0] sm:$0xff] %v2148_v49  ;;  %v2152_v63 = vadd.f32 %v1772_v59, %v613_v45  ;;  %v2154_v0 = vadd.f32 %v1965_v61, %v615_v46  ;;  %v1774_v1 = vpop.f32.mrb[83].mxu1  ;;  %v1967_v2 = vpop.f32.mrb[83].mxu0  ;;  %v643_v47 = vld [vmem:[#allocation2 + $0x5b0] sm:$0xff]  ;;  %v645_v49 = vld [vmem:[#allocation2 + $0x5c0] sm:$0xff] }
 0x2bb   : > { %2339 = vst [vmem:[#allocation2 + $0x498] sm:$0xff] %v2147_v57  ;;  %2341 = vst [vmem:[#allocation2 + $0x4a8] sm:$0xff] %v2149_v58  ;;  %v2153_v5 = vadd.f32 %v1774_v1, %v614_v53  ;;  %v2155_v6 = vadd.f32 %v1967_v2, %v616_v54  ;;  %v649_v57 = vld [vmem:[#allocation2 + $0x5e0] sm:$0xff]  ;;  %v651_v58 = vld [vmem:[#allocation2 + $0x5f0] sm:$0xff] }
 0x2bc   : > { %2344 = vst [vmem:[#allocation2 + $0x4c0] sm:$0xff] %v2152_v63  ;;  %2346 = vst [vmem:[#allocation2 + $0x4d0] sm:$0xff] %v2154_v0  ;;  %v650_v1 = vld [vmem:[#allocation2 + $0x5e8] sm:$0xff]  ;;  %v652_v2 = vld [vmem:[#allocation2 + $0x5f8] sm:$0xff] }
 0x2bd   : > { %2345 = vst [vmem:[#allocation2 + $0x4c8] sm:$0xff] %v2153_v5  ;;  %2347 = vst [vmem:[#allocation2 + $0x4d8] sm:$0xff] %v2155_v6 }
 0x2bf   : > { %v1778_v13 = vpop.f32.mrb[84].mxu1  ;;  %v1971_v15 = vpop.f32.mrb[84].mxu0 }
 0x2c0   : > { %v2158_v14 = vadd.f32 %v1778_v13, %v619_v7  ;;  %v2160_v16 = vadd.f32 %v1971_v15, %v621_v8  ;;  %v1780_v36 = vpop.f32.mrb[85].mxu1  ;;  %v1973_v38 = vpop.f32.mrb[85].mxu0 }
 0x2c1   : > { %v2159_v48 = vadd.f32 %v1780_v36, %v620_v11  ;;  %v2161_v50 = vadd.f32 %v1973_v38, %v622_v12  ;;  %v1782_v55 = vpop.f32.mrb[86].mxu1  ;;  %v1975_v56 = vpop.f32.mrb[86].mxu0 }
 0x2c2   : > { %2350 = vst [vmem:[#allocation2 + $0x4f0] sm:$0xff] %v2158_v14  ;;  %2352 = vst [vmem:[#allocation2 + $0x500] sm:$0xff] %v2160_v16  ;;  %v2164_v60 = vadd.f32 %v1782_v55, %v625_v19  ;;  %v2166_v62 = vadd.f32 %v1975_v56, %v627_v20  ;;  %v1784_v3 = vpop.f32.mrb[87].mxu1  ;;  %v1977_v4 = vpop.f32.mrb[87].mxu0 }
 0x2c3   : > { %2351 = vst [vmem:[#allocation2 + $0x4f8] sm:$0xff] %v2159_v48  ;;  %2353 = vst [vmem:[#allocation2 + $0x508] sm:$0xff] %v2161_v50  ;;  %v2165_v9 = vadd.f32 %v1784_v3, %v626_v43  ;;  %v2167_v10 = vadd.f32 %v1977_v4, %v628_v44 }
 0x2c4   : > { %2356 = vst [vmem:[#allocation2 + $0x520] sm:$0xff] %v2164_v60  ;;  %2358 = vst [vmem:[#allocation2 + $0x530] sm:$0xff] %v2166_v62 }
 0x2c5   : > { %2357 = vst [vmem:[#allocation2 + $0x528] sm:$0xff] %v2165_v9  ;;  %2359 = vst [vmem:[#allocation2 + $0x538] sm:$0xff] %v2167_v10 }
 0x2c7   : > { %v1788_v23 = vpop.f32.mrb[88].mxu1  ;;  %v1981_v24 = vpop.f32.mrb[88].mxu0 }
 0x2c8   : > { %v2170_v27 = vadd.f32 %v1788_v23, %v631_v17  ;;  %v2172_v28 = vadd.f32 %v1981_v24, %v633_v18  ;;  %v1790_v29 = vpop.f32.mrb[89].mxu1  ;;  %v1983_v30 = vpop.f32.mrb[89].mxu0 }
 0x2c9   : > { %v2171_v33 = vadd.f32 %v1790_v29, %v632_v21  ;;  %v2173_v34 = vadd.f32 %v1983_v30, %v634_v22  ;;  %v1792_v35 = vpop.f32.mrb[90].mxu1  ;;  %v1985_v37 = vpop.f32.mrb[90].mxu0 }
 0x2ca   : > { %2362 = vst [vmem:[#allocation2 + $0x550] sm:$0xff] %v2170_v27  ;;  %2364 = vst [vmem:[#allocation2 + $0x560] sm:$0xff] %v2172_v28  ;;  %v2176_v39 = vadd.f32 %v1792_v35, %v637_v25  ;;  %v2178_v40 = vadd.f32 %v1985_v37, %v639_v26  ;;  %v1794_v41 = vpop.f32.mrb[91].mxu1  ;;  %v1987_v42 = vpop.f32.mrb[91].mxu0 }
 0x2cb   : > { %2363 = vst [vmem:[#allocation2 + $0x558] sm:$0xff] %v2171_v33  ;;  %2365 = vst [vmem:[#allocation2 + $0x568] sm:$0xff] %v2173_v34  ;;  %v2177_v45 = vadd.f32 %v1794_v41, %v638_v31  ;;  %v2179_v46 = vadd.f32 %v1987_v42, %v640_v32 }
 0x2cc   : > { %2368 = vst [vmem:[#allocation2 + $0x580] sm:$0xff] %v2176_v39  ;;  %2370 = vst [vmem:[#allocation2 + $0x590] sm:$0xff] %v2178_v40 }
 0x2cd   : > { %2369 = vst [vmem:[#allocation2 + $0x588] sm:$0xff] %v2177_v45  ;;  %2371 = vst [vmem:[#allocation2 + $0x598] sm:$0xff] %v2179_v46 }
 0x2cf   : > { %v1798_v53 = vpop.f32.mrb[92].mxu1  ;;  %v1991_v54 = vpop.f32.mrb[92].mxu0  ;;  %2387 = sbr.rel (%p7284_p5) target bundleno = 1580 (0x62c), region = 52 }
 0x2d0   : > { %v2182_v59 = vadd.f32 %v1798_v53, %v643_v47  ;;  %v2184_v61 = vadd.f32 %v1991_v54, %v645_v49  ;;  %v1800_v63 = vpop.f32.mrb[93].mxu1  ;;  %v1993_v0 = vpop.f32.mrb[93].mxu0 }
 0x2d1   : > { %v2183_v5 = vadd.f32 %v1800_v63, %v644_v51  ;;  %v2185_v6 = vadd.f32 %v1993_v0, %v646_v52  ;;  %v1802_v7 = vpop.f32.mrb[94].mxu1  ;;  %v1995_v8 = vpop.f32.mrb[94].mxu0 }
 0x2d2   : > { %2374 = vst [vmem:[#allocation2 + $0x5b0] sm:$0xff] %v2182_v59  ;;  %2376 = vst [vmem:[#allocation2 + $0x5c0] sm:$0xff] %v2184_v61  ;;  %v2188_v11 = vadd.f32 %v1802_v7, %v649_v57  ;;  %v2190_v12 = vadd.f32 %v1995_v8, %v651_v58  ;;  %v1804_v13 = vpop.f32.mrb[95].mxu1  ;;  %v1997_v15 = vpop.f32.mrb[95].mxu0 }
 0x2d3   : > { %2375 = vst [vmem:[#allocation2 + $0x5b8] sm:$0xff] %v2183_v5  ;;  %2377 = vst [vmem:[#allocation2 + $0x5c8] sm:$0xff] %v2185_v6  ;;  %v2189_v19 = vadd.f32 %v1804_v13, %v650_v1  ;;  %v2191_v20 = vadd.f32 %v1997_v15, %v652_v2 }
 0x2d4   : > { %2380 = vst [vmem:[#allocation2 + $0x5e0] sm:$0xff] %v2188_v11  ;;  %2382 = vst [vmem:[#allocation2 + $0x5f0] sm:$0xff] %v2190_v12 }
 0x2d5   : > { %2381 = vst [vmem:[#allocation2 + $0x5e8] sm:$0xff] %v2189_v19  ;;  %2383 = vst [vmem:[#allocation2 + $0x5f8] sm:$0xff] %v2191_v20 }
 0x2d6   : > { %v8566_v14 = vld [vmem:[#allocation8 + $0x4] ss:$24 sps:$4 sm:$0xff]   ;;  %v8570_v36 = vld [vmem:[#allocation8] ss:$24 sps:$4 sm:$0xff]   ;;  %v8572_v43 = vld [vmem:[#allocation8 + $0x34] ss:$24 sps:$4 sm:$0xff]  }
 0x2d7   : > { %v10041_v16 = vld [vmem:[#allocation8 + $0x304] ss:$24 sps:$4 sm:$0xff]   ;;  %4404 = vmatprep.subr.bf16.mxu1 %v8566_v14  ;;  %v10043_v38 = vld [vmem:[#allocation8 + $0x300] ss:$24 sps:$4 sm:$0xff]   ;;  %v10047_v44 = vld [vmem:[#allocation8 + $0x334] ss:$24 sps:$4 sm:$0xff]  }
 0x2d8   : > { %4597 = vmatprep.subr.bf16.mxu0 %v10041_v16  ;;  %4405 = vmatpush1.bf16.msra.mxu1 %v8570_v36  ;;  %v8576_v48 = vld [vmem:[#allocation8 + $0x30] ss:$24 sps:$4 sm:$0xff]   ;;  %v8578_v55 = vld [vmem:[#allocation8 + $0x64] ss:$24 sps:$4 sm:$0xff]   ;;  %v8582_v60 = vld [vmem:[#allocation8 + $0x60] ss:$24 sps:$4 sm:$0xff]  }
 0x2d9   : > { %4598 = vmatpush1.bf16.msra.mxu0 %v10043_v38  ;;  %4406 = vmatprep.subr.bf16.mxu1 %v8572_v43  ;;  %v10049_v50 = vld [vmem:[#allocation8 + $0x330] ss:$24 sps:$4 sm:$0xff]   ;;  %v10052_v56 = vld [vmem:[#allocation8 + $0x364] ss:$24 sps:$4 sm:$0xff]   ;;  %v10054_v62 = vld [vmem:[#allocation8 + $0x360] ss:$24 sps:$4 sm:$0xff]  }
 0x2da   : > { %4599 = vmatprep.subr.bf16.mxu0 %v10047_v44  ;;  %v8584_v3 = vld [vmem:[#allocation8 + $0x94] ss:$24 sps:$4 sm:$0xff]   ;;  %v8588_v9 = vld [vmem:[#allocation8 + $0x90] ss:$24 sps:$4 sm:$0xff]   ;;  %v8590_v17 = vld [vmem:[#allocation8 + $0xc4] ss:$24 sps:$4 sm:$0xff]  }
 0x2db   : > { %v10058_v4 = vld [vmem:[#allocation8 + $0x394] ss:$24 sps:$4 sm:$0xff]   ;;  %v10061_v10 = vld [vmem:[#allocation8 + $0x390] ss:$24 sps:$4 sm:$0xff]   ;;  %v10064_v18 = vld [vmem:[#allocation8 + $0x3c4] ss:$24 sps:$4 sm:$0xff]  }
 0x2dc   : > { %4407 = vmatpush1.bf16.msra.mxu1 %v8576_v48  ;;  %v8594_v21 = vld [vmem:[#allocation8 + $0xc0] ss:$24 sps:$4 sm:$0xff]   ;;  %v8596_v23 = vld [vmem:[#allocation8 + $0xf4] ss:$24 sps:$4 sm:$0xff]   ;;  %v8600_v25 = vld [vmem:[#allocation8 + $0xf0] ss:$24 sps:$4 sm:$0xff]  }
 0x2dd   : > { %4600 = vmatpush1.bf16.msra.mxu0 %v10049_v50  ;;  %4408 = vmatprep.subr.bf16.mxu1 %v8578_v55  ;;  %v10066_v22 = vld [vmem:[#allocation8 + $0x3c0] ss:$24 sps:$4 sm:$0xff]   ;;  %v10070_v24 = vld [vmem:[#allocation8 + $0x3f4] ss:$24 sps:$4 sm:$0xff]   ;;  %v10073_v26 = vld [vmem:[#allocation8 + $0x3f0] ss:$24 sps:$4 sm:$0xff]  }
 0x2de   : > { %4601 = vmatprep.subr.bf16.mxu0 %v10052_v56  ;;  %v8602_v27 = vld [vmem:[#allocation8 + $0x124] ss:$24 sps:$4 sm:$0xff]   ;;  %v8606_v29 = vld [vmem:[#allocation8 + $0x120] ss:$24 sps:$4 sm:$0xff]   ;;  %v8608_v31 = vld [vmem:[#allocation8 + $0x154] ss:$24 sps:$4 sm:$0xff]  }
 0x2df   : > { %v10076_v28 = vld [vmem:[#allocation8 + $0x424] ss:$24 sps:$4 sm:$0xff]   ;;  %v10078_v30 = vld [vmem:[#allocation8 + $0x420] ss:$24 sps:$4 sm:$0xff]   ;;  %v10082_v32 = vld [vmem:[#allocation8 + $0x454] ss:$24 sps:$4 sm:$0xff]  }
 0x2e0   : > { %4409 = vmatpush1.bf16.msra.mxu1 %v8582_v60  ;;  %v8612_v33 = vld [vmem:[#allocation8 + $0x150] ss:$24 sps:$4 sm:$0xff]   ;;  %v8614_v35 = vld [vmem:[#allocation8 + $0x184] ss:$24 sps:$4 sm:$0xff]   ;;  %v8618_v39 = vld [vmem:[#allocation8 + $0x180] ss:$24 sps:$4 sm:$0xff]  }
 0x2e1   : > { %4602 = vmatpush1.bf16.msra.mxu0 %v10054_v62  ;;  %4410 = vmatprep.subr.bf16.mxu1 %v8584_v3  ;;  %v10085_v34 = vld [vmem:[#allocation8 + $0x450] ss:$24 sps:$4 sm:$0xff]   ;;  %v10088_v37 = vld [vmem:[#allocation8 + $0x484] ss:$24 sps:$4 sm:$0xff]   ;;  %v10090_v40 = vld [vmem:[#allocation8 + $0x480] ss:$24 sps:$4 sm:$0xff]  }
 0x2e2   : > { %4603 = vmatprep.subr.bf16.mxu0 %v10058_v4  ;;  %v8620_v41 = vld [vmem:[#allocation8 + $0x1b4] ss:$24 sps:$4 sm:$0xff]   ;;  %v8624_v45 = vld [vmem:[#allocation8 + $0x1b0] ss:$24 sps:$4 sm:$0xff]   ;;  %v8626_v47 = vld [vmem:[#allocation8 + $0x1e4] ss:$24 sps:$4 sm:$0xff]  }
 0x2e3   : > { %v10094_v42 = vld [vmem:[#allocation8 + $0x4b4] ss:$24 sps:$4 sm:$0xff]   ;;  %v10097_v46 = vld [vmem:[#allocation8 + $0x4b0] ss:$24 sps:$4 sm:$0xff]   ;;  %v10100_v49 = vld [vmem:[#allocation8 + $0x4e4] ss:$24 sps:$4 sm:$0xff]  }
 0x2e4   : > { %4411 = vmatpush1.bf16.msra.mxu1 %v8588_v9  ;;  %v8630_v51 = vld [vmem:[#allocation8 + $0x1e0] ss:$24 sps:$4 sm:$0xff]   ;;  %v8632_v53 = vld [vmem:[#allocation8 + $0x214] ss:$24 sps:$4 sm:$0xff]   ;;  %v8636_v63 = vld [vmem:[#allocation8 + $0x210] ss:$24 sps:$4 sm:$0xff]  }
 0x2e5   : > { %4604 = vmatpush1.bf16.msra.mxu0 %v10061_v10  ;;  %4412 = vmatprep.subr.bf16.mxu1 %v8590_v17  ;;  %v10102_v52 = vld [vmem:[#allocation8 + $0x4e0] ss:$24 sps:$4 sm:$0xff]   ;;  %v10106_v54 = vld [vmem:[#allocation8 + $0x514] ss:$24 sps:$4 sm:$0xff]   ;;  %v10109_v0 = vld [vmem:[#allocation8 + $0x510] ss:$24 sps:$4 sm:$0xff]  }
 0x2e6   : > { %4605 = vmatprep.subr.bf16.mxu0 %v10064_v18  ;;  %v2389_v57 = vld [vmem:[#allocation2 + $0x8] sm:$0xff]  ;;  %v2395_v58 = vld [vmem:[#allocation2 + $0x38] sm:$0xff]  ;;  %v2388_v3 = vld [vmem:[#allocation2] sm:$0xff] }
 0x2e7   : > { %v2391_v59 = vld [vmem:[#allocation2 + $0x18] sm:$0xff]  ;;  %v2397_v61 = vld [vmem:[#allocation2 + $0x48] sm:$0xff]  ;;  %v10111_v2 = vpack.c.bf16 %v2395_v58, %v2389_v57  ;;  %v2394_v9 = vld [vmem:[#allocation2 + $0x30] sm:$0xff] }
 0x2e8   : > { %4413 = vmatpush1.bf16.msra.mxu1 %v8594_v21  ;;  %v8638_v1 = vld [vmem:[#allocation8 + $0x244] ss:$24 sps:$4 sm:$0xff]   ;;  %v10113_v5 = vpack.c.bf16 %v2397_v61, %v2391_v59  ;;  %v8642_v7 = vld [vmem:[#allocation8 + $0x240] ss:$24 sps:$4 sm:$0xff]   ;;  %v8644_v11 = vld [vmem:[#allocation8 + $0x274] ss:$24 sps:$4 sm:$0xff]  }
 0x2e9   : > { %4606 = vmatpush1.bf16.msra.mxu0 %v10066_v22  ;;  %4414 = vmatprep.subr.bf16.mxu1 %v8596_v23  ;;  %v10116_v6 = vld [vmem:[#allocation8 + $0x544] ss:$24 sps:$4 sm:$0xff]   ;;  %v10121_v8 = vld [vmem:[#allocation8 + $0x540] ss:$24 sps:$4 sm:$0xff]   ;;  %v10124_v12 = vld [vmem:[#allocation8 + $0x574] ss:$24 sps:$4 sm:$0xff]  }
 0x2ea   : > { %4607 = vmatprep.subr.bf16.mxu0 %v10070_v24  ;;  %4436 = vmatprep.mubr.bf16.mxu1 %v10111_v2  ;;  %v8648_v13 = vld [vmem:[#allocation8 + $0x270] ss:$24 sps:$4 sm:$0xff]   ;;  %v8650_v19 = vld [vmem:[#allocation8 + $0x2a4] ss:$24 sps:$4 sm:$0xff]   ;;  %v8654_v14 = vld [vmem:[#allocation8 + $0x2a0] ss:$24 sps:$4 sm:$0xff]  }
 0x2eb   : > { %4629 = vmatprep.mubr.bf16.mxu0 %v10113_v5  ;;  %v10127_v15 = vld [vmem:[#allocation8 + $0x570] ss:$24 sps:$4 sm:$0xff]   ;;  %v10130_v20 = vld [vmem:[#allocation8 + $0x5a4] ss:$24 sps:$4 sm:$0xff]   ;;  %v10132_v36 = vld [vmem:[#allocation8 + $0x5a0] ss:$24 sps:$4 sm:$0xff]  }
 0x2ec   : > { %4415 = vmatpush1.bf16.msra.mxu1 %v8600_v25  ;;  %v8656_v43 = vld [vmem:[#allocation8 + $0x2d4] ss:$24 sps:$4 sm:$0xff]   ;;  %v8660_v55 = vld [vmem:[#allocation8 + $0x2d0] ss:$24 sps:$4 sm:$0xff]   ;;  %v2396_v21 = vld [vmem:[#allocation2 + $0x40] sm:$0xff] }
 0x2ed   : > { %4608 = vmatpush1.bf16.msra.mxu0 %v10073_v26  ;;  %4416 = vmatprep.subr.bf16.mxu1 %v8602_v27  ;;  %v10136_v48 = vld [vmem:[#allocation8 + $0x5d4] ss:$24 sps:$4 sm:$0xff]   ;;  %v10138_v60 = vld [vmem:[#allocation8 + $0x5d0] ss:$24 sps:$4 sm:$0xff]   ;;  %v8664_v23 = vld [vmem:[#allocation8 + $0x604] ss:$24 sps:$4 sm:$0xff]  }
 0x2ee   : > { %4609 = vmatprep.subr.bf16.mxu0 %v10076_v28  ;;  %v2390_v17 = vld [vmem:[#allocation2 + $0x10] sm:$0xff]  ;;  %v2401_v25 = vld [vmem:[#allocation2 + $0x68] sm:$0xff]  ;;  %v2407_v27 = vld [vmem:[#allocation2 + $0x98] sm:$0xff] }
 0x2ef   : > { %v2406_v57 = vld [vmem:[#allocation2 + $0x90] sm:$0xff]  ;;  %v2408_v59 = vld [vmem:[#allocation2 + $0xa0] sm:$0xff]  ;;  %v2413_v61 = vld [vmem:[#allocation2 + $0xc8] sm:$0xff] }
 0x2f0   : > { %4417 = vmatpush1.bf16.msra.mxu1 %v8606_v29  ;;  %v10142_v29 = vpack.c.bf16 %v2394_v9, %v2388_v3  ;;  %v2402_v58 = vld [vmem:[#allocation2 + $0x70] sm:$0xff] }
 0x2f1   : > { %4610 = vmatpush1.bf16.msra.mxu0 %v10078_v30  ;;  %4418 = vmatprep.subr.bf16.mxu1 %v8608_v31  ;;  %v10144_v31 = vpack.c.bf16 %v2396_v21, %v2390_v17  ;;  %v2418_v3 = vld [vmem:[#allocation2 + $0xf0] sm:$0xff]  ;;  %v8676_v17 = vld [vmem:[#allocation8 + $0x6c4] ss:$24 sps:$4 sm:$0xff]   ;;  %v2425_v21 = vld [vmem:[#allocation2 + $0x128] sm:$0xff] }
 0x2f2   : > { %4611 = vmatprep.subr.bf16.mxu0 %v10082_v32  ;;  %v2414_v9 = vld [vmem:[#allocation2 + $0xd0] sm:$0xff] }
 0x2f4   : > { %4419 = vmatpush1.bf16.msra.mxu1 %v8612_v33  ;;  %v2403_v33 = vld [vmem:[#allocation2 + $0x78] sm:$0xff] }
 0x2f5   : > { %4612 = vmatpush1.bf16.msra.mxu0 %v10085_v34  ;;  %4420 = vmatprep.subr.bf16.mxu1 %v8614_v35  ;;  %v2409_v35 = vld [vmem:[#allocation2 + $0xa8] sm:$0xff] }
 0x2f6   : > { %4613 = vmatprep.subr.bf16.mxu0 %v10088_v37 }
 0x2f8   : > { %4421 = vmatpush1.bf16.msra.mxu1 %v8618_v39  ;;  %v8662_v39 = vld [vmem:[#allocation8 + $0x600] ss:$24 sps:$4 sm:$0xff]  }
 0x2f9   : > { %4614 = vmatpush1.bf16.msra.mxu0 %v10090_v40  ;;  %4422 = vmatprep.subr.bf16.mxu1 %v8620_v41  ;;  %v8667_v41 = vld [vmem:[#allocation8 + $0x634] ss:$24 sps:$4 sm:$0xff]  }
 0x2fa   : > { %4615 = vmatprep.subr.bf16.mxu0 %v10094_v42 }
 0x2fc   : > { %4423 = vmatpush1.bf16.msra.mxu1 %v8624_v45  ;;  %v10148_v45 = vpack.c.bf16 %v2407_v27, %v2401_v25  ;;  %v2433_v25 = vld [vmem:[#allocation2 + $0x168] sm:$0xff] }
 0x2fd   : > { %4616 = vmatpush1.bf16.msra.mxu0 %v10097_v46  ;;  %4424 = vmatprep.subr.bf16.mxu1 %v8626_v47  ;;  %v8665_v47 = vld [vmem:[#allocation8 + $0x630] ss:$24 sps:$4 sm:$0xff]  }
 0x2fe   : > { %4617 = vmatprep.subr.bf16.mxu0 %v10100_v49 }
 0x300   : > { %4425 = vmatpush1.bf16.msra.mxu1 %v8630_v51  ;;  %v10150_v51 = vpack.c.bf16 %v2409_v35, %v2403_v33  ;;  %v8674_v35 = vld [vmem:[#allocation8 + $0x6c0] ss:$24 sps:$4 sm:$0xff]  }
 0x301   : > { %4618 = vmatpush1.bf16.msra.mxu0 %v10102_v52  ;;  %4426 = vmatprep.subr.bf16.mxu1 %v8632_v53  ;;  %v2400_v53 = vld [vmem:[#allocation2 + $0x60] sm:$0xff] }
 0x302   : > { %4619 = vmatprep.subr.bf16.mxu0 %v10106_v54 }
 0x304   : > { %4427 = vmatpush1.bf16.msra.mxu1 %v8636_v63  ;;  %v2419_v63 = vld [vmem:[#allocation2 + $0xf8] sm:$0xff] }
 0x305   : > { %4620 = vmatpush1.bf16.msra.mxu0 %v10109_v0  ;;  %4428 = vmatprep.subr.bf16.mxu1 %v8638_v1  ;;  %v2415_v1 = vld [vmem:[#allocation2 + $0xd8] sm:$0xff] }
 0x306   : > { %4621 = vmatprep.subr.bf16.mxu0 %v10116_v6 }
 0x308   : > { %4429 = vmatpush1.bf16.msra.mxu1 %v8642_v7  ;;  %v2421_v7 = vld [vmem:[#allocation2 + $0x108] sm:$0xff] }
 0x309   : > { %4622 = vmatpush1.bf16.msra.mxu0 %v10121_v8  ;;  %4430 = vmatprep.subr.bf16.mxu1 %v8644_v11  ;;  %v10158_v11 = vpack.c.bf16 %v2406_v57, %v2400_v53  ;;  %v8677_v53 = vld [vmem:[#allocation8 + $0x6f0] ss:$24 sps:$4 sm:$0xff]   ;;  %v2424_v57 = vld [vmem:[#allocation2 + $0x120] sm:$0xff] }
 0x30a   : > { %4623 = vmatprep.subr.bf16.mxu0 %v10124_v12 }
 0x30c   : > { %4431 = vmatpush1.bf16.msra.mxu1 %v8648_v13  ;;  %v10160_v13 = vpack.c.bf16 %v2408_v59, %v2402_v58  ;;  %v2426_v58 = vld [vmem:[#allocation2 + $0x130] sm:$0xff]  ;;  %v8682_v59 = vld [vmem:[#allocation8 + $0x724] ss:$24 sps:$4 sm:$0xff]  }
 0x30d   : > { %4624 = vmatpush1.bf16.msra.mxu0 %v10127_v15  ;;  %4432 = vmatprep.subr.bf16.mxu1 %v8650_v19  ;;  %v10163_v19 = vpack.c.bf16 %v2419_v63, %v2413_v61  ;;  %v2443_v61 = vld [vmem:[#allocation2 + $0x1b8] sm:$0xff] }
 0x30e   : > { %4625 = vmatprep.subr.bf16.mxu0 %v10130_v20  ;;  %v2439_v63 = vld [vmem:[#allocation2 + $0x198] sm:$0xff] }
 0x310   : > { %4433 = vmatpush1.bf16.msra.mxu1 %v8654_v14  ;;  %v8673_v14 = vld [vmem:[#allocation8 + $0x694] ss:$24 sps:$4 sm:$0xff]  }
 0x311   : > { %4626 = vmatpush1.bf16.msra.mxu0 %v10132_v36  ;;  %4434 = vmatprep.subr.bf16.mxu1 %v8656_v43  ;;  %v10165_v43 = vpack.c.bf16 %v2421_v7, %v2415_v1  ;;  %v2445_v1 = vld [vmem:[#allocation2 + $0x1c8] sm:$0xff] }
 0x312   : > { %4627 = vmatprep.subr.bf16.mxu0 %v10136_v48 }
 0x314   : > { %4435 = vmatpush1.bf16.msra.mxu1 %v8660_v55  ;;  %v8671_v55 = vld [vmem:[#allocation8 + $0x690] ss:$24 sps:$4 sm:$0xff]  }
 0x315   : > { %4628 = vmatpush1.bf16.msra.mxu0 %v10138_v60  ;;  %7803 = vmatprep.subr.bf16.mxu1 %v10041_v16  ;;  %v8670_v16 = vld [vmem:[#allocation8 + $0x664] ss:$24 sps:$4 sm:$0xff]  }
 0x316   : > { %4790 = vmatprep.subr.bf16.mxu0 %v8664_v23  ;;  %v2431_v23 = vld [vmem:[#allocation2 + $0x158] sm:$0xff] }
 0x317   : > { %4437 = vmatmul.mubr.bf16.vlgmr.msra.gmra.mrb[0].mxu1 %v10142_v29 }
 0x318   : > { %4630 = vmatmul.mubr.bf16.vlgmr.msra.gmra.mrb[0].mxu0 %v10144_v31  ;;  %7819 = vmatpush1.bf16.msra.mxu1 %v10043_v38  ;;  %v8668_v38 = vld [vmem:[#allocation8 + $0x660] ss:$24 sps:$4 sm:$0xff]  }
 0x319   : > { %4791 = vmatpush1.bf16.msra.mxu0 %v8662_v39  ;;  %4446 = vmatprep.mubr.bf16.mxu1 %v10148_v45  ;;  %v10178_v39 = vpack.c.bf16 %v2431_v23, %v2425_v21  ;;  %v2455_v21 = vld [vmem:[#allocation2 + $0x218] sm:$0xff] }
 0x31a   : > { %4792 = vmatprep.subr.bf16.mxu0 %v8667_v41  ;;  %4639 = vmatprep.mubr.bf16.mxu0 %v10150_v51  ;;  %v8679_v41 = vld [vmem:[#allocation8 + $0x6f4] ss:$24 sps:$4 sm:$0xff]   ;;  %v2451_v23 = vld [vmem:[#allocation2 + $0x1f8] sm:$0xff] }
 0x31b   : > { %7804 = vmatprep.subr.bf16.mxu1 %v10047_v44  ;;  %v2412_v44 = vld [vmem:[#allocation2 + $0xc0] sm:$0xff] }
 0x31c   : > { %7820 = vmatpush1.bf16.msra.mxu1 %v10049_v50  ;;  %v2420_v50 = vld [vmem:[#allocation2 + $0x100] sm:$0xff]  ;;  %v10173_v27 = vpack.c.bf16 %v2418_v3, %v2412_v44  ;;  %v10196_v44 = vpack.c.bf16 %v2445_v1, %v2439_v63  ;;  %v8683_v3 = vld [vmem:[#allocation8 + $0x750] ss:$24 sps:$4 sm:$0xff]   ;;  %v2467_v63 = vld [vmem:[#allocation2 + $0x278] sm:$0xff] }
 0x31d   : > { %4793 = vmatpush1.bf16.msra.mxu0 %v8665_v47  ;;  %7805 = vmatprep.subr.bf16.mxu1 %v10052_v56  ;;  %v2427_v56 = vld [vmem:[#allocation2 + $0x138] sm:$0xff]  ;;  %v10175_v33 = vpack.c.bf16 %v2420_v50, %v2414_v9  ;;  %v2442_v9 = vld [vmem:[#allocation2 + $0x1b0] sm:$0xff] }
 0x31e   : > { %4794 = vmatprep.subr.bf16.mxu0 %v8670_v16  ;;  %v10180_v47 = vpack.c.bf16 %v2433_v25, %v2427_v56  ;;  %v2437_v16 = vld [vmem:[#allocation2 + $0x188] sm:$0xff]  ;;  %v2438_v50 = vld [vmem:[#allocation2 + $0x190] sm:$0xff]  ;;  %v2463_v1 = vld [vmem:[#allocation2 + $0x258] sm:$0xff] }
 0x31f   : > { %4447 = vmatmul.mubr.bf16.gmra.mrb[4].mxu1 %v10158_v11  ;;  %v2457_v56 = vld [vmem:[#allocation2 + $0x228] sm:$0xff] }
 0x320   : > { %4640 = vmatmul.mubr.bf16.gmra.mrb[4].mxu0 %v10160_v13  ;;  %4456 = vmatprep.mubr.bf16.mxu1 %v10163_v19 }
 0x321   : > { %4795 = vmatpush1.bf16.msra.mxu0 %v8668_v38  ;;  %4649 = vmatprep.mubr.bf16.mxu0 %v10165_v43  ;;  %v8680_v38 = vld [vmem:[#allocation8 + $0x720] ss:$24 sps:$4 sm:$0xff]  }
 0x322   : > { %4796 = vmatprep.subr.bf16.mxu0 %v8673_v14  ;;  %7821 = vmatpush1.bf16.msra.mxu1 %v10054_v62  ;;  %v2430_v62 = vld [vmem:[#allocation2 + $0x150] sm:$0xff]  ;;  %v10193_v14 = vpack.c.bf16 %v2443_v61, %v2437_v16  ;;  %v8694_v16 = vld [vmem:[#allocation8 + $0x7e4] ss:$24 sps:$4 sm:$0xff]   ;;  %v2461_v61 = vld [vmem:[#allocation2 + $0x248] sm:$0xff] }
 0x323   : > { %7806 = vmatprep.subr.bf16.mxu1 %v10058_v4  ;;  %v2432_v4 = vld [vmem:[#allocation2 + $0x160] sm:$0xff] }
 0x324   : > { %v10190_v7 = vpack.c.bf16 %v2432_v4, %v2426_v58  ;;  %v8689_v58 = vld [vmem:[#allocation8 + $0x7b0] ss:$24 sps:$4 sm:$0xff]  }
 0x325   : > { %4797 = vmatpush1.bf16.msra.mxu0 %v8671_v55  ;;  %v8685_v55 = vld [vmem:[#allocation8 + $0x754] ss:$24 sps:$4 sm:$0xff]  }
 0x326   : > { %4798 = vmatprep.subr.bf16.mxu0 %v8676_v17  ;;  %7822 = vmatpush1.bf16.msra.mxu1 %v10061_v10  ;;  %v10188_v10 = vpack.c.bf16 %v2430_v62, %v2424_v57  ;;  %v2449_v17 = vld [vmem:[#allocation2 + $0x1e8] sm:$0xff]  ;;  %v10210_v62 = vpack.c.bf16 %v2457_v56, %v2451_v23  ;;  %v2454_v4 = vld [vmem:[#allocation2 + $0x210] sm:$0xff]  ;;  %v2479_v23 = vld [vmem:[#allocation2 + $0x2d8] sm:$0xff] }
 0x327   : > { %4457 = vmatmul.mubr.bf16.gmra.mrb[8].mxu1 %v10173_v27  ;;  %7807 = vmatprep.subr.bf16.mxu1 %v10064_v18  ;;  %v2436_v18 = vld [vmem:[#allocation2 + $0x180] sm:$0xff]  ;;  %v8691_v57 = vld [vmem:[#allocation8 + $0x7b4] ss:$24 sps:$4 sm:$0xff]   ;;  %v2475_v56 = vld [vmem:[#allocation2 + $0x2b8] sm:$0xff] }
 0x328   : > { %4650 = vmatmul.mubr.bf16.gmra.mrb[8].mxu0 %v10175_v33  ;;  %4466 = vmatprep.mubr.bf16.mxu1 %v10178_v39  ;;  %v10203_v25 = vpack.c.bf16 %v2442_v9, %v2436_v18  ;;  %11098 = vst [vmem:[#allocation25_spill] sm:$0xff] %v10210_v62  ;;  %v10223_v18 = vpack.c.bf16 %v2467_v63, %v2461_v61  ;;  %v8697_v9 = vld [vmem:[#allocation8 + $0x814] ss:$24 sps:$4 sm:$0xff]  }
 0x329   : > { %4799 = vmatpush1.bf16.msra.mxu0 %v8674_v35  ;;  %4659 = vmatprep.mubr.bf16.mxu0 %v10180_v47  ;;  %v2478_v61 = vld [vmem:[#allocation2 + $0x2d0] sm:$0xff] }
 0x32a   : > { %4800 = vmatprep.subr.bf16.mxu0 %v8679_v41  ;;  %7823 = vmatpush1.bf16.msra.mxu1 %v10066_v22  ;;  %v2444_v22 = vld [vmem:[#allocation2 + $0x1c0] sm:$0xff]  ;;  %v2474_v63 = vld [vmem:[#allocation2 + $0x2b0] sm:$0xff] }
 0x32b   : > { %7808 = vmatprep.subr.bf16.mxu1 %v10070_v24  ;;  %v8688_v24 = vld [vmem:[#allocation8 + $0x784] ss:$24 sps:$4 sm:$0xff]   ;;  %v10205_v35 = vpack.c.bf16 %v2444_v22, %v2438_v50  ;;  %v8686_v41 = vld [vmem:[#allocation8 + $0x780] ss:$24 sps:$4 sm:$0xff]   ;;  %v8695_v22 = vld [vmem:[#allocation8 + $0x810] ss:$24 sps:$4 sm:$0xff]  }
 0x32d   : > { %4801 = vmatpush1.bf16.msra.mxu0 %v8677_v53  ;;  %11097 = vst [vmem:[#allocation24_spill] sm:$0xff] %v10205_v35  ;;  %v10208_v53 = vpack.c.bf16 %v2455_v21, %v2449_v17  ;;  %v2462_v17 = vld [vmem:[#allocation2 + $0x250] sm:$0xff]  ;;  %v2473_v21 = vld [vmem:[#allocation2 + $0x2a8] sm:$0xff] }
 0x32e   : > { %4802 = vmatprep.subr.bf16.mxu0 %v8682_v59  ;;  %7824 = vmatpush1.bf16.msra.mxu1 %v10073_v26  ;;  %v2448_v26 = vld [vmem:[#allocation2 + $0x1e0] sm:$0xff]  ;;  %v2450_v59 = vld [vmem:[#allocation2 + $0x1f0] sm:$0xff] }
 0x32f   : > { %4467 = vmatmul.mubr.bf16.gmra.mrb[12].mxu1 %v10188_v10  ;;  %7809 = vmatprep.subr.bf16.mxu1 %v10076_v28  ;;  %v2456_v28 = vld [vmem:[#allocation2 + $0x220] sm:$0xff] }
 0x330   : > { %4660 = vmatmul.mubr.bf16.gmra.mrb[12].mxu0 %v10190_v7  ;;  %4476 = vmatprep.mubr.bf16.mxu1 %v10193_v14 }
 0x331   : > { %4803 = vmatpush1.bf16.msra.mxu0 %v8680_v38  ;;  %4669 = vmatprep.mubr.bf16.mxu0 %v10196_v44  ;;  %v2469_v38 = vld [vmem:[#allocation2 + $0x288] sm:$0xff] }
 0x332   : > { %4804 = vmatprep.subr.bf16.mxu0 %v8685_v55  ;;  %7825 = vmatpush1.bf16.msra.mxu1 %v10078_v30  ;;  %v10218_v30 = vpack.c.bf16 %v2454_v4, %v2448_v26  ;;  %v10220_v55 = vpack.c.bf16 %v2456_v28, %v2450_v59  ;;  %v10226_v50 = vpack.c.bf16 %v2469_v38, %v2463_v1  ;;  %v8698_v26 = vld [vmem:[#allocation8 + $0x840] ss:$24 sps:$4 sm:$0xff]   ;;  %v8703_v59 = vld [vmem:[#allocation8 + $0x874] ss:$24 sps:$4 sm:$0xff]   ;;  %v8706_v1 = vld [vmem:[#allocation8 + $0x8a4] ss:$24 sps:$4 sm:$0xff]  }
 0x333   : > { %7810 = vmatprep.subr.bf16.mxu1 %v10082_v32  ;;  %v2460_v32 = vld [vmem:[#allocation2 + $0x240] sm:$0xff]  ;;  %v10238_v4 = vpack.c.bf16 %v2479_v23, %v2473_v21  ;;  %v2485_v38 = vld [vmem:[#allocation2 + $0x308] sm:$0xff] }
 0x334   : > { %11099 = vst [vmem:[#allocation26_spill] sm:$0xff] %v10220_v55  ;;  %11100 = vst [vmem:[#allocation27_spill] sm:$0xff] %v10226_v50  ;;  %v2484_v21 = vld [vmem:[#allocation2 + $0x300] sm:$0xff] }
 0x335   : > { %4805 = vmatpush1.bf16.msra.mxu0 %v8683_v3  ;;  %v8692_v3 = vld [vmem:[#allocation8 + $0x7e0] ss:$24 sps:$4 sm:$0xff]  }
 0x336   : > { %4806 = vmatprep.subr.bf16.mxu0 %v8688_v24  ;;  %7826 = vmatpush1.bf16.msra.mxu1 %v10085_v34  ;;  %v2466_v24 = vld [vmem:[#allocation2 + $0x270] sm:$0xff]  ;;  %v2468_v34 = vld [vmem:[#allocation2 + $0x280] sm:$0xff] }
 0x337   : > { %4477 = vmatmul.mubr.bf16.gmra.mrb[16].mxu1 %v10203_v25  ;;  %7811 = vmatprep.subr.bf16.mxu1 %v10088_v37  ;;  %v8700_v37 = vld [vmem:[#allocation8 + $0x844] ss:$24 sps:$4 sm:$0xff]  }
 0x338   : > { %4670 = vmatmul.mubr.bf16.gmra.mrb[16].mxu0 %v10205_v35  ;;  %4486 = vmatprep.mubr.bf16.mxu1 %v10208_v53  ;;  %v2392_v23 = vld [vmem:[#allocation2 + $0x20] sm:$0xff]  ;;  %v2518_v35 = vld [vmem:[#allocation2 + $0x410] sm:$0xff] }
 0x339   : > { %4807 = vmatpush1.bf16.msra.mxu0 %v8686_v41  ;;  %4679 = vmatprep.mubr.bf16.mxu0 %v10210_v62  ;;  %v2481_v41 = vld [vmem:[#allocation2 + $0x2e8] sm:$0xff]  ;;  %v2500_v62 = vld [vmem:[#allocation2 + $0x380] sm:$0xff] }
 0x33a   : > { %4808 = vmatprep.subr.bf16.mxu0 %v8691_v57  ;;  %7827 = vmatpush1.bf16.msra.mxu1 %v10090_v40  ;;  %v10233_v57 = vpack.c.bf16 %v2466_v24, %v2460_v32  ;;  %v10240_v28 = vpack.c.bf16 %v2481_v41, %v2475_v56  ;;  %v2472_v40 = vld [vmem:[#allocation2 + $0x2a0] sm:$0xff]  ;;  %v2398_v56 = vld [vmem:[#allocation2 + $0x50] sm:$0xff]  ;;  %v2497_v41 = vld [vmem:[#allocation2 + $0x368] sm:$0xff] }
 0x33b   : > { %7812 = vmatprep.subr.bf16.mxu1 %v10094_v42  ;;  %v2480_v42 = vld [vmem:[#allocation2 + $0x2e0] sm:$0xff] }
 0x33c   : > { %11102 = vst [vmem:[#allocation29_spill] sm:$0xff] %v10240_v28  ;;  %v10250_v32 = vpack.c.bf16 %v2480_v42, %v2474_v63  ;;  %v8704_v24 = vld [vmem:[#allocation8 + $0x8a0] ss:$24 sps:$4 sm:$0xff]   ;;  %v8710_v63 = vld [vmem:[#allocation8 + $0x10] ss:$24 sps:$4 sm:$0xff]  }
 0x33d   : > { %4809 = vmatpush1.bf16.msra.mxu0 %v8689_v58  ;;  %v10235_v58 = vpack.c.bf16 %v2468_v34, %v2462_v17  ;;  %v8709_v34 = vld [vmem:[#allocation8 + $0x8d4] ss:$24 sps:$4 sm:$0xff]  }
 0x33e   : > { %4810 = vmatprep.subr.bf16.mxu0 %v8694_v16  ;;  %v8701_v16 = vld [vmem:[#allocation8 + $0x870] ss:$24 sps:$4 sm:$0xff]   ;;  %7828 = vmatpush1.bf16.msra.mxu1 %v10097_v46  ;;  %v10248_v46 = vpack.c.bf16 %v2478_v61, %v2472_v40  ;;  %11103 = vst [vmem:[#allocation30_spill] sm:$0xff] %v10250_v32  ;;  %v10265_v61 = vpack.c.bf16 %v2398_v56, %v2392_v23 }
 0x33f   : > { %4487 = vmatmul.mubr.bf16.gmra.mrb[20].mxu1 %v10218_v30  ;;  %11101 = vst [vmem:[#allocation28_spill] sm:$0xff] %v10235_v58  ;;  %7813 = vmatprep.subr.bf16.mxu1 %v10100_v49  ;;  %v8707_v49 = vld [vmem:[#allocation8 + $0x8d0] ss:$24 sps:$4 sm:$0xff]  }
 0x340   : > { %4680 = vmatmul.mubr.bf16.gmra.mrb[20].mxu0 %v10220_v55  ;;  %4496 = vmatprep.mubr.bf16.mxu1 %v10223_v18  ;;  %11105 = vst [vmem:[#allocation32_spill] sm:$0xff] %v10265_v61  ;;  %v2494_v55 = vld [vmem:[#allocation2 + $0x350] sm:$0xff] }
 0x341   : > { %4811 = vmatpush1.bf16.msra.mxu0 %v8692_v3  ;;  %4689 = vmatprep.mubr.bf16.mxu0 %v10226_v50  ;;  %v2491_v3 = vld [vmem:[#allocation2 + $0x338] sm:$0xff]  ;;  %v2488_v50 = vld [vmem:[#allocation2 + $0x320] sm:$0xff] }
 0x342   : > { %4812 = vmatprep.subr.bf16.mxu0 %v8697_v9  ;;  %v2393_v9 = vld [vmem:[#allocation2 + $0x28] sm:$0xff]  ;;  %7829 = vmatpush1.bf16.msra.mxu1 %v10102_v52  ;;  %v10253_v17 = vpack.c.bf16 %v2491_v3, %v2485_v38  ;;  %v2490_v52 = vld [vmem:[#allocation2 + $0x330] sm:$0xff]  ;;  %v8715_v38 = vld [vmem:[#allocation8 + $0x44] ss:$24 sps:$4 sm:$0xff]  }
 0x343   : > { %7814 = vmatprep.subr.bf16.mxu1 %v10106_v54  ;;  %v8712_v54 = vld [vmem:[#allocation8 + $0x14] ss:$24 sps:$4 sm:$0xff]   ;;  %v10263_v40 = vpack.c.bf16 %v2490_v52, %v2484_v21  ;;  %v2496_v3 = vld [vmem:[#allocation2 + $0x360] sm:$0xff]  ;;  %v2423_v21 = vld [vmem:[#allocation2 + $0x118] sm:$0xff] }
 0x344   : > { %v8718_v52 = vld [vmem:[#allocation8 + $0x74] ss:$24 sps:$4 sm:$0xff]  }
 0x345   : > { %4813 = vmatpush1.bf16.msra.mxu0 %v8695_v22  ;;  %v2399_v22 = vld [vmem:[#allocation2 + $0x58] sm:$0xff] }
 0x346   : > { %4814 = vmatprep.subr.bf16.mxu0 %v8700_v37  ;;  %v10256_v37 = vpack.c.bf16 %v2399_v22, %v2393_v9  ;;  %7830 = vmatpush1.bf16.msra.mxu1 %v10109_v0  ;;  %v2502_v9 = vld [vmem:[#allocation2 + $0x390] sm:$0xff]  ;;  %v2404_v22 = vld [vmem:[#allocation2 + $0x80] sm:$0xff] }
 0x347   : > { %4497 = vmatmul.mubr.bf16.gmra.mrb[24].mxu1 %v10233_v57  ;;  %7815 = vmatprep.subr.bf16.mxu1 %v10116_v6  ;;  %v2410_v0 = vld [vmem:[#allocation2 + $0xb0] sm:$0xff]  ;;  %v2509_v6 = vld [vmem:[#allocation2 + $0x3c8] sm:$0xff] }
 0x348   : > { %4690 = vmatmul.mubr.bf16.gmra.mrb[24].mxu0 %v10235_v58  ;;  %4506 = vmatprep.mubr.bf16.mxu1 %v10238_v4  ;;  %11104 = vst [vmem:[#allocation31_spill] sm:$0xff] %v10256_v37  ;;  %v10280_v23 = vpack.c.bf16 %v2410_v0, %v2404_v22  ;;  %v8724_v22 = vld [vmem:[#allocation8 + $0xd4] ss:$24 sps:$4 sm:$0xff]  }
 0x349   : > { %4815 = vmatpush1.bf16.msra.mxu0 %v8698_v26  ;;  %4699 = vmatprep.mubr.bf16.mxu0 %v10240_v28  ;;  %v2503_v26 = vld [vmem:[#allocation2 + $0x398] sm:$0xff]  ;;  %v8736_v0 = vld [vmem:[#allocation8 + $0xc] ss:$24 sps:$4 sm:$0xff]   ;;  %v2482_v58 = vld [vmem:[#allocation2 + $0x2f0] sm:$0xff] }
 0x34a   : > { %4816 = vmatprep.subr.bf16.mxu0 %v8703_v59  ;;  %v2405_v59 = vld [vmem:[#allocation2 + $0x88] sm:$0xff]  ;;  %v10268_v42 = vpack.c.bf16 %v2503_v26, %v2497_v41  ;;  %7831 = vmatpush1.bf16.msra.mxu1 %v10121_v8  ;;  %v10278_v8 = vpack.c.bf16 %v2502_v9, %v2496_v3  ;;  %11107 = vst [vmem:[#allocation34_spill] sm:$0xff] %v10280_v23  ;;  %v2508_v26 = vld [vmem:[#allocation2 + $0x3c0] sm:$0xff]  ;;  %v2435_v9 = vld [vmem:[#allocation2 + $0x178] sm:$0xff] }
 0x34b   : > { %7816 = vmatprep.subr.bf16.mxu1 %v10124_v12  ;;  %v8716_v41 = vld [vmem:[#allocation8 + $0x70] ss:$24 sps:$4 sm:$0xff]   ;;  %v8721_v12 = vld [vmem:[#allocation8 + $0xa4] ss:$24 sps:$4 sm:$0xff]  }
 0x34c   : > { %v2429_v3 = vld [vmem:[#allocation2 + $0x148] sm:$0xff]  ;;  %v2476_v28 = vld [vmem:[#allocation2 + $0x2c0] sm:$0xff] }
 0x34d   : > { %4817 = vmatpush1.bf16.msra.mxu0 %v8701_v16  ;;  %v2411_v16 = vld [vmem:[#allocation2 + $0xb8] sm:$0xff] }
 0x34e   : > { %4818 = vmatprep.subr.bf16.mxu0 %v8706_v1  ;;  %v10270_v1 = vpack.c.bf16 %v2411_v16, %v2405_v59  ;;  %7832 = vmatpush1.bf16.msra.mxu1 %v10127_v15  ;;  %v2514_v59 = vld [vmem:[#allocation2 + $0x3f0] sm:$0xff]  ;;  %v2416_v16 = vld [vmem:[#allocation2 + $0xe0] sm:$0xff]  ;;  %v2527_v15 = vld [vmem:[#allocation2 + $0x458] sm:$0xff] }
 0x34f   : > { %4507 = vmatmul.mubr.bf16.gmra.mrb[28].mxu1 %v10248_v46  ;;  %7817 = vmatprep.subr.bf16.mxu1 %v10130_v20  ;;  %v8719_v20 = vld [vmem:[#allocation8 + $0xa0] ss:$24 sps:$4 sm:$0xff]  }
 0x350   : > { %4700 = vmatmul.mubr.bf16.gmra.mrb[28].mxu0 %v10250_v32  ;;  %4516 = vmatprep.mubr.bf16.mxu1 %v10253_v17  ;;  %11106 = vst [vmem:[#allocation33_spill] sm:$0xff] %v10270_v1  ;;  %v8766_v32 = vld [vmem:[#allocation8 + $0x224] ss:$24 sps:$4 sm:$0xff]  }
 0x351   : > { %4819 = vmatpush1.bf16.msra.mxu0 %v8704_v24  ;;  %4822 = vmatprep.mubr.bf16.mxu0 %v10256_v37  ;;  %v8713_v24 = vld [vmem:[#allocation8 + $0x40] ss:$24 sps:$4 sm:$0xff]   ;;  %v2470_v37 = vld [vmem:[#allocation2 + $0x290] sm:$0xff] }
 0x352   : > { %4820 = vmatprep.subr.bf16.mxu0 %v8709_v34  ;;  %v2515_v34 = vld [vmem:[#allocation2 + $0x3f8] sm:$0xff]  ;;  %7833 = vmatpush1.bf16.msra.mxu1 %v10132_v36  ;;  %v2428_v36 = vld [vmem:[#allocation2 + $0x140] sm:$0xff] }
 0x353   : > { %v10283_v56 = vpack.c.bf16 %v2515_v34, %v2509_v6  ;;  %7818 = vmatprep.subr.bf16.mxu1 %v10136_v48  ;;  %v2533_v48 = vld [vmem:[#allocation2 + $0x488] sm:$0xff] }
 0x355   : > { %4821 = vmatpush1.bf16.msra.mxu0 %v8707_v49  ;;  %v2417_v49 = vld [vmem:[#allocation2 + $0xe8] sm:$0xff] }
 0x356   : > { %5562 = vmatprep.subr.bf16.mxu0 %v8712_v54  ;;  %v10285_v54 = vpack.c.bf16 %v2423_v21, %v2417_v49  ;;  %v10300_v49 = vpack.c.bf16 %v2435_v9, %v2429_v3  ;;  %v8722_v21 = vld [vmem:[#allocation8 + $0xd0] ss:$24 sps:$4 sm:$0xff]   ;;  %7834 = vmatpush1.bf16.msra.mxu1 %v10138_v60  ;;  %v8725_v60 = vld [vmem:[#allocation8 + $0x100] ss:$24 sps:$4 sm:$0xff]  }
 0x357   : > { %4517 = vmatmul.mubr.bf16.gmra.mrb[32].mxu1 %v10263_v40  ;;  %4983 = vmatprep.subr.bf16.mxu1 %v8736_v0  ;;  %v2538_v0 = vld [vmem:[#allocation2 + $0x4b0] sm:$0xff] }
 0x358   : > { %4823 = vmatmul.mubr.bf16.vlgmr.msra.gmra.mrb[0].mxu0 %v10265_v61  ;;  %4526 = vmatprep.mubr.bf16.mxu1 %v10268_v42  ;;  %11108 = vst [vmem:[#allocation35_spill] sm:$0xff] %v10285_v54  ;;  %11110 = vst [vmem:[#allocation37_spill] sm:$0xff] %v10300_v49  ;;  %v2464_v61 = vld [vmem:[#allocation2 + $0x260] sm:$0xff] }
 0x359   : > { %5563 = vmatpush1.bf16.msra.mxu0 %v8710_v63  ;;  %4832 = vmatprep.mubr.bf16.mxu0 %v10270_v1  ;;  %v2422_v63 = vld [vmem:[#allocation2 + $0x110] sm:$0xff] }
 0x35a   : > { %5564 = vmatprep.subr.bf16.mxu0 %v8715_v38  ;;  %v2521_v38 = vld [vmem:[#allocation2 + $0x428] sm:$0xff]  ;;  %v10296_v6 = vpack.c.bf16 %v2422_v63, %v2416_v16  ;;  %v2447_v16 = vld [vmem:[#allocation2 + $0x1d8] sm:$0xff]  ;;  %v2562_v1 = vld [vmem:[#allocation2 + $0x570] sm:$0xff] }
 0x35b   : > { %v10298_v34 = vpack.c.bf16 %v2527_v15, %v2521_v38  ;;  %v8730_v63 = vld [vmem:[#allocation8 + $0x134] ss:$24 sps:$4 sm:$0xff]  }
 0x35c   : > { %11109 = vst [vmem:[#allocation36_spill] sm:$0xff] %v10296_v6 }
 0x35d   : > { %5565 = vmatpush1.bf16.msra.mxu0 %v8713_v24  ;;  %v10294_v24 = vpack.c.bf16 %v2514_v59, %v2508_v26  ;;  %v2539_v26 = vld [vmem:[#allocation2 + $0x4b8] sm:$0xff]  ;;  %v2441_v59 = vld [vmem:[#allocation2 + $0x1a8] sm:$0xff] }
 0x35e   : > { %5566 = vmatprep.subr.bf16.mxu0 %v8718_v52  ;;  %v2520_v52 = vld [vmem:[#allocation2 + $0x420] sm:$0xff]  ;;  %v10311_v3 = vpack.c.bf16 %v2539_v26, %v2533_v48  ;;  %v10313_v9 = vpack.c.bf16 %v2447_v16, %v2441_v59  ;;  %v8739_v48 = vld [vmem:[#allocation8 + $0x194] ss:$24 sps:$4 sm:$0xff]  }
 0x35f   : > { %4527 = vmatmul.mubr.bf16.gmra.mrb[36].mxu1 %v10278_v8 }
 0x360   : > { %4833 = vmatmul.mubr.bf16.gmra.mrb[4].mxu0 %v10280_v23  ;;  %4536 = vmatprep.mubr.bf16.mxu1 %v10283_v56  ;;  %11112 = vst [vmem:[#allocation39_spill] sm:$0xff] %v10313_v9  ;;  %v8755_v23 = vld [vmem:[#allocation8 + $0x1f0] ss:$24 sps:$4 sm:$0xff]  }
 0x361   : > { %4842 = vmatprep.mubr.bf16.mxu0 %v10285_v54  ;;  %5567 = vmatpush1.bf16.msra.mxu0 %v8716_v41  ;;  %v2526_v41 = vld [vmem:[#allocation2 + $0x450] sm:$0xff]  ;;  %v8727_v54 = vld [vmem:[#allocation8 + $0x104] ss:$24 sps:$4 sm:$0xff]  }
 0x362   : > { %5568 = vmatprep.subr.bf16.mxu0 %v8721_v12  ;;  %v2434_v12 = vld [vmem:[#allocation2 + $0x170] sm:$0xff]  ;;  %v10307_v38 = vpack.c.bf16 %v2526_v41, %v2520_v52  ;;  %v2551_v52 = vld [vmem:[#allocation2 + $0x518] sm:$0xff]  ;;  %v2453_v41 = vld [vmem:[#allocation2 + $0x208] sm:$0xff] }
 0x363   : > { %v10309_v15 = vpack.c.bf16 %v2434_v12, %v2428_v36  ;;  %v2459_v36 = vld [vmem:[#allocation2 + $0x238] sm:$0xff] }
 0x364   : > { %v8731_v12 = vld [vmem:[#allocation8 + $0x160] ss:$24 sps:$4 sm:$0xff]  }
 0x365   : > { %5569 = vmatpush1.bf16.msra.mxu0 %v8719_v20  ;;  %11111 = vst [vmem:[#allocation38_spill] sm:$0xff] %v10309_v15  ;;  %v8728_v20 = vld [vmem:[#allocation8 + $0x130] ss:$24 sps:$4 sm:$0xff]  }
 0x366   : > { %5570 = vmatprep.subr.bf16.mxu0 %v8724_v22  ;;  %v2532_v22 = vld [vmem:[#allocation2 + $0x480] sm:$0xff] }
 0x367   : > { %4537 = vmatmul.mubr.bf16.gmra.mrb[40].mxu1 %v10294_v24  ;;  %v10319_v26 = vpack.c.bf16 %v2538_v0, %v2532_v22  ;;  %v2557_v22 = vld [vmem:[#allocation2 + $0x548] sm:$0xff]  ;;  %v2563_v0 = vld [vmem:[#allocation2 + $0x578] sm:$0xff] }
 0x368   : > { %4843 = vmatmul.mubr.bf16.gmra.mrb[8].mxu0 %v10296_v6  ;;  %4546 = vmatprep.mubr.bf16.mxu1 %v10298_v34  ;;  %v2440_v6 = vld [vmem:[#allocation2 + $0x1a0] sm:$0xff] }
 0x369   : > { %4852 = vmatprep.mubr.bf16.mxu0 %v10300_v49  ;;  %5571 = vmatpush1.bf16.msra.mxu0 %v8722_v21  ;;  %v8733_v49 = vld [vmem:[#allocation8 + $0x164] ss:$24 sps:$4 sm:$0xff]   ;;  %v2545_v21 = vld [vmem:[#allocation2 + $0x4e8] sm:$0xff] }
 0x36a   : > { %5572 = vmatprep.subr.bf16.mxu0 %v8727_v54  ;;  %v2446_v54 = vld [vmem:[#allocation2 + $0x1d0] sm:$0xff]  ;;  %v10323_v16 = vpack.c.bf16 %v2551_v52, %v2545_v21  ;;  %v2471_v21 = vld [vmem:[#allocation2 + $0x298] sm:$0xff] }
 0x36b   : > { %v10321_v59 = vpack.c.bf16 %v2446_v54, %v2440_v6  ;;  %v2458_v6 = vld [vmem:[#allocation2 + $0x230] sm:$0xff]  ;;  %v2465_v54 = vld [vmem:[#allocation2 + $0x268] sm:$0xff]  ;;  %v8746_v52 = vld [vmem:[#allocation8 + $0x1c0] ss:$24 sps:$4 sm:$0xff]  }
 0x36d   : > { %5573 = vmatpush1.bf16.msra.mxu0 %v8725_v60  ;;  %11113 = vst [vmem:[#allocation40_spill] sm:$0xff] %v10321_v59  ;;  %v10325_v60 = vpack.c.bf16 %v2459_v36, %v2453_v41  ;;  %v8757_v41 = vld [vmem:[#allocation8 + $0x1f4] ss:$24 sps:$4 sm:$0xff]  }
 0x36e   : > { %5574 = vmatprep.subr.bf16.mxu0 %v8730_v63  ;;  %v8737_v63 = vld [vmem:[#allocation8 + $0x190] ss:$24 sps:$4 sm:$0xff]  }
 0x36f   : > { %4547 = vmatmul.mubr.bf16.gmra.mrb[44].mxu1 %v10307_v38  ;;  %11114 = vst [vmem:[#allocation41_spill] sm:$0xff] %v10325_v60 }
 0x370   : > { %4853 = vmatmul.mubr.bf16.gmra.mrb[12].mxu0 %v10309_v15  ;;  %4556 = vmatprep.mubr.bf16.mxu1 %v10311_v3  ;;  %v2544_v15 = vld [vmem:[#allocation2 + $0x4e0] sm:$0xff] }
 0x371   : > { %4862 = vmatprep.mubr.bf16.mxu0 %v10313_v9  ;;  %5575 = vmatpush1.bf16.msra.mxu0 %v8728_v20  ;;  %v8748_v9 = vld [vmem:[#allocation8 + $0x1c4] ss:$24 sps:$4 sm:$0xff]   ;;  %v2550_v20 = vld [vmem:[#allocation2 + $0x510] sm:$0xff] }
 0x372   : > { %5576 = vmatprep.subr.bf16.mxu0 %v8733_v49  ;;  %v2452_v49 = vld [vmem:[#allocation2 + $0x200] sm:$0xff]  ;;  %v10331_v36 = vpack.c.bf16 %v2550_v20, %v2544_v15  ;;  %v2569_v15 = vld [vmem:[#allocation2 + $0x5a8] sm:$0xff]  ;;  %v2483_v20 = vld [vmem:[#allocation2 + $0x2f8] sm:$0xff] }
 0x375   : > { %5577 = vmatpush1.bf16.msra.mxu0 %v8731_v12  ;;  %v10333_v12 = vpack.c.bf16 %v2458_v6, %v2452_v49  ;;  %v8764_v49 = vld [vmem:[#allocation8 + $0x220] ss:$24 sps:$4 sm:$0xff]   ;;  %v8775_v6 = vld [vmem:[#allocation8 + $0x254] ss:$24 sps:$4 sm:$0xff]  }
 0x376   : > { %5578 = vmatprep.subr.bf16.mxu0 %v8739_v48  ;;  %v10335_v48 = vpack.c.bf16 %v2563_v0, %v2557_v22  ;;  %v10345_v0 = vpack.c.bf16 %v2470_v37, %v2464_v61  ;;  %v2489_v37 = vld [vmem:[#allocation2 + $0x328] sm:$0xff]  ;;  %v2495_v61 = vld [vmem:[#allocation2 + $0x358] sm:$0xff] }
 0x377   : > { %4557 = vmatmul.mubr.bf16.gmra.mrb[48].mxu1 %v10319_v26  ;;  %11115 = vst [vmem:[#allocation42_spill] sm:$0xff] %v10333_v12 }
 0x378   : > { %4863 = vmatmul.mubr.bf16.gmra.mrb[16].mxu0 %v10321_v59  ;;  %4566 = vmatprep.mubr.bf16.mxu1 %v10323_v16  ;;  %v10337_v59 = vpack.c.bf16 %v2471_v21, %v2465_v54  ;;  %11117 = vst [vmem:[#allocation44_spill] sm:$0xff] %v10345_v0 }
 0x379   : > { %4872 = vmatprep.mubr.bf16.mxu0 %v10325_v60  ;;  %5579 = vmatpush1.bf16.msra.mxu0 %v8737_v63  ;;  %v2556_v60 = vld [vmem:[#allocation2 + $0x540] sm:$0xff]  ;;  %v2477_v63 = vld [vmem:[#allocation2 + $0x2c8] sm:$0xff] }
 0x37a   : > { %5580 = vmatprep.subr.bf16.mxu0 %v8748_v9  ;;  %11116 = vst [vmem:[#allocation43_spill] sm:$0xff] %v10337_v59  ;;  %v2575_v9 = vld [vmem:[#allocation2 + $0x5d8] sm:$0xff]  ;;  %v10343_v22 = vpack.c.bf16 %v2562_v1, %v2556_v60  ;;  %v10349_v21 = vpack.c.bf16 %v2483_v20, %v2477_v63  ;;  %v2493_v1 = vld [vmem:[#allocation2 + $0x348] sm:$0xff]  ;;  %v10361_v20 = vpack.c.bf16 %v2495_v61, %v2489_v37 }
 0x37b   : > { %v10347_v54 = vpack.c.bf16 %v2575_v9, %v2569_v15  ;;  %v8793_v60 = vld [vmem:[#allocation8 + $0x2b4] ss:$24 sps:$4 sm:$0xff]   ;;  %v10357_v9 = vpack.c.bf16 %v2482_v58, %v2476_v28  ;;  %v8800_v28 = vld [vmem:[#allocation8 + $0x2e0] ss:$24 sps:$4 sm:$0xff]  }
 0x37c   : > { %11118 = vst [vmem:[#allocation45_spill] sm:$0xff] %v10349_v21  ;;  %11121 = vst [vmem:[#allocation48_spill] sm:$0xff] %v10361_v20  ;;  %v2501_v58 = vld [vmem:[#allocation2 + $0x388] sm:$0xff]  ;;  %v8742_v61 = vld [vmem:[#allocation8 + $0x3c] ss:$24 sps:$4 sm:$0xff]  }
 0x37d   : > { %5581 = vmatpush1.bf16.msra.mxu0 %v8746_v52  ;;  %v8773_v52 = vld [vmem:[#allocation8 + $0x250] ss:$24 sps:$4 sm:$0xff]   ;;  %11119 = vst [vmem:[#allocation46_spill] sm:$0xff] %v10357_v9 }
 0x37e   : > { %5582 = vmatprep.subr.bf16.mxu0 %v8757_v41  ;;  %v2568_v41 = vld [vmem:[#allocation2 + $0x5a0] sm:$0xff] }
 0x37f   : > { %4567 = vmatmul.mubr.bf16.gmra.mrb[52].mxu1 %v10331_v36  ;;  %v8734_v37 = vld [vmem:[#allocation8 + $0x8] ss:$24 sps:$4 sm:$0xff]  }
 0x380   : > { %4873 = vmatmul.mubr.bf16.gmra.mrb[20].mxu0 %v10333_v12  ;;  %4576 = vmatprep.mubr.bf16.mxu1 %v10335_v48  ;;  %v2574_v12 = vld [vmem:[#allocation2 + $0x5d0] sm:$0xff] }
 0x381   : > { %4882 = vmatprep.mubr.bf16.mxu0 %v10337_v59  ;;  %5583 = vmatpush1.bf16.msra.mxu0 %v8755_v23  ;;  %v8784_v59 = vld [vmem:[#allocation8 + $0x284] ss:$24 sps:$4 sm:$0xff]   ;;  %v8782_v23 = vld [vmem:[#allocation8 + $0x280] ss:$24 sps:$4 sm:$0xff]   ;;  %v10355_v15 = vpack.c.bf16 %v2574_v12, %v2568_v41  ;;  %v2505_v12 = vld [vmem:[#allocation2 + $0x3a8] sm:$0xff] }
 0x382   : > { %5584 = vmatprep.subr.bf16.mxu0 %v8766_v32  ;;  %v2487_v32 = vld [vmem:[#allocation2 + $0x318] sm:$0xff]  ;;  %v8811_v41 = vld [vmem:[#allocation8 + $0x314] ss:$24 sps:$4 sm:$0xff]  }
 0x383   : > { %v10359_v63 = vpack.c.bf16 %v2493_v1, %v2487_v32  ;;  %v10369_v1 = vpack.c.bf16 %v2494_v55, %v2488_v50  ;;  %v2511_v55 = vld [vmem:[#allocation2 + $0x3d8] sm:$0xff]  ;;  %v2517_v50 = vld [vmem:[#allocation2 + $0x408] sm:$0xff] }
 0x385   : > { %5585 = vmatpush1.bf16.msra.mxu0 %v8764_v49  ;;  %11120 = vst [vmem:[#allocation47_spill] sm:$0xff] %v10359_v63  ;;  %v8791_v49 = vld [vmem:[#allocation8 + $0x2b0] ss:$24 sps:$4 sm:$0xff]   ;;  %11123 = vst [vmem:[#allocation50_spill] sm:$0xff] %v10369_v1 }
 0x386   : > { %5586 = vmatprep.subr.bf16.mxu0 %v8775_v6  ;;  %v2486_v6 = vld [vmem:[#allocation2 + $0x310] sm:$0xff] }
 0x387   : > { %4577 = vmatmul.mubr.bf16.gmra.mrb[56].mxu1 %v10343_v22 }
 0x388   : > { %4883 = vmatmul.mubr.bf16.gmra.mrb[24].mxu0 %v10345_v0  ;;  %4586 = vmatprep.mubr.bf16.mxu1 %v10347_v54  ;;  %v2492_v0 = vld [vmem:[#allocation2 + $0x340] sm:$0xff] }
 0x389   : > { %4892 = vmatprep.mubr.bf16.mxu0 %v10349_v21  ;;  %5587 = vmatpush1.bf16.msra.mxu0 %v8773_v52  ;;  %v8802_v21 = vld [vmem:[#allocation8 + $0x2e4] ss:$24 sps:$4 sm:$0xff]   ;;  %v10367_v32 = vpack.c.bf16 %v2492_v0, %v2486_v6 }
 0x38a   : > { %5588 = vmatprep.subr.bf16.mxu0 %v8784_v59  ;;  %v2499_v59 = vld [vmem:[#allocation2 + $0x378] sm:$0xff]  ;;  %v8745_v0 = vld [vmem:[#allocation8 + $0x6c] ss:$24 sps:$4 sm:$0xff]  }
 0x38b   : > { %v2507_v52 = vld [vmem:[#allocation2 + $0x3b8] sm:$0xff]  ;;  %11122 = vst [vmem:[#allocation49_spill] sm:$0xff] %v10367_v32 }
 0x38c   : > { %v2519_v6 = vld [vmem:[#allocation2 + $0x418] sm:$0xff] }
 0x38d   : > { %5589 = vmatpush1.bf16.msra.mxu0 %v8782_v23  ;;  %v10371_v23 = vpack.c.bf16 %v2505_v12, %v2499_v59  ;;  %v8743_v59 = vld [vmem:[#allocation8 + $0x68] ss:$24 sps:$4 sm:$0xff]  }
 0x38e   : > { %5590 = vmatprep.subr.bf16.mxu0 %v8793_v60  ;;  %v10373_v60 = vpack.c.bf16 %v2507_v52, %v2501_v58  ;;  %v10383_v52 = vpack.c.bf16 %v2517_v50, %v2511_v55  ;;  %v8760_v50 = vld [vmem:[#allocation8 + $0xfc] ss:$24 sps:$4 sm:$0xff]  }
 0x38f   : > { %4587 = vmatmul.mubr.bf16.gmra.mrb[60].mxu1 %v10355_v15  ;;  %11124 = vst [vmem:[#allocation51_spill] sm:$0xff] %v10371_v23 }
 0x390   : > { %4893 = vmatmul.mubr.bf16.gmra.mrb[28].mxu0 %v10357_v9  ;;  %4709 = vmatprep.mubr.bf16.mxu1 %v10359_v63  ;;  %11125 = vst [vmem:[#allocation52_spill] sm:$0xff] %v10373_v60  ;;  %v8740_v9 = vld [vmem:[#allocation8 + $0x38] ss:$24 sps:$4 sm:$0xff]   ;;  %11128 = vst [vmem:[#allocation55_spill] sm:$0xff] %v10383_v52 }
 0x391   : > { %4902 = vmatprep.mubr.bf16.mxu0 %v10361_v20  ;;  %5591 = vmatpush1.bf16.msra.mxu0 %v8791_v49  ;;  %v2498_v63 = vld [vmem:[#allocation2 + $0x370] sm:$0xff]  ;;  %v2504_v20 = vld [vmem:[#allocation2 + $0x3a0] sm:$0xff] }
 0x392   : > { %5592 = vmatprep.subr.bf16.mxu0 %v8802_v21  ;;  %v2506_v49 = vld [vmem:[#allocation2 + $0x3b0] sm:$0xff]  ;;  %v2513_v21 = vld [vmem:[#allocation2 + $0x3e8] sm:$0xff]  ;;  %v10379_v12 = vpack.c.bf16 %v2504_v20, %v2498_v63  ;;  %v2523_v20 = vld [vmem:[#allocation2 + $0x438] sm:$0xff] }
 0x393   : > { %v10381_v58 = vpack.c.bf16 %v2506_v49, %v2500_v62  ;;  %v8754_v63 = vld [vmem:[#allocation8 + $0xcc] ss:$24 sps:$4 sm:$0xff]   ;;  %v8752_v49 = vld [vmem:[#allocation8 + $0xc8] ss:$24 sps:$4 sm:$0xff]  }
 0x394   : > { %11126 = vst [vmem:[#allocation53_spill] sm:$0xff] %v10379_v12  ;;  %v2529_v62 = vld [vmem:[#allocation2 + $0x468] sm:$0xff] }
 0x395   : > { %5593 = vmatpush1.bf16.msra.mxu0 %v8800_v28  ;;  %11127 = vst [vmem:[#allocation54_spill] sm:$0xff] %v10381_v58  ;;  %v8751_v28 = vld [vmem:[#allocation8 + $0x9c] ss:$24 sps:$4 sm:$0xff]  }
 0x396   : > { %5755 = vmatprep.subr.bf16.mxu0 %v8811_v41  ;;  %v10385_v41 = vpack.c.bf16 %v2519_v6, %v2513_v21  ;;  %v10395_v21 = vpack.c.bf16 %v2529_v62, %v2523_v20  ;;  %v8769_v62 = vld [vmem:[#allocation8 + $0x15c] ss:$24 sps:$4 sm:$0xff]  }
 0x397   : > { %4710 = vmatmul.mubr.bf16.vlgmr.msra.gmra.mrb[32].mxu1 %v10367_v32  ;;  %v2512_v32 = vld [vmem:[#allocation2 + $0x3e0] sm:$0xff] }
 0x398   : > { %4903 = vmatmul.mubr.bf16.gmra.mrb[32].mxu0 %v10369_v1  ;;  %4984 = vmatpush1.bf16.msra.mxu1 %v8734_v37  ;;  %11129 = vst [vmem:[#allocation56_spill] sm:$0xff] %v10385_v41  ;;  %v8749_v37 = vld [vmem:[#allocation8 + $0x98] ss:$24 sps:$4 sm:$0xff]   ;;  %v10393_v55 = vpack.c.bf16 %v2518_v35, %v2512_v32  ;;  %11132 = vst [vmem:[#allocation59_spill] sm:$0xff] %v10395_v21  ;;  %v2541_v35 = vld [vmem:[#allocation2 + $0x4c8] sm:$0xff] }
 0x399   : > { %4719 = vmatprep.mubr.bf16.mxu1 %v10371_v23  ;;  %4985 = vmatprep.subr.bf16.mxu1 %v8742_v61  ;;  %v2510_v1 = vld [vmem:[#allocation2 + $0x3d0] sm:$0xff]  ;;  %v2516_v23 = vld [vmem:[#allocation2 + $0x400] sm:$0xff]  ;;  %v2531_v61 = vld [vmem:[#allocation2 + $0x478] sm:$0xff] }
 0x39a   : > { %4912 = vmatprep.mubr.bf16.mxu0 %v10373_v60  ;;  %11131 = vst [vmem:[#allocation58_spill] sm:$0xff] %v10393_v55  ;;  %v2528_v60 = vld [vmem:[#allocation2 + $0x460] sm:$0xff]  ;;  %v2537_v32 = vld [vmem:[#allocation2 + $0x4a8] sm:$0xff] }
 0x39c   : > { %4986 = vmatpush1.bf16.msra.mxu1 %v8740_v9  ;;  %v2525_v9 = vld [vmem:[#allocation2 + $0x448] sm:$0xff] }
 0x39d   : > { %4987 = vmatprep.subr.bf16.mxu1 %v8745_v0  ;;  %v10391_v0 = vpack.c.bf16 %v2516_v23, %v2510_v1  ;;  %v10397_v6 = vpack.c.bf16 %v2531_v61, %v2525_v9  ;;  %v8763_v1 = vld [vmem:[#allocation8 + $0x12c] ss:$24 sps:$4 sm:$0xff]   ;;  %v2535_v23 = vld [vmem:[#allocation2 + $0x498] sm:$0xff] }
 0x39e   : > { %v10407_v9 = vpack.c.bf16 %v2541_v35, %v2535_v23  ;;  %v8770_v23 = vld [vmem:[#allocation8 + $0x188] ss:$24 sps:$4 sm:$0xff]  }
 0x39f   : > { %4720 = vmatmul.mubr.bf16.gmra.mrb[36].mxu1 %v10379_v12  ;;  %11130 = vst [vmem:[#allocation57_spill] sm:$0xff] %v10391_v0  ;;  %11133 = vst [vmem:[#allocation60_spill] sm:$0xff] %v10397_v6  ;;  %v2530_v12 = vld [vmem:[#allocation2 + $0x470] sm:$0xff] }
 0x3a0   : > { %4913 = vmatmul.mubr.bf16.gmra.mrb[36].mxu0 %v10381_v58  ;;  %4988 = vmatpush1.bf16.msra.mxu1 %v8743_v59  ;;  %v8758_v59 = vld [vmem:[#allocation8 + $0xf8] ss:$24 sps:$4 sm:$0xff]   ;;  %11136 = vst [vmem:[#allocation63_spill] sm:$0xff] %v10407_v9 }
 0x3a1   : > { %4729 = vmatprep.mubr.bf16.mxu1 %v10383_v52  ;;  %4989 = vmatprep.subr.bf16.mxu1 %v8751_v28  ;;  %v2522_v58 = vld [vmem:[#allocation2 + $0x430] sm:$0xff]  ;;  %v2524_v52 = vld [vmem:[#allocation2 + $0x440] sm:$0xff]  ;;  %v2543_v28 = vld [vmem:[#allocation2 + $0x4d8] sm:$0xff] }
 0x3a2   : > { %4922 = vmatprep.mubr.bf16.mxu0 %v10385_v41  ;;  %v10405_v20 = vpack.c.bf16 %v2530_v12, %v2524_v52  ;;  %v10409_v61 = vpack.c.bf16 %v2543_v28, %v2537_v32  ;;  %v2540_v41 = vld [vmem:[#allocation2 + $0x4c0] sm:$0xff]  ;;  %v2553_v12 = vld [vmem:[#allocation2 + $0x528] sm:$0xff]  ;;  %v8778_v32 = vld [vmem:[#allocation8 + $0x1bc] ss:$24 sps:$4 sm:$0xff]  }
 0x3a3   : > { %v2549_v52 = vld [vmem:[#allocation2 + $0x508] sm:$0xff] }
 0x3a4   : > { %4990 = vmatpush1.bf16.msra.mxu1 %v8749_v37  ;;  %v8761_v37 = vld [vmem:[#allocation8 + $0x128] ss:$24 sps:$4 sm:$0xff]   ;;  %11135 = vst [vmem:[#allocation62_spill] sm:$0xff] %v10405_v20  ;;  %11137 = vst [vmem:[#allocation64_spill] sm:$0xff] %v10409_v61 }
 0x3a5   : > { %4991 = vmatprep.subr.bf16.mxu1 %v8754_v63  ;;  %v10403_v63 = vpack.c.bf16 %v2528_v60, %v2522_v58  ;;  %v8772_v60 = vld [vmem:[#allocation8 + $0x18c] ss:$24 sps:$4 sm:$0xff]   ;;  %v2547_v58 = vld [vmem:[#allocation2 + $0x4f8] sm:$0xff] }
 0x3a6   : > { %v10419_v35 = vpack.c.bf16 %v2553_v12, %v2547_v58  ;;  %v8779_v58 = vld [vmem:[#allocation8 + $0x1e8] ss:$24 sps:$4 sm:$0xff]  }
 0x3a7   : > { %4730 = vmatmul.mubr.bf16.gmra.mrb[40].mxu1 %v10391_v0  ;;  %11134 = vst [vmem:[#allocation61_spill] sm:$0xff] %v10403_v63  ;;  %v2542_v0 = vld [vmem:[#allocation2 + $0x4d0] sm:$0xff] }
 0x3a8   : > { %4923 = vmatmul.mubr.bf16.gmra.mrb[40].mxu0 %v10393_v55  ;;  %4992 = vmatpush1.bf16.msra.mxu1 %v8752_v49  ;;  %v8767_v49 = vld [vmem:[#allocation8 + $0x158] ss:$24 sps:$4 sm:$0xff]  }
 0x3a9   : > { %4739 = vmatprep.mubr.bf16.mxu1 %v10395_v21  ;;  %4993 = vmatprep.subr.bf16.mxu1 %v8760_v50  ;;  %v2534_v55 = vld [vmem:[#allocation2 + $0x490] sm:$0xff]  ;;  %v2536_v21 = vld [vmem:[#allocation2 + $0x4a0] sm:$0xff]  ;;  %v2555_v50 = vld [vmem:[#allocation2 + $0x538] sm:$0xff] }
 0x3aa   : > { %4932 = vmatprep.mubr.bf16.mxu0 %v10397_v6  ;;  %v10421_v28 = vpack.c.bf16 %v2555_v50, %v2549_v52  ;;  %v2552_v6 = vld [vmem:[#allocation2 + $0x520] sm:$0xff]  ;;  %v8787_v52 = vld [vmem:[#allocation8 + $0x21c] ss:$24 sps:$4 sm:$0xff]  }
 0x3ac   : > { %4994 = vmatpush1.bf16.msra.mxu1 %v8758_v59  ;;  %v10415_v59 = vpack.c.bf16 %v2540_v41, %v2534_v55  ;;  %11139 = vst [vmem:[#allocation66_spill] sm:$0xff] %v10421_v28  ;;  %v8781_v41 = vld [vmem:[#allocation8 + $0x1ec] ss:$24 sps:$4 sm:$0xff]  }
 0x3ad   : > { %4995 = vmatprep.subr.bf16.mxu1 %v8763_v1  ;;  %v10417_v1 = vpack.c.bf16 %v2542_v0, %v2536_v21  ;;  %v2559_v0 = vld [vmem:[#allocation2 + $0x558] sm:$0xff]  ;;  %v2565_v55 = vld [vmem:[#allocation2 + $0x588] sm:$0xff] }
 0x3ae   : > { %v2561_v21 = vld [vmem:[#allocation2 + $0x568] sm:$0xff]  ;;  %v10431_v12 = vpack.c.bf16 %v2565_v55, %v2559_v0  ;;  %v2579_v55 = vld [vmem:[#allocation2 + $0x5f8] sm:$0xff] }
 0x3af   : > { %4740 = vmatmul.mubr.bf16.gmra.mrb[44].mxu1 %v10403_v63  ;;  %11138 = vst [vmem:[#allocation65_spill] sm:$0xff] %v10417_v1  ;;  %v2554_v63 = vld [vmem:[#allocation2 + $0x530] sm:$0xff]  ;;  %v2573_v0 = vld [vmem:[#allocation2 + $0x5c8] sm:$0xff] }
 0x3b0   : > { %4933 = vmatmul.mubr.bf16.gmra.mrb[44].mxu0 %v10405_v20  ;;  %4996 = vmatpush1.bf16.msra.mxu1 %v8761_v37  ;;  %v8776_v37 = vld [vmem:[#allocation8 + $0x1b8] ss:$24 sps:$4 sm:$0xff]   ;;  %11142 = vst [vmem:[#allocation69_spill] sm:$0xff] %v10431_v12 }
 0x3b1   : > { %4749 = vmatprep.mubr.bf16.mxu1 %v10407_v9  ;;  %4997 = vmatprep.subr.bf16.mxu1 %v8769_v62  ;;  %v2546_v20 = vld [vmem:[#allocation2 + $0x4f0] sm:$0xff]  ;;  %v2548_v9 = vld [vmem:[#allocation2 + $0x500] sm:$0xff]  ;;  %v2567_v62 = vld [vmem:[#allocation2 + $0x598] sm:$0xff] }
 0x3b2   : > { %4942 = vmatprep.mubr.bf16.mxu0 %v10409_v61  ;;  %v10433_v50 = vpack.c.bf16 %v2567_v62, %v2561_v21 }
 0x3b4   : > { %4998 = vmatpush1.bf16.msra.mxu1 %v8767_v49  ;;  %v10427_v49 = vpack.c.bf16 %v2552_v6, %v2546_v20  ;;  %11143 = vst [vmem:[#allocation70_spill] sm:$0xff] %v10433_v50  ;;  %v2564_v6 = vld [vmem:[#allocation2 + $0x580] sm:$0xff]  ;;  %v2566_v20 = vld [vmem:[#allocation2 + $0x590] sm:$0xff] }
 0x3b5   : > { %4999 = vmatprep.subr.bf16.mxu1 %v8772_v60  ;;  %v10429_v60 = vpack.c.bf16 %v2554_v63, %v2548_v9  ;;  %v2560_v63 = vld [vmem:[#allocation2 + $0x560] sm:$0xff] }
 0x3b6   : > { %11140 = vst [vmem:[#allocation67_spill] sm:$0xff] %v10427_v49  ;;  %v8790_v9 = vld [vmem:[#allocation8 + $0x24c] ss:$24 sps:$4 sm:$0xff]   ;;  %v10441_v62 = vpack.c.bf16 %v2566_v20, %v2560_v63  ;;  %v2578_v63 = vld [vmem:[#allocation2 + $0x5f0] sm:$0xff] }
 0x3b7   : > { %4750 = vmatmul.mubr.bf16.gmra.mrb[48].mxu1 %v10415_v59  ;;  %11141 = vst [vmem:[#allocation68_spill] sm:$0xff] %v10429_v60 }
 0x3b8   : > { %4943 = vmatmul.mubr.bf16.gmra.mrb[48].mxu0 %v10417_v1  ;;  %5000 = vmatpush1.bf16.msra.mxu1 %v8770_v23  ;;  %v8785_v23 = vld [vmem:[#allocation8 + $0x218] ss:$24 sps:$4 sm:$0xff]   ;;  %11145 = vst [vmem:[#allocation72_spill] sm:$0xff] %v10441_v62  ;;  %v10445_v1 = vpack.c.bf16 %v2579_v55, %v2573_v0  ;;  %v8814_v55 = vld [vmem:[#allocation8 + $0x33c] ss:$24 sps:$4 sm:$0xff]  }
 0x3b9   : > { %4759 = vmatprep.mubr.bf16.mxu1 %v10419_v35  ;;  %5001 = vmatprep.subr.bf16.mxu1 %v8778_v32  ;;  %v2558_v32 = vld [vmem:[#allocation2 + $0x550] sm:$0xff] }
 0x3ba   : > { %4952 = vmatprep.mubr.bf16.mxu0 %v10421_v28  ;;  %v10439_v21 = vpack.c.bf16 %v2564_v6, %v2558_v32  ;;  %v8796_v28 = vld [vmem:[#allocation8 + $0x27c] ss:$24 sps:$4 sm:$0xff]   ;;  %11147 = vst [vmem:[#allocation74_spill] sm:$0xff] %v10445_v1  ;;  %v2576_v32 = vld [vmem:[#allocation2 + $0x5e0] sm:$0xff]  ;;  %v8809_v0 = vld [vmem:[#allocation8 + $0x310] ss:$24 sps:$4 sm:$0xff]  }
 0x3bb   : > { %v2572_v6 = vld [vmem:[#allocation2 + $0x5c0] sm:$0xff] }
 0x3bc   : > { %5002 = vmatpush1.bf16.msra.mxu1 %v8776_v37  ;;  %v2571_v37 = vld [vmem:[#allocation2 + $0x5b8] sm:$0xff]  ;;  %11144 = vst [vmem:[#allocation71_spill] sm:$0xff] %v10439_v21 }
 0x3bd   : > { %5003 = vmatprep.subr.bf16.mxu1 %v8781_v41  ;;  %v2577_v41 = vld [vmem:[#allocation2 + $0x5e8] sm:$0xff] }
 0x3bf   : > { %4760 = vmatmul.mubr.bf16.gmra.mrb[52].mxu1 %v10427_v49 }
 0x3c0   : > { %4953 = vmatmul.mubr.bf16.gmra.mrb[52].mxu0 %v10429_v60  ;;  %5004 = vmatpush1.bf16.msra.mxu1 %v8779_v58  ;;  %v8788_v60 = vld [vmem:[#allocation8 + $0x248] ss:$24 sps:$4 sm:$0xff]   ;;  %v10443_v58 = vpack.c.bf16 %v2577_v41, %v2571_v37  ;;  %v8805_v41 = vld [vmem:[#allocation8 + $0x2dc] ss:$24 sps:$4 sm:$0xff]  }
 0x3c1   : > { %4769 = vmatprep.mubr.bf16.mxu1 %v10431_v12  ;;  %5005 = vmatprep.subr.bf16.mxu1 %v8787_v52  ;;  %v8794_v52 = vld [vmem:[#allocation8 + $0x278] ss:$24 sps:$4 sm:$0xff]   ;;  %v8797_v37 = vld [vmem:[#allocation8 + $0x2a8] ss:$24 sps:$4 sm:$0xff]  }
 0x3c2   : > { %4962 = vmatprep.mubr.bf16.mxu0 %v10433_v50  ;;  %11146 = vst [vmem:[#allocation73_spill] sm:$0xff] %v10443_v58  ;;  %v2570_v50 = vld [vmem:[#allocation2 + $0x5b0] sm:$0xff] }
 0x3c3   : > { %v10451_v20 = vpack.c.bf16 %v2576_v32, %v2570_v50  ;;  %v8806_v50 = vld [vmem:[#allocation8 + $0x308] ss:$24 sps:$4 sm:$0xff]   ;;  %v8812_v32 = vld [vmem:[#allocation8 + $0x338] ss:$24 sps:$4 sm:$0xff]  }
 0x3c4   : > { %5006 = vmatpush1.bf16.msra.mxu1 %v8785_v23  ;;  %v8799_v23 = vld [vmem:[#allocation8 + $0x2ac] ss:$24 sps:$4 sm:$0xff]  }
 0x3c5   : > { %5007 = vmatprep.subr.bf16.mxu1 %v8790_v9  ;;  %11148 = vst [vmem:[#allocation75_spill] sm:$0xff] %v10451_v20  ;;  %v10453_v9 = vpack.c.bf16 %v2578_v63, %v2572_v6  ;;  %v8815_v6 = vld [vmem:[#allocation8 + $0x340] ss:$24 sps:$4 sm:$0xff]   ;;  %v8823_v63 = vld [vmem:[#allocation8 + $0x374] ss:$24 sps:$4 sm:$0xff]  }
 0x3c7   : > { %4770 = vmatmul.mubr.bf16.gmra.mrb[56].mxu1 %v10439_v21  ;;  %11149 = vst [vmem:[#allocation76_spill] sm:$0xff] %v10453_v9 }
 0x3c8   : > { %4963 = vmatmul.mubr.bf16.gmra.mrb[56].mxu0 %v10441_v62  ;;  %5008 = vmatpush1.bf16.msra.mxu1 %v8788_v60  ;;  %v8803_v60 = vld [vmem:[#allocation8 + $0x2d8] ss:$24 sps:$4 sm:$0xff]  }
 0x3c9   : > { %4779 = vmatprep.mubr.bf16.mxu1 %v10443_v58  ;;  %5009 = vmatprep.subr.bf16.mxu1 %v8796_v28  ;;  %v8808_v28 = vld [vmem:[#allocation8 + $0x30c] ss:$24 sps:$4 sm:$0xff]  }
 0x3ca   : > { %4972 = vmatprep.mubr.bf16.mxu0 %v10445_v1 }
 0x3cc   : > { %5010 = vmatpush1.bf16.msra.mxu1 %v8794_v52  ;;  %v8817_v52 = vld [vmem:[#allocation8 + $0x344] ss:$24 sps:$4 sm:$0xff]  }
 0x3cd   : > { %5011 = vmatprep.subr.bf16.mxu1 %v8799_v23  ;;  %v8818_v23 = vld [vmem:[#allocation8 + $0x368] ss:$24 sps:$4 sm:$0xff]  }
 0x3cf   : > { %4780 = vmatmul.mubr.bf16.gmra.mrb[60].mxu1 %v10451_v20 }
 0x3d0   : > { %4973 = vmatmul.mubr.bf16.gmra.mrb[60].mxu0 %v10453_v9  ;;  %5012 = vmatpush1.bf16.msra.mxu1 %v8797_v37  ;;  %v8821_v37 = vld [vmem:[#allocation8 + $0x370] ss:$24 sps:$4 sm:$0xff]  }
 0x3d1   : > { %5015 = vmatprep.mubr.bf16.mxu1 %v10111_v2  ;;  %5013 = vmatprep.subr.bf16.mxu1 %v8805_v41  ;;  %v8826_v41 = vld [vmem:[#allocation8 + $0x39c] ss:$24 sps:$4 sm:$0xff]  }
 0x3d2   : > { %5594 = vmatprep.mubr.bf16.mxu0 %v10111_v2  ;;  %v8820_v2 = vld [vmem:[#allocation8 + $0x36c] ss:$24 sps:$4 sm:$0xff]  }
 0x3d4   : > { %5014 = vmatpush1.bf16.msra.mxu1 %v8803_v60  ;;  %v8827_v60 = vld [vmem:[#allocation8 + $0x3a0] ss:$24 sps:$4 sm:$0xff]  }
 0x3d5   : > { %5176 = vmatprep.subr.bf16.mxu1 %v8808_v28  ;;  %v8832_v28 = vld [vmem:[#allocation8 + $0x3cc] ss:$24 sps:$4 sm:$0xff]  }
 0x3d7   : > { %5016 = vmatmul.mubr.bf16.vlgmr.msra.gmra.mrb[64].mxu1 %v10142_v29 }
 0x3d8   : > { %5595 = vmatmul.mubr.bf16.vlgmr.msra.gmra.mrb[64].mxu0 %v10142_v29  ;;  %5177 = vmatpush1.bf16.msra.mxu1 %v8806_v50  ;;  %v8829_v29 = vld [vmem:[#allocation8 + $0x3a4] ss:$24 sps:$4 sm:$0xff]   ;;  %v8835_v50 = vld [vmem:[#allocation8 + $0x3d4] ss:$24 sps:$4 sm:$0xff]  }
 0x3d9   : > { %5756 = vmatpush1.bf16.msra.mxu0 %v8809_v0  ;;  %5025 = vmatprep.mubr.bf16.mxu1 %v10148_v45  ;;  %v8830_v0 = vld [vmem:[#allocation8 + $0x3c8] ss:$24 sps:$4 sm:$0xff]  }
 0x3da   : > { %5604 = vmatprep.mubr.bf16.mxu0 %v10148_v45  ;;  %5178 = vmatprep.subr.bf16.mxu1 %v8814_v55  ;;  %v8824_v45 = vld [vmem:[#allocation8 + $0x398] ss:$24 sps:$4 sm:$0xff]  }
 0x3db   : > { %5757 = vmatprep.subr.bf16.mxu0 %v8817_v52  ;;  %v8833_v55 = vld [vmem:[#allocation8 + $0x3d0] ss:$24 sps:$4 sm:$0xff]   ;;  %v8838_v52 = vld [vmem:[#allocation8 + $0x3fc] ss:$24 sps:$4 sm:$0xff]  }
 0x3dc   : > { %5179 = vmatpush1.bf16.msra.mxu1 %v8812_v32  ;;  %v8839_v32 = vld [vmem:[#allocation8 + $0x400] ss:$24 sps:$4 sm:$0xff]  }
 0x3dd   : > { %5758 = vmatpush1.bf16.msra.mxu0 %v8815_v6  ;;  %5180 = vmatprep.subr.bf16.mxu1 %v8820_v2  ;;  %v8844_v2 = vld [vmem:[#allocation8 + $0x42c] ss:$24 sps:$4 sm:$0xff]  }
 0x3de   : > { %5759 = vmatprep.subr.bf16.mxu0 %v8823_v63  ;;  %v8847_v63 = vld [vmem:[#allocation8 + $0x434] ss:$24 sps:$4 sm:$0xff]  }
 0x3df   : > { %5026 = vmatmul.mubr.bf16.gmra.mrb[68].mxu1 %v10158_v11 }
 0x3e0   : > { %5605 = vmatmul.mubr.bf16.gmra.mrb[68].mxu0 %v10158_v11  ;;  %5035 = vmatprep.mubr.bf16.mxu1 %v10163_v19  ;;  %v8841_v11 = vld [vmem:[#allocation8 + $0x404] ss:$24 sps:$4 sm:$0xff]  }
 0x3e1   : > { %5614 = vmatprep.mubr.bf16.mxu0 %v10163_v19  ;;  %5181 = vmatpush1.bf16.msra.mxu1 %v8818_v23  ;;  %v8836_v19 = vld [vmem:[#allocation8 + $0x3f8] ss:$24 sps:$4 sm:$0xff]  }
 0x3e2   : > { %5760 = vmatpush1.bf16.msra.mxu0 %v8821_v37  ;;  %5182 = vmatprep.subr.bf16.mxu1 %v8826_v41 }
 0x3e3   : > { %5761 = vmatprep.subr.bf16.mxu0 %v8829_v29  ;;  %v8850_v29 = vld [vmem:[#allocation8 + $0x45c] ss:$24 sps:$4 sm:$0xff]  }
 0x3e5   : > { %5183 = vmatpush1.bf16.msra.mxu1 %v8824_v45  ;;  %v8853_v45 = vld [vmem:[#allocation8 + $0x464] ss:$24 sps:$4 sm:$0xff]  }
 0x3e6   : > { %5762 = vmatpush1.bf16.msra.mxu0 %v8827_v60  ;;  %5184 = vmatprep.subr.bf16.mxu1 %v8832_v28  ;;  %v8848_v60 = vld [vmem:[#allocation8 + $0x458] ss:$24 sps:$4 sm:$0xff]  }
 0x3e7   : > { %5763 = vmatprep.subr.bf16.mxu0 %v8835_v50  ;;  %5036 = vmatmul.mubr.bf16.gmra.mrb[72].mxu1 %v10173_v27  ;;  %v8851_v28 = vld [vmem:[#allocation8 + $0x460] ss:$24 sps:$4 sm:$0xff]  }
 0x3e8   : > { %5615 = vmatmul.mubr.bf16.gmra.mrb[72].mxu0 %v10173_v27  ;;  %5045 = vmatprep.mubr.bf16.mxu1 %v10178_v39  ;;  %v8842_v27 = vld [vmem:[#allocation8 + $0x428] ss:$24 sps:$4 sm:$0xff]  }
 0x3e9   : > { %5624 = vmatprep.mubr.bf16.mxu0 %v10178_v39  ;;  %5185 = vmatpush1.bf16.msra.mxu1 %v8830_v0  ;;  %v8845_v39 = vld [vmem:[#allocation8 + $0x430] ss:$24 sps:$4 sm:$0xff]   ;;  %v8856_v0 = vld [vmem:[#allocation8 + $0x48c] ss:$24 sps:$4 sm:$0xff]  }
 0x3ea   : > { %5764 = vmatpush1.bf16.msra.mxu0 %v8833_v55  ;;  %v10471_v6 = vpop.f32.mrb[0].mxu1  ;;  %5186 = vmatprep.subr.bf16.mxu1 %v8838_v52  ;;  %v8859_v55 = vld [vmem:[#allocation8 + $0x494] ss:$24 sps:$4 sm:$0xff]  }
 0x3eb   : > { %5765 = vmatprep.subr.bf16.mxu0 %v8841_v11  ;;  %v10473_v23 = vpop.f32.mrb[1].mxu1 }
 0x3ec   : > { %v10475_v37 = vpop.f32.mrb[2].mxu1 }
 0x3ed   : > { %v10477_v41 = vpop.f32.mrb[3].mxu1  ;;  %5187 = vmatpush1.bf16.msra.mxu1 %v8836_v19 }
 0x3ee   : > { %5766 = vmatpush1.bf16.msra.mxu0 %v8839_v32  ;;  %5188 = vmatprep.subr.bf16.mxu1 %v8844_v2  ;;  %v8862_v32 = vld [vmem:[#allocation8 + $0x4bc] ss:$24 sps:$4 sm:$0xff]  }
 0x3ef   : > { %5767 = vmatprep.subr.bf16.mxu0 %v8847_v63  ;;  %5046 = vmatmul.mubr.bf16.gmra.mrb[76].mxu1 %v10188_v10  ;;  %v8865_v2 = vld [vmem:[#allocation8 + $0x4c4] ss:$24 sps:$4 sm:$0xff]   ;;  %v8860_v63 = vld [vmem:[#allocation8 + $0x4b8] ss:$24 sps:$4 sm:$0xff]  }
 0x3f0   : > { %5625 = vmatmul.mubr.bf16.gmra.mrb[76].mxu0 %v10188_v10  ;;  %5055 = vmatprep.mubr.bf16.mxu1 %v10193_v14  ;;  %v8854_v10 = vld [vmem:[#allocation8 + $0x488] ss:$24 sps:$4 sm:$0xff]  }
 0x3f1   : > { %5634 = vmatprep.mubr.bf16.mxu0 %v10193_v14  ;;  %5189 = vmatpush1.bf16.msra.mxu1 %v8842_v27  ;;  %v8857_v14 = vld [vmem:[#allocation8 + $0x490] ss:$24 sps:$4 sm:$0xff]   ;;  %v8863_v27 = vld [vmem:[#allocation8 + $0x4c0] ss:$24 sps:$4 sm:$0xff]  }
 0x3f2   : > { %5768 = vmatpush1.bf16.msra.mxu0 %v8845_v39  ;;  %v10483_v50 = vpop.f32.mrb[4].mxu1  ;;  %5190 = vmatprep.subr.bf16.mxu1 %v8850_v29  ;;  %v8868_v29 = vld [vmem:[#allocation8 + $0x4ec] ss:$24 sps:$4 sm:$0xff]  }
 0x3f3   : > { %5769 = vmatprep.subr.bf16.mxu0 %v8853_v45  ;;  %v10485_v52 = vpop.f32.mrb[5].mxu1  ;;  %v8871_v45 = vld [vmem:[#allocation8 + $0x4f4] ss:$24 sps:$4 sm:$0xff]  }
 0x3f4   : > { %v10487_v11 = vpop.f32.mrb[6].mxu1 }
 0x3f5   : > { %v10489_v19 = vpop.f32.mrb[7].mxu1  ;;  %5191 = vmatpush1.bf16.msra.mxu1 %v8848_v60 }
 0x3f6   : > { %5770 = vmatpush1.bf16.msra.mxu0 %v8851_v28  ;;  %5192 = vmatprep.subr.bf16.mxu1 %v8856_v0 }
 0x3f7   : > { %5771 = vmatprep.subr.bf16.mxu0 %v8859_v55  ;;  %5056 = vmatmul.mubr.bf16.gmra.mrb[80].mxu1 %v10203_v25  ;;  %v8874_v55 = vld [vmem:[#allocation8 + $0x51c] ss:$24 sps:$4 sm:$0xff]  }
 0x3f8   : > { %5635 = vmatmul.mubr.bf16.gmra.mrb[80].mxu0 %v10203_v25  ;;  %5065 = vmatprep.mubr.bf16.mxu1 %v10208_v53  ;;  %v8866_v25 = vld [vmem:[#allocation8 + $0x4e8] ss:$24 sps:$4 sm:$0xff]  }
 0x3f9   : > { %5644 = vmatprep.mubr.bf16.mxu0 %v10208_v53  ;;  %5193 = vmatpush1.bf16.msra.mxu1 %v8854_v10  ;;  %v8869_v53 = vld [vmem:[#allocation8 + $0x4f0] ss:$24 sps:$4 sm:$0xff]   ;;  %v8877_v10 = vld [vmem:[#allocation8 + $0x524] ss:$24 sps:$4 sm:$0xff]  }
 0x3fa   : > { %5772 = vmatpush1.bf16.msra.mxu0 %v8857_v14  ;;  %v10495_v39 = vpop.f32.mrb[8].mxu1  ;;  %5194 = vmatprep.subr.bf16.mxu1 %v8862_v32  ;;  %v8872_v14 = vld [vmem:[#allocation8 + $0x518] ss:$24 sps:$4 sm:$0xff]  }
 0x3fb   : > { %5773 = vmatprep.subr.bf16.mxu0 %v8865_v2  ;;  %v10497_v60 = vpop.f32.mrb[9].mxu1  ;;  %v8875_v32 = vld [vmem:[#allocation8 + $0x520] ss:$24 sps:$4 sm:$0xff]  }
 0x3fc   : > { %v10499_v28 = vpop.f32.mrb[10].mxu1 }
 0x3fd   : > { %v10501_v0 = vpop.f32.mrb[11].mxu1  ;;  %5195 = vmatpush1.bf16.msra.mxu1 %v8860_v63  ;;  %v8880_v63 = vld [vmem:[#allocation8 + $0x54c] ss:$24 sps:$4 sm:$0xff]  }
 0x3fe   : > { %5774 = vmatpush1.bf16.msra.mxu0 %v8863_v27  ;;  %5196 = vmatprep.subr.bf16.mxu1 %v8868_v29  ;;  %v8883_v27 = vld [vmem:[#allocation8 + $0x554] ss:$24 sps:$4 sm:$0xff]  }
 0x3ff   : > { %5775 = vmatprep.subr.bf16.mxu0 %v8871_v45  ;;  %5066 = vmatmul.mubr.bf16.gmra.mrb[84].mxu1 %v10218_v30 }
 0x400   : > { %5645 = vmatmul.mubr.bf16.gmra.mrb[84].mxu0 %v10218_v30  ;;  %5075 = vmatprep.mubr.bf16.mxu1 %v10223_v18  ;;  %v8878_v30 = vld [vmem:[#allocation8 + $0x548] ss:$24 sps:$4 sm:$0xff]  }
 0x401   : > { %5654 = vmatprep.mubr.bf16.mxu0 %v10223_v18  ;;  %5197 = vmatpush1.bf16.msra.mxu1 %v8866_v25  ;;  %v8881_v18 = vld [vmem:[#allocation8 + $0x550] ss:$24 sps:$4 sm:$0xff]   ;;  %v8886_v25 = vld [vmem:[#allocation8 + $0x57c] ss:$24 sps:$4 sm:$0xff]  }
 0x402   : > { %5776 = vmatpush1.bf16.msra.mxu0 %v8869_v53  ;;  %v10507_v2 = vpop.f32.mrb[12].mxu1  ;;  %5198 = vmatprep.subr.bf16.mxu1 %v8874_v55  ;;  %v8889_v53 = vld [vmem:[#allocation8 + $0x584] ss:$24 sps:$4 sm:$0xff]   ;;  %v8884_v55 = vld [vmem:[#allocation8 + $0x578] ss:$24 sps:$4 sm:$0xff]  }
 0x403   : > { %5777 = vmatprep.subr.bf16.mxu0 %v8877_v10  ;;  %v10509_v29 = vpop.f32.mrb[13].mxu1  ;;  %v8887_v10 = vld [vmem:[#allocation8 + $0x580] ss:$24 sps:$4 sm:$0xff]  }
 0x404   : > { %v10511_v45 = vpop.f32.mrb[14].mxu1 }
 0x405   : > { %v10513_v9 = vpop.f32.mrb[15].mxu1  ;;  %5199 = vmatpush1.bf16.msra.mxu1 %v8872_v14 }
 0x406   : > { %5778 = vmatpush1.bf16.msra.mxu0 %v8875_v32  ;;  %5200 = vmatprep.subr.bf16.mxu1 %v8880_v63  ;;  %v8892_v32 = vld [vmem:[#allocation8 + $0x5ac] ss:$24 sps:$4 sm:$0xff]  }
 0x407   : > { %5779 = vmatprep.subr.bf16.mxu0 %v8883_v27  ;;  %5076 = vmatmul.mubr.bf16.gmra.mrb[88].mxu1 %v10233_v57  ;;  %v8895_v63 = vld [vmem:[#allocation8 + $0x5b4] ss:$24 sps:$4 sm:$0xff]  }
 0x408   : > { %5655 = vmatmul.mubr.bf16.gmra.mrb[88].mxu0 %v10233_v57  ;;  %5085 = vmatprep.mubr.bf16.mxu1 %v10238_v4  ;;  %v8890_v57 = vld [vmem:[#allocation8 + $0x5a8] ss:$24 sps:$4 sm:$0xff]  }
 0x409   : > { %5664 = vmatprep.mubr.bf16.mxu0 %v10238_v4  ;;  %5201 = vmatpush1.bf16.msra.mxu1 %v8878_v30  ;;  %v8893_v4 = vld [vmem:[#allocation8 + $0x5b0] ss:$24 sps:$4 sm:$0xff]   ;;  %v8898_v30 = vld [vmem:[#allocation8 + $0x5dc] ss:$24 sps:$4 sm:$0xff]  }
 0x40a   : > { %5780 = vmatpush1.bf16.msra.mxu0 %v8881_v18  ;;  %v10519_v14 = vpop.f32.mrb[16].mxu1  ;;  %5202 = vmatprep.subr.bf16.mxu1 %v8886_v25  ;;  %v8901_v18 = vld [vmem:[#allocation8 + $0x5e4] ss:$24 sps:$4 sm:$0xff]   ;;  %v8896_v25 = vld [vmem:[#allocation8 + $0x5d8] ss:$24 sps:$4 sm:$0xff]  }
 0x40b   : > { %5781 = vmatprep.subr.bf16.mxu0 %v8889_v53  ;;  %v10521_v27 = vpop.f32.mrb[17].mxu1  ;;  %v8899_v53 = vld [vmem:[#allocation8 + $0x5e0] ss:$24 sps:$4 sm:$0xff]  }
 0x40c   : > { %v10523_v1 = vpop.f32.mrb[18].mxu1 }
 0x40d   : > { %v10525_v62 = vpop.f32.mrb[19].mxu1  ;;  %5203 = vmatpush1.bf16.msra.mxu1 %v8884_v55 }
 0x40e   : > { %5782 = vmatpush1.bf16.msra.mxu0 %v8887_v10  ;;  %5204 = vmatprep.subr.bf16.mxu1 %v8892_v32  ;;  %v8904_v10 = vld [vmem:[#allocation8 + $0x60c] ss:$24 sps:$4 sm:$0xff]  }
 0x40f   : > { %5783 = vmatprep.subr.bf16.mxu0 %v8895_v63  ;;  %5086 = vmatmul.mubr.bf16.gmra.mrb[92].mxu1 %v10248_v46  ;;  %v8907_v32 = vld [vmem:[#allocation8 + $0x614] ss:$24 sps:$4 sm:$0xff]  }
 0x410   : > { %5665 = vmatmul.mubr.bf16.gmra.mrb[92].mxu0 %v10248_v46  ;;  %5095 = vmatprep.mubr.bf16.mxu1 %v10253_v17 }
 0x411   : > { %5674 = vmatprep.mubr.bf16.mxu0 %v10253_v17  ;;  %5205 = vmatpush1.bf16.msra.mxu1 %v8890_v57 }
 0x412   : > { %5784 = vmatpush1.bf16.msra.mxu0 %v8893_v4  ;;  %v10531_v55 = vpop.f32.mrb[20].mxu1  ;;  %5206 = vmatprep.subr.bf16.mxu1 %v8898_v30 }
 0x413   : > { %5785 = vmatprep.subr.bf16.mxu0 %v8901_v18  ;;  %v10533_v63 = vpop.f32.mrb[21].mxu1 }
 0x414   : > { %v10535_v61 = vpop.f32.mrb[22].mxu1 }
 0x415   : > { %v10537_v20 = vpop.f32.mrb[23].mxu1  ;;  %5207 = vmatpush1.bf16.msra.mxu1 %v8896_v25 }
 0x416   : > { %5786 = vmatpush1.bf16.msra.mxu0 %v8899_v53  ;;  %5369 = vmatprep.subr.bf16.mxu1 %v8904_v10 }
 0x417   : > { %5948 = vmatprep.subr.bf16.mxu0 %v8907_v32  ;;  %5096 = vmatmul.mubr.bf16.gmra.mrb[96].mxu1 %v10263_v40 }
 0x418   : > { %5675 = vmatmul.mubr.bf16.gmra.mrb[96].mxu0 %v10263_v40  ;;  %5105 = vmatprep.mubr.bf16.mxu1 %v10268_v42 }
 0x419   : > { %5684 = vmatprep.mubr.bf16.mxu0 %v10268_v42 }
 0x41a   : > { %v10543_v46 = vpop.f32.mrb[24].mxu1 }
 0x41b   : > { %v10545_v17 = vpop.f32.mrb[25].mxu1 }
 0x41c   : > { %v10547_v57 = vpop.f32.mrb[26].mxu1 }
 0x41d   : > { %v10549_v4 = vpop.f32.mrb[27].mxu1 }
 0x41f   : > { %5106 = vmatmul.mubr.bf16.gmra.mrb[100].mxu1 %v10278_v8 }
 0x420   : > { %5685 = vmatmul.mubr.bf16.gmra.mrb[100].mxu0 %v10278_v8  ;;  %5115 = vmatprep.mubr.bf16.mxu1 %v10283_v56 }
 0x421   : > { %5694 = vmatprep.mubr.bf16.mxu0 %v10283_v56 }
 0x422   : > { %v10555_v40 = vpop.f32.mrb[28].mxu1 }
 0x423   : > { %v10557_v30 = vpop.f32.mrb[29].mxu1 }
 0x424   : > { %v10559_v42 = vpop.f32.mrb[30].mxu1 }
 0x425   : > { %v10561_v18 = vpop.f32.mrb[31].mxu1 }
 0x427   : > { %5116 = vmatmul.mubr.bf16.gmra.mrb[104].mxu1 %v10294_v24 }
 0x428   : > { %5695 = vmatmul.mubr.bf16.gmra.mrb[104].mxu0 %v10294_v24  ;;  %5125 = vmatprep.mubr.bf16.mxu1 %v10298_v34 }
 0x429   : > { %5704 = vmatprep.mubr.bf16.mxu0 %v10298_v34 }
 0x42b   : > { %v4824_v8 = vpop.f32.mrb[0].mxu0 }
 0x42c   : > { %v7835_v25 = vadd.f32 %v4824_v8, %v10471_v6  ;;  %v4826_v56 = vpop.f32.mrb[1].mxu0 }
 0x42d   : > { %v7836_v53 = vadd.f32 %v4826_v56, %v10473_v23  ;;  %v4828_v10 = vpop.f32.mrb[2].mxu0 }
 0x42e   : > { %v6141_v32 = vmax.f32 %v7835_v25, 0.0  ;;  %v7837_v58 = vadd.f32 %v4828_v10, %v10475_v37  ;;  %v4830_v21 = vpop.f32.mrb[3].mxu0 }
 0x42f   : > { %v6142_v12 = vmax.f32 %v7836_v53, 0.0  ;;  %v7838_v24 = vadd.f32 %v4830_v21, %v10477_v41  ;;  %5126 = vmatmul.mubr.bf16.gmra.mrb[108].mxu1 %v10307_v38 }
 0x430   : > { %v6147_v49 = vmax.f32 %v7837_v58, 0.0  ;;  %5705 = vmatmul.mubr.bf16.gmra.mrb[108].mxu0 %v10307_v38  ;;  %5135 = vmatprep.mubr.bf16.mxu1 %v10311_v3 }
 0x431   : > { %v7675_v34 = vpack.c.bf16 %v6142_v12, %v6141_v32  ;;  %v6148_v6 = vmax.f32 %v7838_v24, 0.0  ;;  %5714 = vmatprep.mubr.bf16.mxu0 %v10311_v3 }
 0x433   : > { %6909 = vst [vmem:[%s9567_s28] sm:$0xff] %v7675_v34  ;;  %v7678_v23 = vpack.c.bf16 %v6148_v6, %v6147_v49  ;;  %v4834_v8 = vpop.f32.mrb[4].mxu0 }
 0x434   : > { %v7839_v37 = vadd.f32 %v4834_v8, %v10483_v50  ;;  %v4836_v25 = vpop.f32.mrb[5].mxu0 }
 0x435   : > { %6912 = vst [vmem:[%s9567_s28 + $0x18] sm:$0xff] %v7678_v23  ;;  %v7840_v21 = vadd.f32 %v4836_v25, %v10485_v52  ;;  %v4838_v58 = vpop.f32.mrb[6].mxu0 }
 0x436   : > { %v6153_v41 = vmax.f32 %v7839_v37, 0.0  ;;  %v7841_v38 = vadd.f32 %v4838_v58, %v10487_v11  ;;  %v4840_v12 = vpop.f32.mrb[7].mxu0 }
 0x437   : > { %v6154_v56 = vmax.f32 %v7840_v21, 0.0  ;;  %v7842_v53 = vadd.f32 %v4840_v12, %v10489_v19  ;;  %5136 = vmatmul.mubr.bf16.gmra.mrb[112].mxu1 %v10319_v26 }
 0x438   : > { %v6159_v3 = vmax.f32 %v7841_v38, 0.0  ;;  %5715 = vmatmul.mubr.bf16.gmra.mrb[112].mxu0 %v10319_v26  ;;  %5145 = vmatprep.mubr.bf16.mxu1 %v10323_v16 }
 0x439   : > { %v7681_v49 = vpack.c.bf16 %v6154_v56, %v6153_v41  ;;  %v6160_v50 = vmax.f32 %v7842_v53, 0.0  ;;  %5724 = vmatprep.mubr.bf16.mxu0 %v10323_v16 }
 0x43b   : > { %6915 = vst [vmem:[%s9567_s28 + $0x30] sm:$0xff] %v7681_v49  ;;  %v7684_v52 = vpack.c.bf16 %v6160_v50, %v6159_v3  ;;  %v4844_v10 = vpop.f32.mrb[8].mxu0 }
 0x43c   : > { %v7843_v11 = vadd.f32 %v4844_v10, %v10495_v39  ;;  %v4846_v32 = vpop.f32.mrb[9].mxu0 }
 0x43d   : > { %6918 = vst [vmem:[%s9567_s28 + $0x48] sm:$0xff] %v7684_v52  ;;  %v7844_v19 = vadd.f32 %v4846_v32, %v10497_v60  ;;  %v4848_v24 = vpop.f32.mrb[10].mxu0 }
 0x43e   : > { %v6165_v34 = vmax.f32 %v7843_v11, 0.0  ;;  %v7845_v26 = vadd.f32 %v4848_v24, %v10499_v28  ;;  %v4850_v6 = vpop.f32.mrb[11].mxu0 }
 0x43f   : > { %v6166_v23 = vmax.f32 %v7844_v19, 0.0  ;;  %v7846_v8 = vadd.f32 %v4850_v6, %v10501_v0  ;;  %5146 = vmatmul.mubr.bf16.gmra.mrb[116].mxu1 %v10331_v36  ;;  %v8902_v6 = vld [vmem:[#allocation8 + $0x608] ss:$24 sps:$4 sm:$0xff]  }
 0x440   : > { %v6171_v16 = vmax.f32 %v7845_v26, 0.0  ;;  %5725 = vmatmul.mubr.bf16.gmra.mrb[116].mxu0 %v10331_v36  ;;  %5155 = vmatprep.mubr.bf16.mxu1 %v10335_v48 }
 0x441   : > { %v7687_v39 = vpack.c.bf16 %v6166_v23, %v6165_v34  ;;  %v6172_v37 = vmax.f32 %v7846_v8, 0.0  ;;  %5734 = vmatprep.mubr.bf16.mxu0 %v10335_v48  ;;  %v8905_v23 = vld [vmem:[#allocation8 + $0x610] ss:$24 sps:$4 sm:$0xff]  }
 0x443   : > { %6921 = vst [vmem:[%s9567_s28 + $0x60] sm:$0xff] %v7687_v39  ;;  %v7690_v60 = vpack.c.bf16 %v6172_v37, %v6171_v16  ;;  %v4854_v25 = vpop.f32.mrb[12].mxu0 }
 0x444   : > { %v7847_v28 = vadd.f32 %v4854_v25, %v10507_v2  ;;  %v4856_v21 = vpop.f32.mrb[13].mxu0 }
 0x445   : > { %6924 = vst [vmem:[%s9567_s28 + $0x78] sm:$0xff] %v7690_v60  ;;  %v7848_v0 = vadd.f32 %v4856_v21, %v10509_v29  ;;  %v4858_v58 = vpop.f32.mrb[14].mxu0  ;;  %v8913_v60 = vld [vmem:[#allocation8 + $0x644] ss:$24 sps:$4 sm:$0xff]   ;;  %v8911_v21 = vld [vmem:[#allocation8 + $0x640] ss:$24 sps:$4 sm:$0xff]  }
 0x446   : > { %v6177_v41 = vmax.f32 %v7847_v28, 0.0  ;;  %v7849_v36 = vadd.f32 %v4858_v58, %v10511_v45  ;;  %v4860_v38 = vpop.f32.mrb[15].mxu0  ;;  %v8908_v28 = vld [vmem:[#allocation8 + $0x638] ss:$24 sps:$4 sm:$0xff]  }
 0x447   : > { %v6178_v12 = vmax.f32 %v7848_v0, 0.0  ;;  %v7850_v56 = vadd.f32 %v4860_v38, %v10513_v9  ;;  %5156 = vmatmul.mubr.bf16.gmra.mrb[120].mxu1 %v10343_v22 }
 0x448   : > { %v6183_v48 = vmax.f32 %v7849_v36, 0.0  ;;  %5735 = vmatmul.mubr.bf16.gmra.mrb[120].mxu0 %v10343_v22  ;;  %5165 = vmatprep.mubr.bf16.mxu1 %v10347_v54 }
 0x449   : > { %v7693_v2 = vpack.c.bf16 %v6178_v12, %v6177_v41  ;;  %v6184_v53 = vmax.f32 %v7850_v56, 0.0  ;;  %5744 = vmatprep.mubr.bf16.mxu0 %v10347_v54 }
 0x44b   : > { %6927 = vst [vmem:[%s9567_s28 + $0x90] sm:$0xff] %v7693_v2  ;;  %v7696_v29 = vpack.c.bf16 %v6184_v53, %v6183_v48  ;;  %v4864_v3 = vpop.f32.mrb[16].mxu0  ;;  %v8914_v48 = vld [vmem:[#allocation8 + $0x668] ss:$24 sps:$4 sm:$0xff]  }
 0x44c   : > { %v7851_v45 = vadd.f32 %v4864_v3, %v10519_v14  ;;  %v4866_v49 = vpop.f32.mrb[17].mxu0  ;;  %v8917_v2 = vld [vmem:[#allocation8 + $0x670] ss:$24 sps:$4 sm:$0xff]   ;;  %v8925_v3 = vld [vmem:[#allocation8 + $0x6a4] ss:$24 sps:$4 sm:$0xff]  }
 0x44d   : > { %6930 = vst [vmem:[%s9567_s28 + $0xa8] sm:$0xff] %v7696_v29  ;;  %v7852_v9 = vadd.f32 %v4866_v49, %v10521_v27  ;;  %v4868_v50 = vpop.f32.mrb[18].mxu0 }
 0x44e   : > { %v6189_v52 = vmax.f32 %v7851_v45, 0.0  ;;  %v7853_v22 = vadd.f32 %v4868_v50, %v10523_v1  ;;  %v4870_v10 = vpop.f32.mrb[19].mxu0 }
 0x44f   : > { %v6190_v11 = vmax.f32 %v7852_v9, 0.0  ;;  %v7854_v32 = vadd.f32 %v4870_v10, %v10525_v62  ;;  %5166 = vmatmul.mubr.bf16.gmra.mrb[124].mxu1 %v10355_v15  ;;  %v8923_v9 = vld [vmem:[#allocation8 + $0x6a0] ss:$24 sps:$4 sm:$0xff]  }
 0x450   : > { %v6195_v54 = vmax.f32 %v7853_v22, 0.0  ;;  %5745 = vmatmul.mubr.bf16.gmra.mrb[124].mxu0 %v10355_v15  ;;  %5208 = vmatprep.mubr.bf16.mxu1 %v10113_v5  ;;  %v8931_v22 = vld [vmem:[#allocation8 + $0x6d4] ss:$24 sps:$4 sm:$0xff]  }
 0x451   : > { %v7699_v14 = vpack.c.bf16 %v6190_v11, %v6189_v52  ;;  %v6196_v19 = vmax.f32 %v7854_v32, 0.0  ;;  %5787 = vmatprep.mubr.bf16.mxu0 %v10113_v5  ;;  %v8910_v5 = vld [vmem:[#allocation8 + $0x63c] ss:$24 sps:$4 sm:$0xff]   ;;  %v8928_v52 = vld [vmem:[#allocation8 + $0x6cc] ss:$24 sps:$4 sm:$0xff]  }
 0x453   : > { %6933 = vst [vmem:[%s9567_s28 + $0xc0] sm:$0xff] %v7699_v14  ;;  %v7702_v27 = vpack.c.bf16 %v6196_v19, %v6195_v54  ;;  %v4874_v24 = vpop.f32.mrb[20].mxu0  ;;  %v8926_v19 = vld [vmem:[#allocation8 + $0x6c8] ss:$24 sps:$4 sm:$0xff]  }
 0x454   : > { %v7855_v1 = vadd.f32 %v4874_v24, %v10531_v55  ;;  %v4876_v34 = vpop.f32.mrb[21].mxu0 }
 0x455   : > { %6936 = vst [vmem:[%s9567_s28 + $0xd8] sm:$0xff] %v7702_v27  ;;  %v7856_v62 = vadd.f32 %v4876_v34, %v10533_v63  ;;  %v4878_v26 = vpop.f32.mrb[22].mxu0  ;;  %v8929_v27 = vld [vmem:[#allocation8 + $0x6d0] ss:$24 sps:$4 sm:$0xff]   ;;  %v8937_v34 = vld [vmem:[#allocation8 + $0x704] ss:$24 sps:$4 sm:$0xff]  }
 0x456   : > { %v6201_v8 = vmax.f32 %v7855_v1, 0.0  ;;  %v7857_v15 = vadd.f32 %v4878_v26, %v10535_v61  ;;  %v4880_v16 = vpop.f32.mrb[23].mxu0  ;;  %v8916_v61 = vld [vmem:[#allocation8 + $0x66c] ss:$24 sps:$4 sm:$0xff]   ;;  %v8935_v26 = vld [vmem:[#allocation8 + $0x700] ss:$24 sps:$4 sm:$0xff]  }
 0x457   : > { %v6202_v39 = vmax.f32 %v7856_v62, 0.0  ;;  %v7858_v37 = vadd.f32 %v4880_v16, %v10537_v20  ;;  %5209 = vmatmul.mubr.bf16.vlgmr.msra.gmra.mrb[64].mxu1 %v10144_v31  ;;  %v8919_v20 = vld [vmem:[#allocation8 + $0x674] ss:$24 sps:$4 sm:$0xff]  }
 0x458   : > { %v6207_v25 = vmax.f32 %v7857_v15, 0.0  ;;  %5788 = vmatmul.mubr.bf16.vlgmr.msra.gmra.mrb[64].mxu0 %v10144_v31  ;;  %5370 = vmatpush1.bf16.msra.mxu1 %v8902_v6  ;;  %v8940_v15 = vld [vmem:[#allocation8 + $0x72c] ss:$24 sps:$4 sm:$0xff]  }
 0x459   : > { %v7705_v55 = vpack.c.bf16 %v6202_v39, %v6201_v8  ;;  %v6208_v63 = vmax.f32 %v7858_v37, 0.0  ;;  %5949 = vmatpush1.bf16.msra.mxu0 %v8905_v23  ;;  %5218 = vmatprep.mubr.bf16.mxu1 %v10150_v51  ;;  %v8943_v16 = vld [vmem:[#allocation8 + $0x734] ss:$24 sps:$4 sm:$0xff]  }
 0x45a   : > { %5797 = vmatprep.mubr.bf16.mxu0 %v10150_v51  ;;  %5371 = vmatprep.subr.bf16.mxu1 %v8910_v5 }
 0x45b   : > { %6939 = vst [vmem:[%s9567_s28 + $0xf0] sm:$0xff] %v7705_v55  ;;  %v7708_v0 = vpack.c.bf16 %v6208_v63, %v6207_v25  ;;  %v4884_v58 = vpop.f32.mrb[24].mxu0  ;;  %5950 = vmatprep.subr.bf16.mxu0 %v8913_v60  ;;  %v8938_v25 = vld [vmem:[#allocation8 + $0x728] ss:$24 sps:$4 sm:$0xff]  }
 0x45c   : > { %v7859_v31 = vadd.f32 %v4884_v58, %v10543_v46  ;;  %v4886_v41 = vpop.f32.mrb[25].mxu0  ;;  %5372 = vmatpush1.bf16.msra.mxu1 %v8908_v28  ;;  %v8922_v46 = vld [vmem:[#allocation8 + $0x69c] ss:$24 sps:$4 sm:$0xff]  }
 0x45d   : > { %6942 = vst [vmem:[%s9567_s28 + $0x108] sm:$0xff] %v7708_v0  ;;  %v7860_v36 = vadd.f32 %v4886_v41, %v10545_v17  ;;  %v4888_v38 = vpop.f32.mrb[26].mxu0  ;;  %5951 = vmatpush1.bf16.msra.mxu0 %v8911_v21  ;;  %5373 = vmatprep.subr.bf16.mxu1 %v8916_v61  ;;  %v8941_v61 = vld [vmem:[#allocation8 + $0x730] ss:$24 sps:$4 sm:$0xff]   ;;  %v8946_v58 = vld [vmem:[#allocation8 + $0x75c] ss:$24 sps:$4 sm:$0xff]  }
 0x45e   : > { %v6213_v12 = vmax.f32 %v7859_v31, 0.0  ;;  %v7861_v56 = vadd.f32 %v4888_v38, %v10547_v57  ;;  %v4890_v51 = vpop.f32.mrb[27].mxu0  ;;  %5952 = vmatprep.subr.bf16.mxu0 %v8919_v20  ;;  %v8920_v57 = vld [vmem:[#allocation8 + $0x698] ss:$24 sps:$4 sm:$0xff]   ;;  %v8949_v31 = vld [vmem:[#allocation8 + $0x764] ss:$24 sps:$4 sm:$0xff]  }
 0x45f   : > { %v6214_v53 = vmax.f32 %v7860_v36, 0.0  ;;  %v7862_v29 = vadd.f32 %v4890_v51, %v10549_v4  ;;  %5219 = vmatmul.mubr.bf16.gmra.mrb[68].mxu1 %v10160_v13 }
 0x460   : > { %v6219_v45 = vmax.f32 %v7861_v56, 0.0  ;;  %5798 = vmatmul.mubr.bf16.gmra.mrb[68].mxu0 %v10160_v13  ;;  %5228 = vmatprep.mubr.bf16.mxu1 %v10165_v43  ;;  %v8947_v56 = vld [vmem:[#allocation8 + $0x760] ss:$24 sps:$4 sm:$0xff]  }
 0x461   : > { %v7711_v17 = vpack.c.bf16 %v6214_v53, %v6213_v12  ;;  %v6220_v49 = vmax.f32 %v7862_v29, 0.0  ;;  %5807 = vmatprep.mubr.bf16.mxu0 %v10165_v43  ;;  %5374 = vmatpush1.bf16.msra.mxu1 %v8914_v48  ;;  %v8944_v12 = vld [vmem:[#allocation8 + $0x758] ss:$24 sps:$4 sm:$0xff]   ;;  %v8952_v53 = vld [vmem:[#allocation8 + $0x78c] ss:$24 sps:$4 sm:$0xff]  }
 0x462   : > { %5953 = vmatpush1.bf16.msra.mxu0 %v8917_v2  ;;  %5375 = vmatprep.subr.bf16.mxu1 %v8922_v46  ;;  %v8955_v29 = vld [vmem:[#allocation8 + $0x794] ss:$24 sps:$4 sm:$0xff]  }
 0x463   : > { %6945 = vst [vmem:[%s9567_s28 + $0x120] sm:$0xff] %v7711_v17  ;;  %v7714_v4 = vpack.c.bf16 %v6220_v49, %v6219_v45  ;;  %v4894_v50 = vpop.f32.mrb[28].mxu0  ;;  %5954 = vmatprep.subr.bf16.mxu0 %v8925_v3  ;;  %v8950_v49 = vld [vmem:[#allocation8 + $0x788] ss:$24 sps:$4 sm:$0xff]  }
 0x464   : > { %v7863_v13 = vadd.f32 %v4894_v50, %v10555_v40  ;;  %v4896_v10 = vpop.f32.mrb[29].mxu0  ;;  %v8934_v40 = vld [vmem:[#allocation8 + $0x6fc] ss:$24 sps:$4 sm:$0xff]  }
 0x465   : > { %6948 = vst [vmem:[%s9567_s28 + $0x138] sm:$0xff] %v7714_v4  ;;  %v7864_v11 = vadd.f32 %v4896_v10, %v10557_v30  ;;  %v4898_v32 = vpop.f32.mrb[30].mxu0  ;;  %5376 = vmatpush1.bf16.msra.mxu1 %v8920_v57  ;;  %v8958_v10 = vld [vmem:[#allocation8 + $0x7bc] ss:$24 sps:$4 sm:$0xff]  }
 0x466   : > { %v6225_v54 = vmax.f32 %v7863_v13, 0.0  ;;  %v7865_v43 = vadd.f32 %v4898_v32, %v10559_v42  ;;  %v4900_v14 = vpop.f32.mrb[31].mxu0  ;;  %5955 = vmatpush1.bf16.msra.mxu0 %v8923_v9  ;;  %5377 = vmatprep.subr.bf16.mxu1 %v8928_v52  ;;  %v8953_v52 = vld [vmem:[#allocation8 + $0x790] ss:$24 sps:$4 sm:$0xff]  }
 0x467   : > { %v6226_v24 = vmax.f32 %v7864_v11, 0.0  ;;  %v7866_v1 = vadd.f32 %v4900_v14, %v10561_v18  ;;  %5956 = vmatprep.subr.bf16.mxu0 %v8931_v22  ;;  %5229 = vmatmul.mubr.bf16.gmra.mrb[72].mxu1 %v10175_v33  ;;  %v8932_v18 = vld [vmem:[#allocation8 + $0x6f8] ss:$24 sps:$4 sm:$0xff]   ;;  %v8961_v11 = vld [vmem:[#allocation8 + $0x7c4] ss:$24 sps:$4 sm:$0xff]  }
 0x468   : > { %v6231_v62 = vmax.f32 %v7865_v43, 0.0  ;;  %5808 = vmatmul.mubr.bf16.gmra.mrb[72].mxu0 %v10175_v33  ;;  %5238 = vmatprep.mubr.bf16.mxu1 %v10180_v47 }
 0x469   : > { %v7717_v30 = vpack.c.bf16 %v6226_v24, %v6225_v54  ;;  %v6232_v42 = vmax.f32 %v7866_v1, 0.0  ;;  %5817 = vmatprep.mubr.bf16.mxu0 %v10180_v47  ;;  %5378 = vmatpush1.bf16.msra.mxu1 %v8926_v19  ;;  %v11150_v54 = vld [vmem:[#allocation24_spill] sm:$0xff]  ;;  %v11151_v19 = vld [vmem:[#allocation25_spill] sm:$0xff] }
 0x46a   : > { %5957 = vmatpush1.bf16.msra.mxu0 %v8929_v27  ;;  %v4711_v23 = vpop.f32.mrb[32].mxu1  ;;  %5379 = vmatprep.subr.bf16.mxu1 %v8934_v40  ;;  %v8956_v27 = vld [vmem:[#allocation8 + $0x7b8] ss:$24 sps:$4 sm:$0xff]  }
 0x46b   : > { %6951 = vst [vmem:[%s9567_s28 + $0x150] sm:$0xff] %v7717_v30  ;;  %v7720_v6 = vpack.c.bf16 %v6232_v42, %v6231_v62  ;;  %v4904_v8 = vpop.f32.mrb[32].mxu0  ;;  %5958 = vmatprep.subr.bf16.mxu0 %v8937_v34  ;;  %v4713_v39 = vpop.f32.mrb[33].mxu1  ;;  %v8959_v24 = vld [vmem:[#allocation8 + $0x7c0] ss:$24 sps:$4 sm:$0xff]  }
 0x46c   : > { %v7867_v33 = vadd.f32 %v4904_v8, %v4711_v23  ;;  %v4906_v37 = vpop.f32.mrb[33].mxu0  ;;  %v4715_v60 = vpop.f32.mrb[34].mxu1  ;;  %v8964_v62 = vld [vmem:[#allocation8 + $0x7ec] ss:$24 sps:$4 sm:$0xff]  }
 0x46d   : > { %6954 = vst [vmem:[%s9567_s28 + $0x168] sm:$0xff] %v7720_v6  ;;  %v7868_v5 = vadd.f32 %v4906_v37, %v4713_v39  ;;  %v4908_v47 = vpop.f32.mrb[34].mxu0  ;;  %v4717_v28 = vpop.f32.mrb[35].mxu1  ;;  %5380 = vmatpush1.bf16.msra.mxu1 %v8932_v18  ;;  %v8967_v30 = vld [vmem:[#allocation8 + $0x7f4] ss:$24 sps:$4 sm:$0xff]  }
 0x46e   : > { %v6237_v55 = vmax.f32 %v7867_v33, 0.0  ;;  %v7869_v63 = vadd.f32 %v4908_v47, %v4715_v60  ;;  %v4910_v21 = vpop.f32.mrb[35].mxu0  ;;  %5959 = vmatpush1.bf16.msra.mxu0 %v8935_v26  ;;  %5381 = vmatprep.subr.bf16.mxu1 %v8940_v15  ;;  %v8962_v15 = vld [vmem:[#allocation8 + $0x7e8] ss:$24 sps:$4 sm:$0xff]  }
 0x46f   : > { %v6238_v20 = vmax.f32 %v7868_v5, 0.0  ;;  %v7870_v0 = vadd.f32 %v4910_v21, %v4717_v28  ;;  %5960 = vmatprep.subr.bf16.mxu0 %v8943_v16  ;;  %5239 = vmatmul.mubr.bf16.gmra.mrb[76].mxu1 %v10190_v7  ;;  %v8965_v5 = vld [vmem:[#allocation8 + $0x7f0] ss:$24 sps:$4 sm:$0xff]  }
 0x470   : > { %v6243_v41 = vmax.f32 %v7869_v63, 0.0  ;;  %5818 = vmatmul.mubr.bf16.gmra.mrb[76].mxu0 %v10190_v7  ;;  %5248 = vmatprep.mubr.bf16.mxu1 %v10196_v44  ;;  %v11152_v28 = vld [vmem:[#allocation26_spill] sm:$0xff] }
 0x471   : > { %v7723_v36 = vpack.c.bf16 %v6238_v20, %v6237_v55  ;;  %v6244_v38 = vmax.f32 %v7870_v0, 0.0  ;;  %5827 = vmatprep.mubr.bf16.mxu0 %v10196_v44  ;;  %5382 = vmatpush1.bf16.msra.mxu1 %v8938_v25  ;;  %v8970_v25 = vld [vmem:[#allocation8 + $0x81c] ss:$24 sps:$4 sm:$0xff]   ;;  %v8968_v0 = vld [vmem:[#allocation8 + $0x818] ss:$24 sps:$4 sm:$0xff]  }
 0x472   : > { %5961 = vmatpush1.bf16.msra.mxu0 %v8941_v61  ;;  %v4721_v48 = vpop.f32.mrb[36].mxu1  ;;  %5383 = vmatprep.subr.bf16.mxu1 %v8946_v58  ;;  %v8973_v55 = vld [vmem:[#allocation8 + $0x824] ss:$24 sps:$4 sm:$0xff]   ;;  %v8971_v58 = vld [vmem:[#allocation8 + $0x820] ss:$24 sps:$4 sm:$0xff]  }
 0x473   : > { %6957 = vst [vmem:[%s9567_s28 + $0x180] sm:$0xff] %v7723_v36  ;;  %v7726_v51 = vpack.c.bf16 %v6244_v38, %v6243_v41  ;;  %v4914_v2 = vpop.f32.mrb[36].mxu0  ;;  %5962 = vmatprep.subr.bf16.mxu0 %v8949_v31  ;;  %v4723_v46 = vpop.f32.mrb[37].mxu1  ;;  %v11153_v20 = vld [vmem:[#allocation27_spill] sm:$0xff]  ;;  %v8976_v38 = vld [vmem:[#allocation8 + $0x84c] ss:$24 sps:$4 sm:$0xff]  }
 0x474   : > { %v7871_v7 = vadd.f32 %v4914_v2, %v4721_v48  ;;  %v4916_v3 = vpop.f32.mrb[37].mxu0  ;;  %v4725_v17 = vpop.f32.mrb[38].mxu1 }
 0x475   : > { %6960 = vst [vmem:[%s9567_s28 + $0x198] sm:$0xff] %v7726_v51  ;;  %v7872_v45 = vadd.f32 %v4916_v3, %v4723_v46  ;;  %v4918_v44 = vpop.f32.mrb[38].mxu0  ;;  %v4727_v4 = vpop.f32.mrb[39].mxu1  ;;  %5384 = vmatpush1.bf16.msra.mxu1 %v8944_v12  ;;  %v8979_v12 = vld [vmem:[#allocation8 + $0x854] ss:$24 sps:$4 sm:$0xff]  }
 0x476   : > { %v6249_v57 = vmax.f32 %v7871_v7, 0.0  ;;  %v7873_v9 = vadd.f32 %v4918_v44, %v4725_v17  ;;  %v4920_v50 = vpop.f32.mrb[39].mxu0  ;;  %5963 = vmatpush1.bf16.msra.mxu0 %v8947_v56  ;;  %5385 = vmatprep.subr.bf16.mxu1 %v8952_v53  ;;  %v8974_v7 = vld [vmem:[#allocation8 + $0x848] ss:$24 sps:$4 sm:$0xff]  }
 0x477   : > { %v6250_v22 = vmax.f32 %v7872_v45, 0.0  ;;  %v7874_v13 = vadd.f32 %v4920_v50, %v4727_v4  ;;  %5964 = vmatprep.subr.bf16.mxu0 %v8955_v29  ;;  %5249 = vmatmul.mubr.bf16.gmra.mrb[80].mxu1 %v11150_v54  ;;  %v8977_v44 = vld [vmem:[#allocation8 + $0x850] ss:$24 sps:$4 sm:$0xff]   ;;  %v8985_v4 = vld [vmem:[#allocation8 + $0x884] ss:$24 sps:$4 sm:$0xff]  }
 0x478   : > { %v6255_v32 = vmax.f32 %v7873_v9, 0.0  ;;  %5828 = vmatmul.mubr.bf16.gmra.mrb[80].mxu0 %v11150_v54  ;;  %5258 = vmatprep.mubr.bf16.mxu1 %v11151_v19  ;;  %v8982_v9 = vld [vmem:[#allocation8 + $0x87c] ss:$24 sps:$4 sm:$0xff]  }
 0x479   : > { %v7729_v43 = vpack.c.bf16 %v6250_v22, %v6249_v57  ;;  %v6256_v14 = vmax.f32 %v7874_v13, 0.0  ;;  %5837 = vmatprep.mubr.bf16.mxu0 %v11151_v19  ;;  %5386 = vmatpush1.bf16.msra.mxu1 %v8950_v49  ;;  %v8988_v19 = vld [vmem:[#allocation8 + $0x8ac] ss:$24 sps:$4 sm:$0xff]  }
 0x47a   : > { %5965 = vmatpush1.bf16.msra.mxu0 %v8953_v52  ;;  %v4731_v40 = vpop.f32.mrb[40].mxu1  ;;  %5387 = vmatprep.subr.bf16.mxu1 %v8958_v10  ;;  %v11154_v52 = vld [vmem:[#allocation28_spill] sm:$0xff]  ;;  %v11155_v10 = vld [vmem:[#allocation29_spill] sm:$0xff] }
 0x47b   : > { %6963 = vst [vmem:[%s9567_s28 + $0x1b0] sm:$0xff] %v7729_v43  ;;  %v7732_v1 = vpack.c.bf16 %v6256_v14, %v6255_v32  ;;  %v4924_v34 = vpop.f32.mrb[40].mxu0  ;;  %5966 = vmatprep.subr.bf16.mxu0 %v8961_v11  ;;  %v4733_v18 = vpop.f32.mrb[41].mxu1  ;;  %v8980_v11 = vld [vmem:[#allocation8 + $0x878] ss:$24 sps:$4 sm:$0xff]  }
 0x47c   : > { %v7875_v42 = vadd.f32 %v4924_v34, %v4731_v40  ;;  %v4926_v26 = vpop.f32.mrb[41].mxu0  ;;  %v4735_v23 = vpop.f32.mrb[42].mxu1  ;;  %v8983_v32 = vld [vmem:[#allocation8 + $0x880] ss:$24 sps:$4 sm:$0xff]  }
 0x47d   : > { %6966 = vst [vmem:[%s9567_s28 + $0x1c8] sm:$0xff] %v7732_v1  ;;  %v7876_v6 = vadd.f32 %v4926_v26, %v4733_v18  ;;  %v4928_v8 = vpop.f32.mrb[42].mxu0  ;;  %v4737_v39 = vpop.f32.mrb[43].mxu1  ;;  %5388 = vmatpush1.bf16.msra.mxu1 %v8956_v27  ;;  %v8991_v27 = vld [vmem:[#allocation8 + $0x8b4] ss:$24 sps:$4 sm:$0xff]  }
 0x47e   : > { %v6261_v16 = vmax.f32 %v7875_v42, 0.0  ;;  %v7877_v33 = vadd.f32 %v4928_v8, %v4735_v23  ;;  %v4930_v37 = vpop.f32.mrb[43].mxu0  ;;  %5967 = vmatpush1.bf16.msra.mxu0 %v8959_v24  ;;  %5389 = vmatprep.subr.bf16.mxu1 %v8964_v62  ;;  %v8986_v42 = vld [vmem:[#allocation8 + $0x8a8] ss:$24 sps:$4 sm:$0xff]  }
 0x47f   : > { %v6262_v60 = vmax.f32 %v7876_v6, 0.0  ;;  %v7878_v47 = vadd.f32 %v4930_v37, %v4737_v39  ;;  %5968 = vmatprep.subr.bf16.mxu0 %v8967_v30  ;;  %5259 = vmatmul.mubr.bf16.gmra.mrb[84].mxu1 %v11152_v28  ;;  %v8989_v8 = vld [vmem:[#allocation8 + $0x8b0] ss:$24 sps:$4 sm:$0xff]   ;;  %v8997_v39 = vld [vmem:[#allocation8 + $0x8e4] ss:$24 sps:$4 sm:$0xff]  }
 0x480   : > { %v6267_v63 = vmax.f32 %v7877_v33, 0.0  ;;  %5838 = vmatmul.mubr.bf16.gmra.mrb[84].mxu0 %v11152_v28  ;;  %5268 = vmatprep.mubr.bf16.mxu1 %v11153_v20  ;;  %v8994_v33 = vld [vmem:[#allocation8 + $0x8dc] ss:$24 sps:$4 sm:$0xff]  }
 0x481   : > { %v7735_v21 = vpack.c.bf16 %v6262_v60, %v6261_v16  ;;  %v6268_v61 = vmax.f32 %v7878_v47, 0.0  ;;  %5847 = vmatprep.mubr.bf16.mxu0 %v11153_v20  ;;  %5390 = vmatpush1.bf16.msra.mxu1 %v8962_v15 }
 0x482   : > { %5969 = vmatpush1.bf16.msra.mxu0 %v8965_v5  ;;  %v4741_v41 = vpop.f32.mrb[44].mxu1  ;;  %5391 = vmatprep.subr.bf16.mxu1 %v8970_v25  ;;  %v11156_v5 = vld [vmem:[#allocation30_spill] sm:$0xff]  ;;  %v11157_v25 = vld [vmem:[#allocation47_spill] sm:$0xff] }
 0x483   : > { %6969 = vst [vmem:[%s9567_s28 + $0x1e0] sm:$0xff] %v7735_v21  ;;  %v7738_v31 = vpack.c.bf16 %v6268_v61, %v6267_v63  ;;  %v4934_v36 = vpop.f32.mrb[44].mxu0  ;;  %5970 = vmatprep.subr.bf16.mxu0 %v8973_v55  ;;  %v4743_v51 = vpop.f32.mrb[45].mxu1  ;;  %v8992_v55 = vld [vmem:[#allocation8 + $0x8d8] ss:$24 sps:$4 sm:$0xff]  }
 0x484   : > { %v7879_v56 = vadd.f32 %v4934_v36, %v4741_v41  ;;  %v4936_v48 = vpop.f32.mrb[45].mxu0  ;;  %v4745_v53 = vpop.f32.mrb[46].mxu1  ;;  %v8995_v63 = vld [vmem:[#allocation8 + $0x8e0] ss:$24 sps:$4 sm:$0xff]  }
 0x485   : > { %6972 = vst [vmem:[%s9567_s28 + $0x1f8] sm:$0xff] %v7738_v31  ;;  %v7880_v2 = vadd.f32 %v4936_v48, %v4743_v51  ;;  %v4938_v29 = vpop.f32.mrb[46].mxu0  ;;  %v4747_v45 = vpop.f32.mrb[47].mxu1  ;;  %5392 = vmatpush1.bf16.msra.mxu1 %v8968_v0 }
 0x486   : > { %v6273_v46 = vmax.f32 %v7879_v56, 0.0  ;;  %v7881_v3 = vadd.f32 %v4938_v29, %v4745_v53  ;;  %v4940_v17 = vpop.f32.mrb[47].mxu0  ;;  %5971 = vmatpush1.bf16.msra.mxu0 %v8971_v58  ;;  %5393 = vmatprep.subr.bf16.mxu1 %v8976_v38  ;;  %v11158_v29 = vld [vmem:[#allocation49_spill] sm:$0xff] }
 0x487   : > { %v6274_v49 = vmax.f32 %v7880_v2, 0.0  ;;  %v7882_v57 = vadd.f32 %v4940_v17, %v4747_v45  ;;  %5972 = vmatprep.subr.bf16.mxu0 %v8979_v12  ;;  %5269 = vmatmul.mubr.bf16.gmra.mrb[88].mxu1 %v11154_v52 }
 0x488   : > { %v6279_v50 = vmax.f32 %v7881_v3, 0.0  ;;  %5848 = vmatmul.mubr.bf16.gmra.mrb[88].mxu0 %v11154_v52  ;;  %5278 = vmatprep.mubr.bf16.mxu1 %v11155_v10  ;;  %v11159_v3 = vld [vmem:[#allocation51_spill] sm:$0xff] }
 0x489   : > { %v7741_v22 = vpack.c.bf16 %v6274_v49, %v6273_v46  ;;  %v6280_v13 = vmax.f32 %v7882_v57, 0.0  ;;  %5857 = vmatprep.mubr.bf16.mxu0 %v11155_v10  ;;  %5394 = vmatpush1.bf16.msra.mxu1 %v8974_v7 }
 0x48a   : > { %5973 = vmatpush1.bf16.msra.mxu0 %v8977_v44  ;;  %v4751_v43 = vpop.f32.mrb[48].mxu1  ;;  %5395 = vmatprep.subr.bf16.mxu1 %v8982_v9 }
 0x48b   : > { %6975 = vst [vmem:[%s9567_s28 + $0x210] sm:$0xff] %v7741_v22  ;;  %v7744_v54 = vpack.c.bf16 %v6280_v13, %v6279_v50  ;;  %v4944_v14 = vpop.f32.mrb[48].mxu0  ;;  %5974 = vmatprep.subr.bf16.mxu0 %v8985_v4  ;;  %v4753_v1 = vpop.f32.mrb[49].mxu1 }
 0x48c   : > { %v7883_v24 = vadd.f32 %v4944_v14, %v4751_v43  ;;  %v4946_v40 = vpop.f32.mrb[49].mxu0  ;;  %v4755_v62 = vpop.f32.mrb[50].mxu1  ;;  %v11160_v14 = vld [vmem:[#allocation53_spill] sm:$0xff] }
 0x48d   : > { %6978 = vst [vmem:[%s9567_s28 + $0x228] sm:$0xff] %v7744_v54  ;;  %v7884_v34 = vadd.f32 %v4946_v40, %v4753_v1  ;;  %v4948_v30 = vpop.f32.mrb[50].mxu0  ;;  %v4757_v6 = vpop.f32.mrb[51].mxu1  ;;  %5396 = vmatpush1.bf16.msra.mxu1 %v8980_v11 }
 0x48e   : > { %v6285_v18 = vmax.f32 %v7883_v24, 0.0  ;;  %v7885_v26 = vadd.f32 %v4948_v30, %v4755_v62  ;;  %v4950_v23 = vpop.f32.mrb[51].mxu0  ;;  %5975 = vmatpush1.bf16.msra.mxu0 %v8983_v32  ;;  %5397 = vmatprep.subr.bf16.mxu1 %v8988_v19  ;;  %v11161_v24 = vld [vmem:[#allocation55_spill] sm:$0xff] }
 0x48f   : > { %v6286_v15 = vmax.f32 %v7884_v34, 0.0  ;;  %v7886_v16 = vadd.f32 %v4950_v23, %v4757_v6  ;;  %5976 = vmatprep.subr.bf16.mxu0 %v8991_v27  ;;  %5279 = vmatmul.mubr.bf16.gmra.mrb[92].mxu1 %v11156_v5 }
 0x490   : > { %v6291_v37 = vmax.f32 %v7885_v26, 0.0  ;;  %5858 = vmatmul.mubr.bf16.gmra.mrb[92].mxu0 %v11156_v5  ;;  %5288 = vmatprep.mubr.bf16.mxu1 %v11157_v25  ;;  %v11162_v5 = vld [vmem:[#allocation57_spill] sm:$0xff] }
 0x491   : > { %v7747_v60 = vpack.c.bf16 %v6286_v15, %v6285_v18  ;;  %v6292_v47 = vmax.f32 %v7886_v16, 0.0  ;;  %5867 = vmatprep.mubr.bf16.mxu0 %v11157_v25  ;;  %5398 = vmatpush1.bf16.msra.mxu1 %v8986_v42  ;;  %v11163_v25 = vld [vmem:[#allocation59_spill] sm:$0xff] }
 0x492   : > { %5977 = vmatpush1.bf16.msra.mxu0 %v8989_v8  ;;  %v4761_v21 = vpop.f32.mrb[52].mxu1  ;;  %5399 = vmatprep.subr.bf16.mxu1 %v8994_v33 }
 0x493   : > { %6981 = vst [vmem:[%s9567_s28 + $0x240] sm:$0xff] %v7747_v60  ;;  %v7750_v28 = vpack.c.bf16 %v6292_v47, %v6291_v37  ;;  %v4954_v61 = vpop.f32.mrb[52].mxu0  ;;  %5978 = vmatprep.subr.bf16.mxu0 %v8997_v39  ;;  %v4763_v0 = vpop.f32.mrb[53].mxu1 }
 0x494   : > { %v7887_v20 = vadd.f32 %v4954_v61, %v4761_v21  ;;  %v4956_v58 = vpop.f32.mrb[53].mxu0  ;;  %v4765_v41 = vpop.f32.mrb[54].mxu1  ;;  %v11166_v21 = vld [vmem:[#allocation67_spill] sm:$0xff]  ;;  %v11167_v61 = vld [vmem:[#allocation69_spill] sm:$0xff] }
 0x495   : > { %6984 = vst [vmem:[%s9567_s28 + $0x258] sm:$0xff] %v7750_v28  ;;  %v7888_v31 = vadd.f32 %v4956_v58, %v4763_v0  ;;  %v4958_v36 = vpop.f32.mrb[54].mxu0  ;;  %v4767_v56 = vpop.f32.mrb[55].mxu1  ;;  %5400 = vmatpush1.bf16.msra.mxu1 %v8992_v55  ;;  %v11165_v28 = vld [vmem:[#allocation63_spill] sm:$0xff]  ;;  %v11169_v0 = vld [vmem:[#allocation73_spill] sm:$0xff]  ;;  %v11172_v58 = vld [vmem:[#allocation32_spill] sm:$0xff] }
 0x496   : > { %v6297_v38 = vmax.f32 %v7887_v20, 0.0  ;;  %v7889_v12 = vadd.f32 %v4958_v36, %v4765_v41  ;;  %v4960_v51 = vpop.f32.mrb[55].mxu0  ;;  %5979 = vmatpush1.bf16.msra.mxu0 %v8995_v63  ;;  %v11164_v63 = vld [vmem:[#allocation61_spill] sm:$0xff]  ;;  %v11168_v20 = vld [vmem:[#allocation71_spill] sm:$0xff]  ;;  %v11174_v41 = vld [vmem:[#allocation34_spill] sm:$0xff] }
 0x497   : > { %v6298_v48 = vmax.f32 %v7888_v31, 0.0  ;;  %v7890_v2 = vadd.f32 %v4960_v51, %v4767_v56  ;;  %5289 = vmatmul.mubr.bf16.gmra.mrb[96].mxu1 %v11158_v29  ;;  %v11173_v31 = vld [vmem:[#allocation33_spill] sm:$0xff]  ;;  %v11175_v36 = vld [vmem:[#allocation35_spill] sm:$0xff]  ;;  %v11178_v56 = vld [vmem:[#allocation38_spill] sm:$0xff] }
 0x498   : > { %v6303_v53 = vmax.f32 %v7889_v12, 0.0  ;;  %5868 = vmatmul.mubr.bf16.gmra.mrb[96].mxu0 %v11158_v29  ;;  %5298 = vmatprep.mubr.bf16.mxu1 %v11159_v3  ;;  %v11177_v12 = vld [vmem:[#allocation37_spill] sm:$0xff]  ;;  %v11179_v51 = vld [vmem:[#allocation39_spill] sm:$0xff] }
 0x499   : > { %v7753_v7 = vpack.c.bf16 %v6298_v48, %v6297_v38  ;;  %v6304_v46 = vmax.f32 %v7890_v2, 0.0  ;;  %5877 = vmatprep.mubr.bf16.mxu0 %v11159_v3  ;;  %v11176_v38 = vld [vmem:[#allocation36_spill] sm:$0xff]  ;;  %v11181_v2 = vld [vmem:[#allocation41_spill] sm:$0xff]  ;;  %v11183_v29 = vld [vmem:[#allocation43_spill] sm:$0xff] }
 0x49a   : > { %v4771_v17 = vpop.f32.mrb[56].mxu1  ;;  %v11180_v48 = vld [vmem:[#allocation40_spill] sm:$0xff]  ;;  %v11186_v3 = vld [vmem:[#allocation46_spill] sm:$0xff] }
 0x49b   : > { %6987 = vst [vmem:[%s9567_s28 + $0x270] sm:$0xff] %v7753_v7  ;;  %v7756_v45 = vpack.c.bf16 %v6304_v46, %v6303_v53  ;;  %v4964_v44 = vpop.f32.mrb[56].mxu0  ;;  %v4773_v57 = vpop.f32.mrb[57].mxu1  ;;  %v11182_v53 = vld [vmem:[#allocation42_spill] sm:$0xff]  ;;  %v11184_v7 = vld [vmem:[#allocation44_spill] sm:$0xff]  ;;  %v11185_v46 = vld [vmem:[#allocation45_spill] sm:$0xff] }
 0x49c   : > { %v7891_v49 = vadd.f32 %v4964_v44, %v4771_v17  ;;  %v4966_v9 = vpop.f32.mrb[57].mxu0  ;;  %v4775_v50 = vpop.f32.mrb[58].mxu1  ;;  %v11188_v17 = vld [vmem:[#allocation50_spill] sm:$0xff]  ;;  %v11189_v44 = vld [vmem:[#allocation52_spill] sm:$0xff] }
 0x49d   : > { %6990 = vst [vmem:[%s9567_s28 + $0x288] sm:$0xff] %v7756_v45  ;;  %v7892_v4 = vadd.f32 %v4966_v9, %v4773_v57  ;;  %v4968_v52 = vpop.f32.mrb[58].mxu0  ;;  %v4777_v10 = vpop.f32.mrb[59].mxu1  ;;  %v11187_v45 = vld [vmem:[#allocation48_spill] sm:$0xff]  ;;  %v11192_v9 = vld [vmem:[#allocation58_spill] sm:$0xff] }
 0x49e   : > { %v6309_v22 = vmax.f32 %v7891_v49, 0.0  ;;  %v7893_v13 = vadd.f32 %v4968_v52, %v4775_v50  ;;  %v4970_v11 = vpop.f32.mrb[59].mxu0  ;;  %v11190_v49 = vld [vmem:[#allocation54_spill] sm:$0xff]  ;;  %v11191_v57 = vld [vmem:[#allocation56_spill] sm:$0xff] }
 0x49f   : > { %v6310_v32 = vmax.f32 %v7892_v4, 0.0  ;;  %v7894_v54 = vadd.f32 %v4970_v11, %v4777_v10  ;;  %5299 = vmatmul.mubr.bf16.gmra.mrb[100].mxu1 %v11160_v14  ;;  %v11193_v4 = vld [vmem:[#allocation60_spill] sm:$0xff]  ;;  %v11194_v50 = vld [vmem:[#allocation62_spill] sm:$0xff] }
 0x4a0   : > { %v6315_v43 = vmax.f32 %v7893_v13, 0.0  ;;  %5878 = vmatmul.mubr.bf16.gmra.mrb[100].mxu0 %v11160_v14  ;;  %5308 = vmatprep.mubr.bf16.mxu1 %v11161_v24  ;;  %v11195_v52 = vld [vmem:[#allocation64_spill] sm:$0xff]  ;;  %v11197_v13 = vld [vmem:[#allocation66_spill] sm:$0xff] }
 0x4a1   : > { %v7759_v19 = vpack.c.bf16 %v6310_v32, %v6309_v22  ;;  %v6316_v27 = vmax.f32 %v7894_v54, 0.0  ;;  %5887 = vmatprep.mubr.bf16.mxu0 %v11161_v24  ;;  %v11196_v22 = vld [vmem:[#allocation65_spill] sm:$0xff]  ;;  %v11198_v10 = vld [vmem:[#allocation68_spill] sm:$0xff]  ;;  %v11199_v11 = vld [vmem:[#allocation70_spill] sm:$0xff] }
 0x4a2   : > { %v4781_v40 = vpop.f32.mrb[60].mxu1  ;;  %v11200_v32 = vld [vmem:[#allocation72_spill] sm:$0xff]  ;;  %v11201_v54 = vld [vmem:[#allocation74_spill] sm:$0xff] }
 0x4a3   : > { %6993 = vst [vmem:[%s9567_s28 + $0x2a0] sm:$0xff] %v7759_v19  ;;  %v7762_v1 = vpack.c.bf16 %v6316_v27, %v6315_v43  ;;  %v4974_v34 = vpop.f32.mrb[60].mxu0  ;;  %v4783_v30 = vpop.f32.mrb[61].mxu1  ;;  %v11202_v43 = vld [vmem:[#allocation76_spill] sm:$0xff] }
 0x4a4   : > { %v7895_v62 = vadd.f32 %v4974_v34, %v4781_v40  ;;  %v4976_v42 = vpop.f32.mrb[61].mxu0  ;;  %v4785_v26 = vpop.f32.mrb[62].mxu1 }
 0x4a5   : > { %6996 = vst [vmem:[%s9567_s28 + $0x2b8] sm:$0xff] %v7762_v1  ;;  %v7896_v18 = vadd.f32 %v4976_v42, %v4783_v30  ;;  %v4978_v6 = vpop.f32.mrb[62].mxu0  ;;  %v4787_v15 = vpop.f32.mrb[63].mxu1 }
 0x4a6   : > { %v6321_v23 = vmax.f32 %v7895_v62, 0.0  ;;  %v7897_v8 = vadd.f32 %v4978_v6, %v4785_v26  ;;  %v4980_v16 = vpop.f32.mrb[63].mxu0 }
 0x4a7   : > { %v6322_v33 = vmax.f32 %v7896_v18, 0.0  ;;  %v7898_v39 = vadd.f32 %v4980_v16, %v4787_v15  ;;  %5309 = vmatmul.mubr.bf16.gmra.mrb[104].mxu1 %v11162_v5 }
 0x4a8   : > { %v6327_v37 = vmax.f32 %v7897_v8, 0.0  ;;  %5888 = vmatmul.mubr.bf16.gmra.mrb[104].mxu0 %v11162_v5  ;;  %5318 = vmatprep.mubr.bf16.mxu1 %v11163_v25 }
 0x4a9   : > { %v7765_v60 = vpack.c.bf16 %v6322_v33, %v6321_v23  ;;  %v6328_v47 = vmax.f32 %v7898_v39, 0.0  ;;  %5897 = vmatprep.mubr.bf16.mxu0 %v11163_v25 }
 0x4ab   : > { %6999 = vst [vmem:[%s9567_s28 + $0x2d0] sm:$0xff] %v7765_v60  ;;  %v7768_v55 = vpack.c.bf16 %v6328_v47, %v6327_v37 }
 0x4ad   : > { %7002 = vst [vmem:[%s9567_s28 + $0x2e8] sm:$0xff] %v7768_v55 }
 0x4af   : > { %5319 = vmatmul.mubr.bf16.gmra.mrb[108].mxu1 %v11164_v63 }
 0x4b0   : > { %5898 = vmatmul.mubr.bf16.gmra.mrb[108].mxu0 %v11164_v63  ;;  %5328 = vmatprep.mubr.bf16.mxu1 %v11165_v28 }
 0x4b1   : > { %5907 = vmatprep.mubr.bf16.mxu0 %v11165_v28 }
 0x4b7   : > { %5329 = vmatmul.mubr.bf16.gmra.mrb[112].mxu1 %v10415_v59 }
 0x4b8   : > { %5908 = vmatmul.mubr.bf16.gmra.mrb[112].mxu0 %v10415_v59  ;;  %5338 = vmatprep.mubr.bf16.mxu1 %v10419_v35  ;;  %v11170_v59 = vld [vmem:[#allocation75_spill] sm:$0xff] }
 0x4b9   : > { %5917 = vmatprep.mubr.bf16.mxu0 %v10419_v35  ;;  %v11171_v35 = vld [vmem:[#allocation31_spill] sm:$0xff] }
 0x4bf   : > { %5339 = vmatmul.mubr.bf16.gmra.mrb[116].mxu1 %v11166_v21 }
 0x4c0   : > { %5918 = vmatmul.mubr.bf16.gmra.mrb[116].mxu0 %v11166_v21  ;;  %5348 = vmatprep.mubr.bf16.mxu1 %v11167_v61 }
 0x4c1   : > { %5927 = vmatprep.mubr.bf16.mxu0 %v11167_v61 }
 0x4c7   : > { %5349 = vmatmul.mubr.bf16.gmra.mrb[120].mxu1 %v11168_v20 }
 0x4c8   : > { %5928 = vmatmul.mubr.bf16.gmra.mrb[120].mxu0 %v11168_v20  ;;  %5358 = vmatprep.mubr.bf16.mxu1 %v11169_v0 }
 0x4c9   : > { %5937 = vmatprep.mubr.bf16.mxu0 %v11169_v0 }
 0x4cf   : > { %5359 = vmatmul.mubr.bf16.gmra.mrb[124].mxu1 %v11170_v59 }
 0x4d0   : > { %5938 = vmatmul.mubr.bf16.gmra.mrb[124].mxu0 %v11170_v59  ;;  %5401 = vmatprep.mubr.bf16.mxu1 %v11171_v35 }
 0x4d1   : > { %5980 = vmatprep.mubr.bf16.mxu0 %v11171_v35 }
 0x4d7   : > { %5402 = vmatmul.mubr.bf16.vlgmr.msra.gmra.mrb[64].mxu1 %v11172_v58 }
 0x4d8   : > { %5981 = vmatmul.mubr.bf16.vlgmr.msra.gmra.mrb[64].mxu0 %v11172_v58  ;;  %5411 = vmatprep.mubr.bf16.mxu1 %v11173_v31 }
 0x4d9   : > { %5990 = vmatprep.mubr.bf16.mxu0 %v11173_v31 }
 0x4df   : > { %5412 = vmatmul.mubr.bf16.gmra.mrb[68].mxu1 %v11174_v41 }
 0x4e0   : > { %5991 = vmatmul.mubr.bf16.gmra.mrb[68].mxu0 %v11174_v41  ;;  %5421 = vmatprep.mubr.bf16.mxu1 %v11175_v36 }
 0x4e1   : > { %6000 = vmatprep.mubr.bf16.mxu0 %v11175_v36 }
 0x4e7   : > { %5422 = vmatmul.mubr.bf16.gmra.mrb[72].mxu1 %v11176_v38 }
 0x4e8   : > { %6001 = vmatmul.mubr.bf16.gmra.mrb[72].mxu0 %v11176_v38  ;;  %5431 = vmatprep.mubr.bf16.mxu1 %v11177_v12 }
 0x4e9   : > { %6010 = vmatprep.mubr.bf16.mxu0 %v11177_v12 }
 0x4ef   : > { %5432 = vmatmul.mubr.bf16.gmra.mrb[76].mxu1 %v11178_v56 }
 0x4f0   : > { %6011 = vmatmul.mubr.bf16.gmra.mrb[76].mxu0 %v11178_v56  ;;  %5441 = vmatprep.mubr.bf16.mxu1 %v11179_v51 }
 0x4f1   : > { %6020 = vmatprep.mubr.bf16.mxu0 %v11179_v51 }
 0x4f7   : > { %5442 = vmatmul.mubr.bf16.gmra.mrb[80].mxu1 %v11180_v48 }
 0x4f8   : > { %6021 = vmatmul.mubr.bf16.gmra.mrb[80].mxu0 %v11180_v48  ;;  %5451 = vmatprep.mubr.bf16.mxu1 %v11181_v2 }
 0x4f9   : > { %6030 = vmatprep.mubr.bf16.mxu0 %v11181_v2 }
 0x4ff   : > { %5452 = vmatmul.mubr.bf16.gmra.mrb[84].mxu1 %v11182_v53 }
 0x500   : > { %6031 = vmatmul.mubr.bf16.gmra.mrb[84].mxu0 %v11182_v53  ;;  %5461 = vmatprep.mubr.bf16.mxu1 %v11183_v29 }
 0x501   : > { %6040 = vmatprep.mubr.bf16.mxu0 %v11183_v29 }
 0x507   : > { %5462 = vmatmul.mubr.bf16.gmra.mrb[88].mxu1 %v11184_v7 }
 0x508   : > { %6041 = vmatmul.mubr.bf16.gmra.mrb[88].mxu0 %v11184_v7  ;;  %5471 = vmatprep.mubr.bf16.mxu1 %v11185_v46 }
 0x509   : > { %6050 = vmatprep.mubr.bf16.mxu0 %v11185_v46 }
 0x50f   : > { %5472 = vmatmul.mubr.bf16.gmra.mrb[92].mxu1 %v11186_v3 }
 0x510   : > { %6051 = vmatmul.mubr.bf16.gmra.mrb[92].mxu0 %v11186_v3  ;;  %5481 = vmatprep.mubr.bf16.mxu1 %v11187_v45 }
 0x511   : > { %6060 = vmatprep.mubr.bf16.mxu0 %v11187_v45 }
 0x517   : > { %5482 = vmatmul.mubr.bf16.gmra.mrb[96].mxu1 %v11188_v17 }
 0x518   : > { %6061 = vmatmul.mubr.bf16.gmra.mrb[96].mxu0 %v11188_v17  ;;  %5491 = vmatprep.mubr.bf16.mxu1 %v11189_v44 }
 0x519   : > { %6070 = vmatprep.mubr.bf16.mxu0 %v11189_v44 }
 0x51f   : > { %5492 = vmatmul.mubr.bf16.gmra.mrb[100].mxu1 %v11190_v49 }
 0x520   : > { %6071 = vmatmul.mubr.bf16.gmra.mrb[100].mxu0 %v11190_v49  ;;  %5501 = vmatprep.mubr.bf16.mxu1 %v11191_v57 }
 0x521   : > { %6080 = vmatprep.mubr.bf16.mxu0 %v11191_v57 }
 0x527   : > { %5502 = vmatmul.mubr.bf16.gmra.mrb[104].mxu1 %v11192_v9 }
 0x528   : > { %6081 = vmatmul.mubr.bf16.gmra.mrb[104].mxu0 %v11192_v9  ;;  %5511 = vmatprep.mubr.bf16.mxu1 %v11193_v4 }
 0x529   : > { %6090 = vmatprep.mubr.bf16.mxu0 %v11193_v4 }
 0x52f   : > { %5512 = vmatmul.mubr.bf16.gmra.mrb[108].mxu1 %v11194_v50 }
 0x530   : > { %6091 = vmatmul.mubr.bf16.gmra.mrb[108].mxu0 %v11194_v50  ;;  %5521 = vmatprep.mubr.bf16.mxu1 %v11195_v52 }
 0x531   : > { %6100 = vmatprep.mubr.bf16.mxu0 %v11195_v52 }
 0x537   : > { %5522 = vmatmul.mubr.bf16.gmra.mrb[112].mxu1 %v11196_v22 }
 0x538   : > { %6101 = vmatmul.mubr.bf16.gmra.mrb[112].mxu0 %v11196_v22  ;;  %5531 = vmatprep.mubr.bf16.mxu1 %v11197_v13 }
 0x539   : > { %6110 = vmatprep.mubr.bf16.mxu0 %v11197_v13 }
 0x53f   : > { %5532 = vmatmul.mubr.bf16.gmra.mrb[116].mxu1 %v11198_v10 }
 0x540   : > { %6111 = vmatmul.mubr.bf16.gmra.mrb[116].mxu0 %v11198_v10  ;;  %5541 = vmatprep.mubr.bf16.mxu1 %v11199_v11 }
 0x541   : > { %6120 = vmatprep.mubr.bf16.mxu0 %v11199_v11 }
 0x547   : > { %5542 = vmatmul.mubr.bf16.gmra.mrb[120].mxu1 %v11200_v32 }
 0x548   : > { %6121 = vmatmul.mubr.bf16.gmra.mrb[120].mxu0 %v11200_v32  ;;  %5551 = vmatprep.mubr.bf16.mxu1 %v11201_v54 }
 0x549   : > { %6130 = vmatprep.mubr.bf16.mxu0 %v11201_v54 }
 0x54f   : > { %5552 = vmatmul.mubr.bf16.gmra.mrb[124].mxu1 %v11202_v43 }
 0x550   : > { %6131 = vmatmul.mubr.bf16.gmra.mrb[124].mxu0 %v11202_v43 }
 0x5aa   : > { %v5403_v14 = vpop.f32.mrb[64].mxu1 }
 0x5ab   : > { %v5982_v19 = vpop.f32.mrb[64].mxu0  ;;  %v6143_v27 = vmax.f32 %v5403_v14, 0.0  ;;  %v5405_v1 = vpop.f32.mrb[65].mxu1 }
 0x5ac   : > { %v6145_v24 = vmax.f32 %v5982_v19, 0.0  ;;  %v5984_v40 = vpop.f32.mrb[65].mxu0  ;;  %v6144_v34 = vmax.f32 %v5405_v1, 0.0  ;;  %v5407_v30 = vpop.f32.mrb[66].mxu1 }
 0x5ad   : > { %v6146_v62 = vmax.f32 %v5984_v40, 0.0  ;;  %v5986_v42 = vpop.f32.mrb[66].mxu0  ;;  %v6149_v18 = vmax.f32 %v5407_v30, 0.0  ;;  %v5409_v6 = vpop.f32.mrb[67].mxu1 }
 0x5ae   : > { %v6151_v26 = vmax.f32 %v5986_v42, 0.0  ;;  %v5988_v23 = vpop.f32.mrb[67].mxu0  ;;  %v7676_v8 = vpack.c.bf16 %v6144_v34, %v6143_v27  ;;  %v6150_v16 = vmax.f32 %v5409_v6, 0.0 }
 0x5af   : > { %v7677_v15 = vpack.c.bf16 %v6146_v62, %v6145_v24  ;;  %v6152_v33 = vmax.f32 %v5988_v23, 0.0 }
 0x5b0   : > { %6910 = vst [vmem:[%s9567_s28 + $0x8] sm:$0xff] %v7676_v8  ;;  %v7679_v39 = vpack.c.bf16 %v6150_v16, %v6149_v18 }
 0x5b1   : > { %6911 = vst [vmem:[%s9567_s28 + $0x10] sm:$0xff] %v7677_v15  ;;  %v7680_v37 = vpack.c.bf16 %v6152_v33, %v6151_v26 }
 0x5b2   : > { %6913 = vst [vmem:[%s9567_s28 + $0x20] sm:$0xff] %v7679_v39  ;;  %v5413_v5 = vpop.f32.mrb[68].mxu1 }
 0x5b3   : > { %6914 = vst [vmem:[%s9567_s28 + $0x28] sm:$0xff] %v7680_v37  ;;  %v5992_v60 = vpop.f32.mrb[68].mxu0  ;;  %v6155_v47 = vmax.f32 %v5413_v5, 0.0  ;;  %v5415_v55 = vpop.f32.mrb[69].mxu1 }
 0x5b4   : > { %v6157_v25 = vmax.f32 %v5992_v60, 0.0  ;;  %v5994_v63 = vpop.f32.mrb[69].mxu0  ;;  %v6156_v28 = vmax.f32 %v5415_v55, 0.0  ;;  %v5417_v61 = vpop.f32.mrb[70].mxu1 }
 0x5b5   : > { %v6158_v21 = vmax.f32 %v5994_v63, 0.0  ;;  %v5996_v20 = vpop.f32.mrb[70].mxu0  ;;  %v6161_v0 = vmax.f32 %v5417_v61, 0.0  ;;  %v5419_v35 = vpop.f32.mrb[71].mxu1 }
 0x5b6   : > { %v6163_v59 = vmax.f32 %v5996_v20, 0.0  ;;  %v5998_v58 = vpop.f32.mrb[71].mxu0  ;;  %v7682_v31 = vpack.c.bf16 %v6156_v28, %v6155_v47  ;;  %v6162_v36 = vmax.f32 %v5419_v35, 0.0 }
 0x5b7   : > { %v7683_v41 = vpack.c.bf16 %v6158_v21, %v6157_v25  ;;  %v6164_v38 = vmax.f32 %v5998_v58, 0.0 }
 0x5b8   : > { %6916 = vst [vmem:[%s9567_s28 + $0x38] sm:$0xff] %v7682_v31  ;;  %v7685_v12 = vpack.c.bf16 %v6162_v36, %v6161_v0 }
 0x5b9   : > { %6917 = vst [vmem:[%s9567_s28 + $0x40] sm:$0xff] %v7683_v41  ;;  %v7686_v56 = vpack.c.bf16 %v6164_v38, %v6163_v59 }
 0x5ba   : > { %6919 = vst [vmem:[%s9567_s28 + $0x50] sm:$0xff] %v7685_v12  ;;  %v5423_v51 = vpop.f32.mrb[72].mxu1 }
 0x5bb   : > { %6920 = vst [vmem:[%s9567_s28 + $0x58] sm:$0xff] %v7686_v56  ;;  %v6002_v48 = vpop.f32.mrb[72].mxu0  ;;  %v6167_v2 = vmax.f32 %v5423_v51, 0.0  ;;  %v5425_v29 = vpop.f32.mrb[73].mxu1 }
 0x5bc   : > { %v6169_v53 = vmax.f32 %v6002_v48, 0.0  ;;  %v6004_v7 = vpop.f32.mrb[73].mxu0  ;;  %v6168_v46 = vmax.f32 %v5425_v29, 0.0  ;;  %v5427_v45 = vpop.f32.mrb[74].mxu1 }
 0x5bd   : > { %v6170_v3 = vmax.f32 %v6004_v7, 0.0  ;;  %v6006_v17 = vpop.f32.mrb[74].mxu0  ;;  %v6173_v44 = vmax.f32 %v5427_v45, 0.0  ;;  %v5429_v57 = vpop.f32.mrb[75].mxu1 }
 0x5be   : > { %v6175_v49 = vmax.f32 %v6006_v17, 0.0  ;;  %v6008_v9 = vpop.f32.mrb[75].mxu0  ;;  %v7688_v4 = vpack.c.bf16 %v6168_v46, %v6167_v2  ;;  %v6174_v52 = vmax.f32 %v5429_v57, 0.0 }
 0x5bf   : > { %v7689_v50 = vpack.c.bf16 %v6170_v3, %v6169_v53  ;;  %v6176_v22 = vmax.f32 %v6008_v9, 0.0 }
 0x5c0   : > { %6922 = vst [vmem:[%s9567_s28 + $0x68] sm:$0xff] %v7688_v4  ;;  %v7691_v13 = vpack.c.bf16 %v6174_v52, %v6173_v44 }
 0x5c1   : > { %6923 = vst [vmem:[%s9567_s28 + $0x70] sm:$0xff] %v7689_v50  ;;  %v7692_v10 = vpack.c.bf16 %v6176_v22, %v6175_v49 }
 0x5c2   : > { %6925 = vst [vmem:[%s9567_s28 + $0x80] sm:$0xff] %v7691_v13  ;;  %v5433_v11 = vpop.f32.mrb[76].mxu1 }
 0x5c3   : > { %6926 = vst [vmem:[%s9567_s28 + $0x88] sm:$0xff] %v7692_v10  ;;  %v6012_v32 = vpop.f32.mrb[76].mxu0  ;;  %v6179_v54 = vmax.f32 %v5433_v11, 0.0  ;;  %v5435_v14 = vpop.f32.mrb[77].mxu1 }
 0x5c4   : > { %v6181_v43 = vmax.f32 %v6012_v32, 0.0  ;;  %v6014_v19 = vpop.f32.mrb[77].mxu0  ;;  %v6180_v27 = vmax.f32 %v5435_v14, 0.0  ;;  %v5437_v1 = vpop.f32.mrb[78].mxu1 }
 0x5c5   : > { %v6182_v24 = vmax.f32 %v6014_v19, 0.0  ;;  %v6016_v40 = vpop.f32.mrb[78].mxu0  ;;  %v6185_v34 = vmax.f32 %v5437_v1, 0.0  ;;  %v5439_v30 = vpop.f32.mrb[79].mxu1 }
 0x5c6   : > { %v6187_v62 = vmax.f32 %v6016_v40, 0.0  ;;  %v6018_v42 = vpop.f32.mrb[79].mxu0  ;;  %v7694_v18 = vpack.c.bf16 %v6180_v27, %v6179_v54  ;;  %v6186_v6 = vmax.f32 %v5439_v30, 0.0 }
 0x5c7   : > { %v7695_v26 = vpack.c.bf16 %v6182_v24, %v6181_v43  ;;  %v6188_v23 = vmax.f32 %v6018_v42, 0.0 }
 0x5c8   : > { %6928 = vst [vmem:[%s9567_s28 + $0x98] sm:$0xff] %v7694_v18  ;;  %v7697_v8 = vpack.c.bf16 %v6186_v6, %v6185_v34 }
 0x5c9   : > { %6929 = vst [vmem:[%s9567_s28 + $0xa0] sm:$0xff] %v7695_v26  ;;  %v7698_v15 = vpack.c.bf16 %v6188_v23, %v6187_v62 }
 0x5ca   : > { %6931 = vst [vmem:[%s9567_s28 + $0xb0] sm:$0xff] %v7697_v8  ;;  %v5443_v16 = vpop.f32.mrb[80].mxu1 }
 0x5cb   : > { %6932 = vst [vmem:[%s9567_s28 + $0xb8] sm:$0xff] %v7698_v15  ;;  %v6022_v33 = vpop.f32.mrb[80].mxu0  ;;  %v6191_v39 = vmax.f32 %v5443_v16, 0.0  ;;  %v5445_v5 = vpop.f32.mrb[81].mxu1 }
 0x5cc   : > { %v6193_v37 = vmax.f32 %v6022_v33, 0.0  ;;  %v6024_v60 = vpop.f32.mrb[81].mxu0  ;;  %v6192_v47 = vmax.f32 %v5445_v5, 0.0  ;;  %v5447_v55 = vpop.f32.mrb[82].mxu1 }
 0x5cd   : > { %v6194_v25 = vmax.f32 %v6024_v60, 0.0  ;;  %v6026_v63 = vpop.f32.mrb[82].mxu0  ;;  %v6197_v28 = vmax.f32 %v5447_v55, 0.0  ;;  %v5449_v61 = vpop.f32.mrb[83].mxu1 }
 0x5ce   : > { %v6199_v21 = vmax.f32 %v6026_v63, 0.0  ;;  %v6028_v20 = vpop.f32.mrb[83].mxu0  ;;  %v7700_v0 = vpack.c.bf16 %v6192_v47, %v6191_v39  ;;  %v6198_v35 = vmax.f32 %v5449_v61, 0.0 }
 0x5cf   : > { %v7701_v59 = vpack.c.bf16 %v6194_v25, %v6193_v37  ;;  %v6200_v58 = vmax.f32 %v6028_v20, 0.0 }
 0x5d0   : > { %6934 = vst [vmem:[%s9567_s28 + $0xc8] sm:$0xff] %v7700_v0  ;;  %v7703_v31 = vpack.c.bf16 %v6198_v35, %v6197_v28 }
 0x5d1   : > { %6935 = vst [vmem:[%s9567_s28 + $0xd0] sm:$0xff] %v7701_v59  ;;  %v7704_v41 = vpack.c.bf16 %v6200_v58, %v6199_v21 }
 0x5d2   : > { %6937 = vst [vmem:[%s9567_s28 + $0xe0] sm:$0xff] %v7703_v31  ;;  %v5453_v36 = vpop.f32.mrb[84].mxu1 }
 0x5d3   : > { %6938 = vst [vmem:[%s9567_s28 + $0xe8] sm:$0xff] %v7704_v41  ;;  %v6032_v38 = vpop.f32.mrb[84].mxu0  ;;  %v6203_v12 = vmax.f32 %v5453_v36, 0.0  ;;  %v5455_v51 = vpop.f32.mrb[85].mxu1 }
 0x5d4   : > { %v6205_v56 = vmax.f32 %v6032_v38, 0.0  ;;  %v6034_v48 = vpop.f32.mrb[85].mxu0  ;;  %v6204_v2 = vmax.f32 %v5455_v51, 0.0  ;;  %v5457_v29 = vpop.f32.mrb[86].mxu1 }
 0x5d5   : > { %v6206_v53 = vmax.f32 %v6034_v48, 0.0  ;;  %v6036_v7 = vpop.f32.mrb[86].mxu0  ;;  %v6209_v46 = vmax.f32 %v5457_v29, 0.0  ;;  %v5459_v45 = vpop.f32.mrb[87].mxu1 }
 0x5d6   : > { %v6211_v3 = vmax.f32 %v6036_v7, 0.0  ;;  %v6038_v17 = vpop.f32.mrb[87].mxu0  ;;  %v7706_v44 = vpack.c.bf16 %v6204_v2, %v6203_v12  ;;  %v6210_v57 = vmax.f32 %v5459_v45, 0.0 }
 0x5d7   : > { %v7707_v49 = vpack.c.bf16 %v6206_v53, %v6205_v56  ;;  %v6212_v9 = vmax.f32 %v6038_v17, 0.0 }
 0x5d8   : > { %6940 = vst [vmem:[%s9567_s28 + $0xf8] sm:$0xff] %v7706_v44  ;;  %v7709_v4 = vpack.c.bf16 %v6210_v57, %v6209_v46 }
 0x5d9   : > { %6941 = vst [vmem:[%s9567_s28 + $0x100] sm:$0xff] %v7707_v49  ;;  %v7710_v50 = vpack.c.bf16 %v6212_v9, %v6211_v3 }
 0x5da   : > { %6943 = vst [vmem:[%s9567_s28 + $0x110] sm:$0xff] %v7709_v4  ;;  %v5463_v52 = vpop.f32.mrb[88].mxu1 }
 0x5db   : > { %6944 = vst [vmem:[%s9567_s28 + $0x118] sm:$0xff] %v7710_v50  ;;  %v6042_v22 = vpop.f32.mrb[88].mxu0  ;;  %v6215_v13 = vmax.f32 %v5463_v52, 0.0  ;;  %v5465_v11 = vpop.f32.mrb[89].mxu1 }
 0x5dc   : > { %v6217_v10 = vmax.f32 %v6042_v22, 0.0  ;;  %v6044_v32 = vpop.f32.mrb[89].mxu0  ;;  %v6216_v54 = vmax.f32 %v5465_v11, 0.0  ;;  %v5467_v14 = vpop.f32.mrb[90].mxu1 }
 0x5dd   : > { %v6218_v43 = vmax.f32 %v6044_v32, 0.0  ;;  %v6046_v19 = vpop.f32.mrb[90].mxu0  ;;  %v6221_v27 = vmax.f32 %v5467_v14, 0.0  ;;  %v5469_v1 = vpop.f32.mrb[91].mxu1 }
 0x5de   : > { %v6223_v24 = vmax.f32 %v6046_v19, 0.0  ;;  %v6048_v40 = vpop.f32.mrb[91].mxu0  ;;  %v7712_v34 = vpack.c.bf16 %v6216_v54, %v6215_v13  ;;  %v6222_v30 = vmax.f32 %v5469_v1, 0.0 }
 0x5df   : > { %v7713_v62 = vpack.c.bf16 %v6218_v43, %v6217_v10  ;;  %v6224_v42 = vmax.f32 %v6048_v40, 0.0 }
 0x5e0   : > { %6946 = vst [vmem:[%s9567_s28 + $0x128] sm:$0xff] %v7712_v34  ;;  %v7715_v18 = vpack.c.bf16 %v6222_v30, %v6221_v27 }
 0x5e1   : > { %6947 = vst [vmem:[%s9567_s28 + $0x130] sm:$0xff] %v7713_v62  ;;  %v7716_v26 = vpack.c.bf16 %v6224_v42, %v6223_v24 }
 0x5e2   : > { %6949 = vst [vmem:[%s9567_s28 + $0x140] sm:$0xff] %v7715_v18  ;;  %v5473_v6 = vpop.f32.mrb[92].mxu1 }
 0x5e3   : > { %6950 = vst [vmem:[%s9567_s28 + $0x148] sm:$0xff] %v7716_v26  ;;  %v6052_v23 = vpop.f32.mrb[92].mxu0  ;;  %v6227_v8 = vmax.f32 %v5473_v6, 0.0  ;;  %v5475_v16 = vpop.f32.mrb[93].mxu1 }
 0x5e4   : > { %v6229_v15 = vmax.f32 %v6052_v23, 0.0  ;;  %v6054_v33 = vpop.f32.mrb[93].mxu0  ;;  %v6228_v39 = vmax.f32 %v5475_v16, 0.0  ;;  %v5477_v5 = vpop.f32.mrb[94].mxu1 }
 0x5e5   : > { %v6230_v37 = vmax.f32 %v6054_v33, 0.0  ;;  %v6056_v60 = vpop.f32.mrb[94].mxu0  ;;  %v6233_v47 = vmax.f32 %v5477_v5, 0.0  ;;  %v5479_v55 = vpop.f32.mrb[95].mxu1 }
 0x5e6   : > { %v6235_v25 = vmax.f32 %v6056_v60, 0.0  ;;  %v6058_v63 = vpop.f32.mrb[95].mxu0  ;;  %v7718_v28 = vpack.c.bf16 %v6228_v39, %v6227_v8  ;;  %v6234_v61 = vmax.f32 %v5479_v55, 0.0 }
 0x5e7   : > { %v7719_v21 = vpack.c.bf16 %v6230_v37, %v6229_v15  ;;  %v6236_v20 = vmax.f32 %v6058_v63, 0.0 }
 0x5e8   : > { %6952 = vst [vmem:[%s9567_s28 + $0x158] sm:$0xff] %v7718_v28  ;;  %v7721_v0 = vpack.c.bf16 %v6234_v61, %v6233_v47 }
 0x5e9   : > { %6953 = vst [vmem:[%s9567_s28 + $0x160] sm:$0xff] %v7719_v21  ;;  %v7722_v59 = vpack.c.bf16 %v6236_v20, %v6235_v25 }
 0x5ea   : > { %6955 = vst [vmem:[%s9567_s28 + $0x170] sm:$0xff] %v7721_v0  ;;  %v5483_v35 = vpop.f32.mrb[96].mxu1 }
 0x5eb   : > { %6956 = vst [vmem:[%s9567_s28 + $0x178] sm:$0xff] %v7722_v59  ;;  %v6062_v58 = vpop.f32.mrb[96].mxu0  ;;  %v6239_v31 = vmax.f32 %v5483_v35, 0.0  ;;  %v5485_v36 = vpop.f32.mrb[97].mxu1 }
 0x5ec   : > { %v6241_v41 = vmax.f32 %v6062_v58, 0.0  ;;  %v6064_v38 = vpop.f32.mrb[97].mxu0  ;;  %v6240_v12 = vmax.f32 %v5485_v36, 0.0  ;;  %v5487_v51 = vpop.f32.mrb[98].mxu1 }
 0x5ed   : > { %v6242_v56 = vmax.f32 %v6064_v38, 0.0  ;;  %v6066_v48 = vpop.f32.mrb[98].mxu0  ;;  %v6245_v2 = vmax.f32 %v5487_v51, 0.0  ;;  %v5489_v29 = vpop.f32.mrb[99].mxu1 }
 0x5ee   : > { %v6247_v53 = vmax.f32 %v6066_v48, 0.0  ;;  %v6068_v7 = vpop.f32.mrb[99].mxu0  ;;  %v7724_v46 = vpack.c.bf16 %v6240_v12, %v6239_v31  ;;  %v6246_v45 = vmax.f32 %v5489_v29, 0.0 }
 0x5ef   : > { %v7725_v3 = vpack.c.bf16 %v6242_v56, %v6241_v41  ;;  %v6248_v17 = vmax.f32 %v6068_v7, 0.0 }
 0x5f0   : > { %6958 = vst [vmem:[%s9567_s28 + $0x188] sm:$0xff] %v7724_v46  ;;  %v7727_v44 = vpack.c.bf16 %v6246_v45, %v6245_v2 }
 0x5f1   : > { %6959 = vst [vmem:[%s9567_s28 + $0x190] sm:$0xff] %v7725_v3  ;;  %v7728_v49 = vpack.c.bf16 %v6248_v17, %v6247_v53 }
 0x5f2   : > { %6961 = vst [vmem:[%s9567_s28 + $0x1a0] sm:$0xff] %v7727_v44  ;;  %v5493_v57 = vpop.f32.mrb[100].mxu1 }
 0x5f3   : > { %6962 = vst [vmem:[%s9567_s28 + $0x1a8] sm:$0xff] %v7728_v49  ;;  %v6072_v9 = vpop.f32.mrb[100].mxu0  ;;  %v6251_v4 = vmax.f32 %v5493_v57, 0.0  ;;  %v5495_v52 = vpop.f32.mrb[101].mxu1 }
 0x5f4   : > { %v6253_v50 = vmax.f32 %v6072_v9, 0.0  ;;  %v6074_v22 = vpop.f32.mrb[101].mxu0  ;;  %v6252_v13 = vmax.f32 %v5495_v52, 0.0  ;;  %v5497_v11 = vpop.f32.mrb[102].mxu1 }
 0x5f5   : > { %v6254_v10 = vmax.f32 %v6074_v22, 0.0  ;;  %v6076_v32 = vpop.f32.mrb[102].mxu0  ;;  %v6257_v54 = vmax.f32 %v5497_v11, 0.0  ;;  %v5499_v14 = vpop.f32.mrb[103].mxu1 }
 0x5f6   : > { %v6259_v43 = vmax.f32 %v6076_v32, 0.0  ;;  %v6078_v19 = vpop.f32.mrb[103].mxu0  ;;  %v7730_v27 = vpack.c.bf16 %v6252_v13, %v6251_v4  ;;  %v6258_v1 = vmax.f32 %v5499_v14, 0.0 }
 0x5f7   : > { %v7731_v24 = vpack.c.bf16 %v6254_v10, %v6253_v50  ;;  %v6260_v40 = vmax.f32 %v6078_v19, 0.0 }
 0x5f8   : > { %6964 = vst [vmem:[%s9567_s28 + $0x1b8] sm:$0xff] %v7730_v27  ;;  %v7733_v34 = vpack.c.bf16 %v6258_v1, %v6257_v54 }
 0x5f9   : > { %6965 = vst [vmem:[%s9567_s28 + $0x1c0] sm:$0xff] %v7731_v24  ;;  %v7734_v62 = vpack.c.bf16 %v6260_v40, %v6259_v43 }
 0x5fa   : > { %6967 = vst [vmem:[%s9567_s28 + $0x1d0] sm:$0xff] %v7733_v34  ;;  %v5503_v30 = vpop.f32.mrb[104].mxu1 }
 0x5fb   : > { %6968 = vst [vmem:[%s9567_s28 + $0x1d8] sm:$0xff] %v7734_v62  ;;  %v6082_v42 = vpop.f32.mrb[104].mxu0  ;;  %v6263_v18 = vmax.f32 %v5503_v30, 0.0  ;;  %v5505_v6 = vpop.f32.mrb[105].mxu1 }
 0x5fc   : > { %v6265_v26 = vmax.f32 %v6082_v42, 0.0  ;;  %v6084_v23 = vpop.f32.mrb[105].mxu0  ;;  %v6264_v8 = vmax.f32 %v5505_v6, 0.0  ;;  %v5507_v16 = vpop.f32.mrb[106].mxu1 }
 0x5fd   : > { %v6266_v15 = vmax.f32 %v6084_v23, 0.0  ;;  %v6086_v33 = vpop.f32.mrb[106].mxu0  ;;  %v6269_v39 = vmax.f32 %v5507_v16, 0.0  ;;  %v5509_v5 = vpop.f32.mrb[107].mxu1 }
 0x5fe   : > { %v6271_v37 = vmax.f32 %v6086_v33, 0.0  ;;  %v6088_v60 = vpop.f32.mrb[107].mxu0  ;;  %v7736_v47 = vpack.c.bf16 %v6264_v8, %v6263_v18  ;;  %v6270_v55 = vmax.f32 %v5509_v5, 0.0 }
 0x5ff   : > { %v7737_v25 = vpack.c.bf16 %v6266_v15, %v6265_v26  ;;  %v6272_v63 = vmax.f32 %v6088_v60, 0.0 }
 0x600   : > { %6970 = vst [vmem:[%s9567_s28 + $0x1e8] sm:$0xff] %v7736_v47  ;;  %v7739_v28 = vpack.c.bf16 %v6270_v55, %v6269_v39 }
 0x601   : > { %6971 = vst [vmem:[%s9567_s28 + $0x1f0] sm:$0xff] %v7737_v25  ;;  %v7740_v21 = vpack.c.bf16 %v6272_v63, %v6271_v37 }
 0x602   : > { %6973 = vst [vmem:[%s9567_s28 + $0x200] sm:$0xff] %v7739_v28  ;;  %v5513_v61 = vpop.f32.mrb[108].mxu1 }
 0x603   : > { %6974 = vst [vmem:[%s9567_s28 + $0x208] sm:$0xff] %v7740_v21  ;;  %v6092_v20 = vpop.f32.mrb[108].mxu0  ;;  %v6275_v0 = vmax.f32 %v5513_v61, 0.0  ;;  %v5515_v35 = vpop.f32.mrb[109].mxu1 }
 0x604   : > { %v6277_v59 = vmax.f32 %v6092_v20, 0.0  ;;  %v6094_v58 = vpop.f32.mrb[109].mxu0  ;;  %v6276_v31 = vmax.f32 %v5515_v35, 0.0  ;;  %v5517_v36 = vpop.f32.mrb[110].mxu1 }
 0x605   : > { %v6278_v41 = vmax.f32 %v6094_v58, 0.0  ;;  %v6096_v38 = vpop.f32.mrb[110].mxu0  ;;  %v6281_v12 = vmax.f32 %v5517_v36, 0.0  ;;  %v5519_v51 = vpop.f32.mrb[111].mxu1 }
 0x606   : > { %v6283_v56 = vmax.f32 %v6096_v38, 0.0  ;;  %v6098_v48 = vpop.f32.mrb[111].mxu0  ;;  %v7742_v2 = vpack.c.bf16 %v6276_v31, %v6275_v0  ;;  %v6282_v29 = vmax.f32 %v5519_v51, 0.0 }
 0x607   : > { %v7743_v53 = vpack.c.bf16 %v6278_v41, %v6277_v59  ;;  %v6284_v7 = vmax.f32 %v6098_v48, 0.0 }
 0x608   : > { %6976 = vst [vmem:[%s9567_s28 + $0x218] sm:$0xff] %v7742_v2  ;;  %v7745_v46 = vpack.c.bf16 %v6282_v29, %v6281_v12 }
 0x609   : > { %6977 = vst [vmem:[%s9567_s28 + $0x220] sm:$0xff] %v7743_v53  ;;  %v7746_v3 = vpack.c.bf16 %v6284_v7, %v6283_v56 }
 0x60a   : > { %6979 = vst [vmem:[%s9567_s28 + $0x230] sm:$0xff] %v7745_v46  ;;  %v5523_v45 = vpop.f32.mrb[112].mxu1 }
 0x60b   : > { %6980 = vst [vmem:[%s9567_s28 + $0x238] sm:$0xff] %v7746_v3  ;;  %v6102_v17 = vpop.f32.mrb[112].mxu0  ;;  %v6287_v44 = vmax.f32 %v5523_v45, 0.0  ;;  %v5525_v57 = vpop.f32.mrb[113].mxu1 }
 0x60c   : > { %v6289_v49 = vmax.f32 %v6102_v17, 0.0  ;;  %v6104_v9 = vpop.f32.mrb[113].mxu0  ;;  %v6288_v4 = vmax.f32 %v5525_v57, 0.0  ;;  %v5527_v52 = vpop.f32.mrb[114].mxu1 }
 0x60d   : > { %v6290_v50 = vmax.f32 %v6104_v9, 0.0  ;;  %v6106_v22 = vpop.f32.mrb[114].mxu0  ;;  %v6293_v13 = vmax.f32 %v5527_v52, 0.0  ;;  %v5529_v11 = vpop.f32.mrb[115].mxu1 }
 0x60e   : > { %v6295_v10 = vmax.f32 %v6106_v22, 0.0  ;;  %v6108_v32 = vpop.f32.mrb[115].mxu0  ;;  %v7748_v54 = vpack.c.bf16 %v6288_v4, %v6287_v44  ;;  %v6294_v14 = vmax.f32 %v5529_v11, 0.0 }
 0x60f   : > { %v7749_v43 = vpack.c.bf16 %v6290_v50, %v6289_v49  ;;  %v6296_v19 = vmax.f32 %v6108_v32, 0.0 }
 0x610   : > { %6982 = vst [vmem:[%s9567_s28 + $0x248] sm:$0xff] %v7748_v54  ;;  %v7751_v27 = vpack.c.bf16 %v6294_v14, %v6293_v13 }
 0x611   : > { %6983 = vst [vmem:[%s9567_s28 + $0x250] sm:$0xff] %v7749_v43  ;;  %v7752_v24 = vpack.c.bf16 %v6296_v19, %v6295_v10 }
 0x612   : > { %6985 = vst [vmem:[%s9567_s28 + $0x260] sm:$0xff] %v7751_v27  ;;  %v5533_v1 = vpop.f32.mrb[116].mxu1 }
 0x613   : > { %6986 = vst [vmem:[%s9567_s28 + $0x268] sm:$0xff] %v7752_v24  ;;  %v6112_v40 = vpop.f32.mrb[116].mxu0  ;;  %v6299_v34 = vmax.f32 %v5533_v1, 0.0  ;;  %v5535_v30 = vpop.f32.mrb[117].mxu1 }
 0x614   : > { %v6301_v62 = vmax.f32 %v6112_v40, 0.0  ;;  %v6114_v42 = vpop.f32.mrb[117].mxu0  ;;  %v6300_v18 = vmax.f32 %v5535_v30, 0.0  ;;  %v5537_v6 = vpop.f32.mrb[118].mxu1 }
 0x615   : > { %v6302_v26 = vmax.f32 %v6114_v42, 0.0  ;;  %v6116_v23 = vpop.f32.mrb[118].mxu0  ;;  %v6305_v8 = vmax.f32 %v5537_v6, 0.0  ;;  %v5539_v16 = vpop.f32.mrb[119].mxu1 }
 0x616   : > { %v6307_v15 = vmax.f32 %v6116_v23, 0.0  ;;  %v6118_v33 = vpop.f32.mrb[119].mxu0  ;;  %v7754_v39 = vpack.c.bf16 %v6300_v18, %v6299_v34  ;;  %v6306_v5 = vmax.f32 %v5539_v16, 0.0 }
 0x617   : > { %v7755_v37 = vpack.c.bf16 %v6302_v26, %v6301_v62  ;;  %v6308_v60 = vmax.f32 %v6118_v33, 0.0 }
 0x618   : > { %6988 = vst [vmem:[%s9567_s28 + $0x278] sm:$0xff] %v7754_v39  ;;  %v7757_v47 = vpack.c.bf16 %v6306_v5, %v6305_v8 }
 0x619   : > { %6989 = vst [vmem:[%s9567_s28 + $0x280] sm:$0xff] %v7755_v37  ;;  %v7758_v25 = vpack.c.bf16 %v6308_v60, %v6307_v15 }
 0x61a   : > { %6991 = vst [vmem:[%s9567_s28 + $0x290] sm:$0xff] %v7757_v47  ;;  %v5543_v55 = vpop.f32.mrb[120].mxu1 }
 0x61b   : > { %6992 = vst [vmem:[%s9567_s28 + $0x298] sm:$0xff] %v7758_v25  ;;  %v6122_v63 = vpop.f32.mrb[120].mxu0  ;;  %v6311_v28 = vmax.f32 %v5543_v55, 0.0  ;;  %v5545_v61 = vpop.f32.mrb[121].mxu1 }
 0x61c   : > { %v6313_v21 = vmax.f32 %v6122_v63, 0.0  ;;  %v6124_v20 = vpop.f32.mrb[121].mxu0  ;;  %v6312_v0 = vmax.f32 %v5545_v61, 0.0  ;;  %v5547_v35 = vpop.f32.mrb[122].mxu1 }
 0x61d   : > { %v6314_v59 = vmax.f32 %v6124_v20, 0.0  ;;  %v6126_v58 = vpop.f32.mrb[122].mxu0  ;;  %v6317_v31 = vmax.f32 %v5547_v35, 0.0  ;;  %v5549_v36 = vpop.f32.mrb[123].mxu1 }
 0x61e   : > { %v6319_v41 = vmax.f32 %v6126_v58, 0.0  ;;  %v6128_v38 = vpop.f32.mrb[123].mxu0  ;;  %v7760_v12 = vpack.c.bf16 %v6312_v0, %v6311_v28  ;;  %v6318_v51 = vmax.f32 %v5549_v36, 0.0 }
 0x61f   : > { %v7761_v56 = vpack.c.bf16 %v6314_v59, %v6313_v21  ;;  %v6320_v48 = vmax.f32 %v6128_v38, 0.0 }
 0x620   : > { %6994 = vst [vmem:[%s9567_s28 + $0x2a8] sm:$0xff] %v7760_v12  ;;  %v7763_v2 = vpack.c.bf16 %v6318_v51, %v6317_v31 }
 0x621   : > { %6995 = vst [vmem:[%s9567_s28 + $0x2b0] sm:$0xff] %v7761_v56  ;;  %v7764_v53 = vpack.c.bf16 %v6320_v48, %v6319_v41 }
 0x622   : > { %6997 = vst [vmem:[%s9567_s28 + $0x2c0] sm:$0xff] %v7763_v2  ;;  %v5553_v29 = vpop.f32.mrb[124].mxu1 }
 0x623   : > { %6998 = vst [vmem:[%s9567_s28 + $0x2c8] sm:$0xff] %v7764_v53  ;;  %v6132_v7 = vpop.f32.mrb[124].mxu0  ;;  %v6323_v46 = vmax.f32 %v5553_v29, 0.0  ;;  %v5555_v45 = vpop.f32.mrb[125].mxu1 }
 0x624   : > { %v6325_v3 = vmax.f32 %v6132_v7, 0.0  ;;  %v6134_v17 = vpop.f32.mrb[125].mxu0  ;;  %v6324_v44 = vmax.f32 %v5555_v45, 0.0  ;;  %v5557_v57 = vpop.f32.mrb[126].mxu1 }
 0x625   : > { %v6326_v49 = vmax.f32 %v6134_v17, 0.0  ;;  %v6136_v9 = vpop.f32.mrb[126].mxu0  ;;  %v6329_v4 = vmax.f32 %v5557_v57, 0.0  ;;  %v5559_v52 = vpop.f32.mrb[127].mxu1 }
 0x626   : > { %v6331_v50 = vmax.f32 %v6136_v9, 0.0  ;;  %v6138_v22 = vpop.f32.mrb[127].mxu0  ;;  %v7766_v13 = vpack.c.bf16 %v6324_v44, %v6323_v46  ;;  %v6330_v11 = vmax.f32 %v5559_v52, 0.0 }
 0x627   : > { %v7767_v10 = vpack.c.bf16 %v6326_v49, %v6325_v3  ;;  %v6332_v32 = vmax.f32 %v6138_v22, 0.0 }
 0x628   : > { %7000 = vst [vmem:[%s9567_s28 + $0x2d8] sm:$0xff] %v7766_v13  ;;  %v7769_v54 = vpack.c.bf16 %v6330_v11, %v6329_v4 }
 0x629   : > { %7001 = vst [vmem:[%s9567_s28 + $0x2e0] sm:$0xff] %v7767_v10  ;;  %v7770_v43 = vpack.c.bf16 %v6332_v32, %v6331_v50 }
 0x62a   : > { %7003 = vst [vmem:[%s9567_s28 + $0x2f0] sm:$0xff] %v7769_v54 }
 0x62b   : > { %7004 = vst [vmem:[%s9567_s28 + $0x2f8] sm:$0xff] %v7770_v43 }
 0x62c PF: > { %s11203_s18 = sld [smem:[#allocation17_spill]]  ;;  %s11205_s5 = sld [smem:[#allocation20_spill]] }
 0x62d   : > { %s7020_s22 = sshll.u32 %s9567_s28, 4  ;;  %s11206_s4 = sld [smem:[#allocation78_spill]]  ;;  %s10848_s22 = int_to_ptr.vmem [resolvable:$true] %s7020_s22 }
 0x62e   : > { %s10852_s9 = scalar_lea.sflag [#allocation5], %s258_s13  ;;  %s9086_s6 = scalar_lea.vmem %s10848_s22, 12288 }
 0x62f   : > { %p9087_p2 = scmp.ne.s32.totalorder %s10848_s22, %s9086_s6  ;;  %s9251_s2 = smov [#allocation9]  }
 0x630   : > { %s9090_s29 = sshll.u32 %s9251_s2, 4  ;;  %s9091_s29 = int_to_ptr.vmem [resolvable:$false] %s9090_s29 }
 0x631   : > { %s9092_s10 = scalar_lea.vmem %s9091_s29, 24576  ;;  %p9093_p4 = scmp.lt.s32.totalorder %s10848_s22, %s9091_s29 }
 0x632   : > { %s8223_s11 = smul.u32 12288, %s11203_s18  ;;  %p11207_p10 = scmp.ne.s32.totalorder %s11205_s5, 0 }
 0x633   : > { %p9094_p8 = scmp.lt.s32.totalorder %s9092_s10, %s9086_s6 }
 0x634   : > { %s10846_s21 = scalar_lea.hbm %s11206_s4, %s8223_s11  ;;  %p9088_p0 = pnand %p9087_p2, %p11207_p10 }
 0x635   : > { %p9095_p12 = por %p9094_p8, %p9093_p4 }
 0x636   : > { %p9089_p11 = pneg %p9088_p0 }
 0x638   : > { %p9096_p7 = pnand %p9095_p12, %p9089_p11 }
 0x63a   : > { %9099 = shalt.err (!%p9096_p7)
}
 0x63b   : > { %s9100_s13 = scalar_lea.hbm %s10846_s21, 12288  ;;  %s9104_s7 = scalar_lea.hbm %s11206_s4, 24576 }
 0x63c   : > { %p9101_p6 = scmp.ne.s32.totalorder %s10846_s21, %s9100_s13  ;;  %p9105_p3 = scmp.lt.u32.totalorder %s10846_s21, %s11206_s4 }
 0x63d   : > { %p9106_p9 = scmp.lt.u32.totalorder %s9104_s7, %s9100_s13  ;;  %p9108_p2 = scmp.lt.u32.totalorder %s9100_s13, %s10846_s21 }
 0x63e   : > { %p9102_p13 = pnand %p9101_p6, %p11207_p10 }
 0x63f   : > { %p9107_p5 = por %p9106_p9, %p9105_p3 }
 0x640   : > { %p9103_p1 = pneg %p9102_p13 }
 0x641   : > { %p9109_p0 = por %p9108_p2, %p9107_p5 }
 0x643   : > { %p9110_p11 = pnand %p9109_p0, %p9103_p1 }
 0x645   : > { %9113 = shalt.err (!%p9110_p11)
}
 0x646   : > { %s9252_s11 = smov 384   ;;  %s9253_s27 = smov 24  }
 0x647   : > { %8232 = dma.vmem_to_hbm [thread:$0]  (%p11207_p10), %s10848_s22, 12288, %s10846_s21, %s10852_s9, %s9252_s11, %s9252_s11, %s9253_s27  }
 0x648 PF: > { %s11208_s26 = sld [smem:[#allocation14_spill]]  ;;  %s11209_s6 = sld [smem:[#allocation21_spill]] }
 0x649   : > { %p8252_p4 = scmp.ge.s32.totalorder %s9240_s25, 2 }
 0x64e   : > { %s7035_s2 = sand.u32 1, %s11208_s26   ;;  %p11210_p8 = scmp.ne.s32.totalorder %s11209_s6, 0 }
 0x64f   : > { %s7036_s29 = scalar_lea.sflag [#allocation5], %s7035_s2 }
 0x650   : > { %p8246_p12 = pnand %p8252_p4, %p11210_p8 }
 0x652   : > { %9183 = dma.done.wait (!%p8246_p12), %s7036_s29, 12288  }
 0x653   : > { %9185 = vsyncadd (!%p8246_p12), %s7036_s29, 4294955008  ;;  %s22_s25 = sadd.s32 1, %s9240_s25   ;;  %s11212_s13 = sld [smem:[#allocation15_spill]] }
 0x654   : > { %p10881_p7 = scmp.ge.s32.totalorder %s22_s25, 6   ;;  %s11213_s5 = smov %s9440_s12 }
 0x655   : > { %s11214_s9 = sld [smem:[#allocation22_spill]]  ;;  %s11215_s28 = sld [smem:[#allocation23_spill]] }
 0x656   : > { %s11222_s18 = smov %s9216_s19  ;;  %s11223_s19 = smov %s9220_s20 }
 0x657   : > { %s11224_s20 = smov %s11213_s5  ;;  %s11225_s21 = smov %s9232_s23 }
 0x658   : > { %s11226_s22 = smov %s9236_s24  ;;  %21 = sbr.rel (!%p10881_p7) target bundleno = 15 (0xf), region = 102 }
 0x659   : > { %s11216_s12 = smov %s11212_s13  ;;  %s11217_s13 = smov %s9196_s14 }
 0x65a   : > { %s11218_s14 = smov %s9437_s15  ;;  %s11219_s15 = smov %s9204_s16 }
 0x65b   : > { %s11220_s16 = smov %s9208_s17  ;;  %s11221_s17 = smov %s9493_s30 }
 0x65c   : > { %s11227_s23 = smov %s11214_s9  ;;  %s11228_s24 = smov %s11215_s28 }
 0x65f   :  { %7041 = vsyncpa [#allocation4], 1 }
 0x660   :  { %7043 = vsyncpa [#allocation4 + $0x1], 1 }
 0x661   :  { %7044 = vsyncpa [#allocation7], 1 }
 0x662   :  { %7046 = vsyncpa [#allocation7 + $0x1], 1 }
 0x663   :  { %7047 = vsyncpa [#allocation5], 1 }
 0x664   :  { %7049 = vsyncpa [#allocation5 + $0x1], 1 }

</bundles_post_ra>
